<compile_context>
chip_gen: v6e
topology: v6e:2x2x1
jax: 0.10.0
libtpu: 0.0.40
codegen_flags: <defaults>
</compile_context>

<pallas_src>
import functools
import math

import jax
import jax.numpy as jnp
from jax.experimental import pallas as pl
from jax.experimental.pallas import tpu as pltpu

_VMEM_LIMIT = 32 * 1024 * 1024


def _round_up(v, m):
    return (v + m - 1) // m * m


def _pad2(a, rows, cols, dtype):
    out = jnp.zeros((rows, cols), dtype)
    return out.at[: a.shape[0], : a.shape[1]].set(a.astype(dtype))


def _layernorm(z, w, b, emb):
    """LayerNorm over the first `emb` lanes (lanes >= emb may be zero padding)."""
    d = z.shape[-1]
    inv_n = 1.0 / float(emb)
    if emb != d:
        lane = jax.lax.broadcasted_iota(jnp.int32, z.shape, 1)
        mask = (lane < emb).astype(z.dtype)
        z = z * mask
    mean = jnp.sum(z, axis=-1, keepdims=True) * inv_n
    cent = z - mean
    if emb != d:
        cent = cent * mask
    var = jnp.sum(cent * cent, axis=-1, keepdims=True) * inv_n
    return cent * jax.lax.rsqrt(var + 1e-5) * w + b


# --------------------------------------------------------------------------
# Kernel 1: y = x @ W1   (node-tile grid, bf16 MXU operands, f32 output)
# --------------------------------------------------------------------------
def _xw_kernel(x_ref, w_ref, y_ref):
    y_ref[...] = jnp.dot(
        x_ref[...].astype(jnp.bfloat16),
        w_ref[...],  # already bf16
        preferred_element_type=jnp.float32,
    )


# --------------------------------------------------------------------------
# Kernel 2: per node-row tile i, accumulate A[i,k] @ y[k] over k, then fuse
#   GIN combine -> LayerNorm -> ReLU -> @W2+b2 -> DSLayer LayerNorm -> ReLU
#   -> optional residual add.  vec_ref rows: [b1, ln1w, ln1b, b2, ln2w, ln2b].
# --------------------------------------------------------------------------
def _gin_layer_kernel(eps_ref, a_ref, yk_ref, yi_ref, vec_ref, w2_ref, res_ref,
                      o_ref, acc_ref, *, emb, apply_residual):
    k = pl.program_id(1)

    @pl.when(k == 0)
    def _():
        acc_ref[...] = jnp.zeros_like(acc_ref)

    # Sum aggregation over incoming edges: A (bf16) @ y (cast bf16), f32 acc.
    acc_ref[...] += jnp.dot(
        a_ref[...],
        yk_ref[...].astype(jnp.bfloat16),
        preferred_element_type=jnp.float32,
    )

    @pl.when(k == pl.num_programs(1) - 1)
    def _():
        b1, ln1w, ln1b = vec_ref[0:1, :], vec_ref[1:2, :], vec_ref[2:3, :]
        b2, ln2w, ln2b = vec_ref[3:4, :], vec_ref[4:5, :], vec_ref[5:6, :]

        # GIN combine (W1 already folded into y): z = (1+eps)*y_i + A@y + b1
        z = (1.0 + eps_ref[...]) * yi_ref[...] + acc_ref[...] + b1
        # GIN MLP: LayerNorm -> ReLU -> Linear
        zr = jnp.maximum(_layernorm(z, ln1w, ln1b, emb), 0.0)
        g = jnp.dot(zr.astype(jnp.bfloat16), w2_ref[...],
                    preferred_element_type=jnp.float32) + b2
        # DSLayer epilogue: LayerNorm -> ReLU (-> + residual)
        h = jnp.maximum(_layernorm(g, ln2w, ln2b, emb), 0.0)
        if apply_residual:
            h = h + res_ref[...]
        o_ref[...] = h.astype(o_ref.dtype)


# --------------------------------------------------------------------------
# Kernel 3: segment pooling (P @ x) fused with the final MLP head
#           Linear(emb, 2emb) -> ReLU -> Linear(2emb, num_tasks).
# --------------------------------------------------------------------------
def _pool_head_kernel(p_ref, x_ref, w3_ref, b3_ref, w4_ref, b4_ref, o_ref, acc_ref):
    k = pl.program_id(1)

    @pl.when(k == 0)
    def _():
        acc_ref[...] = jnp.zeros_like(acc_ref)

    acc_ref[...] += jnp.dot(
        p_ref[...],                              # pooling weights (bf16)
        x_ref[...].astype(jnp.bfloat16),
        preferred_element_type=jnp.float32,
    )

    @pl.when(k == pl.num_programs(1) - 1)
    def _():
        h = jnp.dot(acc_ref[...].astype(jnp.bfloat16), w3_ref[...],
                    preferred_element_type=jnp.float32) + b3_ref[...]
        h = jnp.maximum(h, 0.0)
        o_ref[...] = (jnp.dot(h.astype(jnp.bfloat16), w4_ref[...],
                              preferred_element_type=jnp.float32)
                      + b4_ref[...]).astype(o_ref.dtype)


# --------------------------------------------------------------------------
# Wrappers
# --------------------------------------------------------------------------
def _gin_block(x, a_p, p, residual, *, n_pad, tile_m, tile_k):
    """CustomGIN + fused DSLayer LayerNorm/ReLU/residual on a padded graph."""
    f32, bf16 = jnp.float32, jnp.bfloat16
    n, in_dim = x.shape
    emb = p["w1"].shape[1]
    in_pad = _round_up(in_dim, 128)
    emb_pad = _round_up(emb, 128)

    x_p = _pad2(x, n_pad, in_pad, f32)
    w1_p = _pad2(p["w1"], in_pad, emb_pad, bf16)
    w2_p = _pad2(p["w2"], emb_pad, emb_pad, bf16)
    eps_p = p["eps"].astype(f32).reshape(1, 1)

    # Stack all per-feature vectors into a single (8, emb_pad) DMA.
    vec = jnp.zeros((8, emb_pad), f32)
    for r, v in enumerate((p["b1"], p["ln1w"], p["ln1b"],
                           p["b2"], p["ln2w"], p["ln2b"])):
        vec = vec.at[r, :emb].set(v.reshape(-1).astype(f32))

    apply_residual = residual is not None
    if apply_residual:
        res_p = _pad2(residual, n_pad, emb_pad, f32)
        res_spec = pl.BlockSpec((tile_m, emb_pad), lambda i, k: (i, 0))
    else:
        res_p = jnp.zeros((tile_m, emb_pad), f32)
        res_spec = pl.BlockSpec((tile_m, emb_pad), lambda i, k: (0, 0))

    ni = n_pad // tile_m
    nk = n_pad // tile_k

    # ---- Stage 1: y = x @ W1 (W1 reassociated into the aggregation) -------
    y = pl.pallas_call(
        _xw_kernel,
        out_shape=jax.ShapeDtypeStruct((n_pad, emb_pad), f32),
        grid=(ni,),
        in_specs=[pl.BlockSpec((tile_m, in_pad), lambda i: (i, 0)),
                  pl.BlockSpec((in_pad, emb_pad), lambda i: (0, 0))],
        out_specs=pl.BlockSpec((tile_m, emb_pad), lambda i: (i, 0)),
        compiler_params=pltpu.CompilerParams(
            dimension_semantics=("parallel",),
            vmem_limit_bytes=_VMEM_LIMIT),
    )(x_p, w1_p)

    # ---- Stage 2: aggregation + fused MLP/LayerNorm/ReLU/residual ---------
    cost = pl.CostEstimate(
        flops=2 * n_pad * n_pad * emb_pad + 2 * n_pad * emb_pad * emb_pad,
        transcendentals=2 * n_pad,
        bytes_accessed=(n_pad * n_pad * 2            # adjacency (bf16)
                        + 4 * n_pad * emb_pad * 4    # y (x2) + residual + out
                        + emb_pad * emb_pad * 2),    # w2
    )

    out_p = pl.pallas_call(
        functools.partial(_gin_layer_kernel, emb=emb,
                          apply_residual=apply_residual),
        out_shape=jax.ShapeDtypeStruct((n_pad, emb_pad), f32),
        grid=(ni, nk),
        in_specs=[
            pl.BlockSpec((1, 1), lambda i, k: (0, 0)),               # eps
            pl.BlockSpec((tile_m, tile_k), lambda i, k: (i, k)),     # A tile
            pl.BlockSpec((tile_k, emb_pad), lambda i, k: (k, 0)),    # y (agg)
            pl.BlockSpec((tile_m, emb_pad), lambda i, k: (i, 0)),    # y (self)
            pl.BlockSpec((8, emb_pad), lambda i, k: (0, 0)),         # stacked vecs
            pl.BlockSpec((emb_pad, emb_pad), lambda i, k: (0, 0)),   # w2
            res_spec,                                                # residual
        ],
        out_specs=pl.BlockSpec((tile_m, emb_pad), lambda i, k: (i, 0)),
        scratch_shapes=[pltpu.VMEM((tile_m, emb_pad), jnp.float32)],
        compiler_params=pltpu.CompilerParams(
            dimension_semantics=("parallel", "arbitrary"),
            vmem_limit_bytes=_VMEM_LIMIT),
        cost_estimate=cost,
    )(eps_p, a_p, y, y, vec, w2_p, res_p)

    return out_p[:n, :emb]


def _pool_head(pool_mat, x, w3, b3, w4, b4, *, tile_k=512):
    """segment_csr('node', reduce) pooling fused with the final MLP head."""
    f32, bf16 = jnp.float32, jnp.bfloat16
    s, n = pool_mat.shape
    emb = x.shape[1]
    hid, tasks = w3.shape[1], w4.shape[1]
    emb_pad = _round_up(emb, 128)
    hid_pad = _round_up(hid, 128)
    tasks_pad = _round_up(tasks, 128)
    tile_k = min(tile_k, _round_up(n, 128))
    n_pad = _round_up(n, tile_k)
    tile_s = min(256, _round_up(s, 8))
    s_pad = _round_up(s, tile_s)

    p_p = _pad2(pool_mat, s_pad, n_pad, bf16)
    x_p = _pad2(x, n_pad, emb_pad, f32)
    w3_p = _pad2(w3, emb_pad, hid_pad, bf16)
    w4_p = _pad2(w4, hid_pad, tasks_pad, bf16)
    b3_p = _pad2(b3.reshape(1, -1), 1, hid_pad, f32)
    b4_p = _pad2(b4.reshape(1, -1), 1, tasks_pad, f32)

    out_p = pl.pallas_call(
        _pool_head_kernel,
        out_shape=jax.ShapeDtypeStruct((s_pad, tasks_pad), f32),
        grid=(s_pad // tile_s, n_pad // tile_k),
        in_specs=[
            pl.BlockSpec((tile_s, tile_k), lambda i, k: (i, k)),     # pool tile
            pl.BlockSpec((tile_k, emb_pad), lambda i, k: (k, 0)),    # features
            pl.BlockSpec((emb_pad, hid_pad), lambda i, k: (0, 0)),   # w3
            pl.BlockSpec((1, hid_pad), lambda i, k: (0, 0)),         # b3
            pl.BlockSpec((hid_pad, tasks_pad), lambda i, k: (0, 0)), # w4
            pl.BlockSpec((1, tasks_pad), lambda i, k: (0, 0)),       # b4
        ],
        out_specs=pl.BlockSpec((tile_s, tasks_pad), lambda i, k: (i, 0)),
        scratch_shapes=[pltpu.VMEM((tile_s, emb_pad), jnp.float32)],
        compiler_params=pltpu.CompilerParams(
            dimension_semantics=("parallel", "arbitrary"),
            vmem_limit_bytes=_VMEM_LIMIT),
    )(p_p, x_p, w3_p, b3_p, w4_p, b4_p)

    return out_p[:s, :tasks]


@functools.partial(jax.jit, static_argnames=("k", "add_residual"))
def dsnetwork_forward(x, adj, pool_mat, params, *, k, add_residual):
    """DSnetwork forward (eval mode): backbone layers + pooling + head."""
    n = x.shape[0]
    emb = params["layers"][0]["gnn"]["w2"].shape[0]

    tile_m = min(256, _round_up(n, 128))
    tile_k = min(512, _round_up(n, 128))
    n_pad = _round_up(n, math.lcm(tile_m, tile_k))
    a_p = _pad2(adj, n_pad, n_pad, jnp.bfloat16)   # edge counts exact in bf16

    # feature_encoder is module-external; modeled as identity with leading k
    # columns as positional features.
    # TODO(synk): plug in the real feature_encoder.
    pos = x[:, :k]
    h = x
    # TODO(synk): init_linear (add_residual with in_dim != emb_dim) not needed
    #             here since in_dim == emb_dim in this configuration.

    for lp in params["layers"]:
        node_feats = jnp.concatenate([h, pos], axis=-1)
        residual = h if (add_residual and h.shape[1] == emb) else None
        h_new = _gin_block(node_feats, a_p, lp["gnn"], residual,
                           n_pad=n_pad, tile_m=tile_m, tile_k=tile_k)
        p_new = _gin_block(pos, a_p, lp["gnn_pos"], None,
                           n_pad=n_pad, tile_m=tile_m, tile_k=tile_k)
        # TODO(synk): F.dropout is identity at inference; training dropout
        #             would use pltpu.prng_seed/prng_random_bits.
        h, pos = h_new, p_new

    xb = h + pos
    hd = params["head"]
    # reduce_and_predict: ('node', reduce) path fused with the final MLP head.
    # TODO(synk): two-level ('node','subg') and 'subg'-first scatter reductions
    #             are not kernelized.
    return _pool_head(pool_mat, xb, hd["w3"], hd["b3"], hd["w4"], hd["b4"])


# --------------------------------------------------------------------------
# Host-side graph helpers
# --------------------------------------------------------------------------
def build_dense_adjacency(edge_index, num_nodes):
    """A[dst, src] += 1 so that A @ x performs the GIN sum aggregation."""
    src, dst = edge_index[0], edge_index[1]
    return jnp.zeros((num_nodes, num_nodes), jnp.float32).at[dst, src].add(1.0)


def build_pool_matrix(indptr, num_nodes, reduce="mean"):
    """Dense pooling matrix P so that P @ x == segment_csr(x, indptr, reduce)."""
    indptr = jnp.asarray(indptr, jnp.int32)
    num_seg = int(indptr.shape[0]) - 1
    node = jnp.arange(num_nodes)
    seg_id = jnp.searchsorted(indptr[1:], node, side="right")
    p = jnp.zeros((num_seg, num_nodes), jnp.float32).at[seg_id, node].set(1.0)
    if reduce == "mean":
        p = p / jnp.maximum(p.sum(axis=1, keepdims=True), 1.0)
    elif reduce != "sum":
        raise NotImplementedError(reduce)
    return p


# --------------------------------------------------------------------------
# Pure-JAX references
# --------------------------------------------------------------------------
def _gin_ref_f32(x, adj, p):
    aggr = adj @ x
    h = (1.0 + p["eps"][0]) * x + aggr
    z = _layernorm(h @ p["w1"] + p["b1"], p["ln1w"], p["ln1b"], p["w1"].shape[1])
    return jnp.maximum(z, 0.0) @ p["w2"] + p["b2"]


def _gin_ref_matched(x, adj, p):
    bf, f32 = jnp.bfloat16, jnp.float32
    y = jnp.dot(x.astype(bf), p["w1"].astype(bf), preferred_element_type=f32)
    aggr = jnp.dot(adj.astype(bf), y.astype(bf), preferred_element_type=f32)
    z = (1.0 + p["eps"][0]) * y + aggr + p["b1"]
    z = _layernorm(z, p["ln1w"], p["ln1b"], z.shape[-1])
    zr = jnp.maximum(z, 0.0)
    return jnp.dot(zr.astype(bf), p["w2"].astype(bf),
                   preferred_element_type=f32) + p["b2"]


def _reference_forward(x, adj, pool_mat, params, *, k, add_residual, gin_fn,
                       matched):
    bf, f32 = jnp.bfloat16, jnp.float32
    pos, h = x[:, :k], x
    emb = params["layers"][0]["gnn"]["w2"].shape[0]
    for lp in params["layers"]:
        node_feats = jnp.concatenate([h, pos], axis=-1)
        g = gin_fn(node_feats, adj, lp["gnn"])
        h_new = jnp.maximum(
            _layernorm(g, lp["gnn"]["ln2w"], lp["gnn"]["ln2b"], emb), 0.0)
        if add_residual and h.shape[1] == emb:
            h_new = h_new + h
        gp = gin_fn(pos, adj, lp["gnn_pos"])
        p_new = jnp.maximum(
            _layernorm(gp, lp["gnn_pos"]["ln2w"], lp["gnn_pos"]["ln2b"], emb), 0.0)
        h, pos = h_new, p_new
    xb = h + pos
    hd = params["head"]
    if matched:
        pooled = jnp.dot(pool_mat.astype(bf), xb.astype(bf),
                         preferred_element_type=f32)
        hh = jnp.maximum(jnp.dot(pooled.astype(bf), hd["w3"].astype(bf),
                                 preferred_element_type=f32) + hd["b3"], 0.0)
        return jnp.dot(hh.astype(bf), hd["w4"].astype(bf),
                       preferred_element_type=f32) + hd["b4"]
    pooled = pool_mat @ xb
    hh = jnp.maximum(pooled @ hd["w3"] + hd["b3"], 0.0)
    return hh @ hd["w4"] + hd["b4"]


# --------------------------------------------------------------------------
# Demo / self-test
# --------------------------------------------------------------------------
if __name__ == "__main__":
    key = jax.random.PRNGKey(0)
    N, IN_DIM, K_POS, EMB, NUM_LAYERS, NUM_TASKS = 16, 32, 8, 32, 2, 3
    ADD_RESIDUAL = True

    key, kx = jax.random.split(key)
    x = jax.random.normal(kx, (N, IN_DIM), jnp.float32)

    # Deterministic bidirectional ring graph.
    idx = jnp.arange(N)
    src = jnp.concatenate([idx, (idx + 1) % N])
    dst = jnp.concatenate([(idx + 1) % N, idx])
    adj = build_dense_adjacency(jnp.stack([src, dst]), N)

    # 4 subgraphs of 4 nodes each (v_subg_slices indptr), mean reduction.
    indptr = jnp.array([0, 4, 8, 12, 16], jnp.int32)
    pool_mat = build_pool_matrix(indptr, N, reduce="mean")

    def linear_init(k_, fan_in, shape):
        lim = 1.0 / math.sqrt(fan_in)
        return jax.random.uniform(k_, shape, jnp.float32, -lim, lim)

    def make_gin_params(k_, d_in, emb):
        ks = jax.random.split(k_, 4)
        return dict(
            eps=jnp.zeros((1,), jnp.float32),             # train_eps init
            w1=linear_init(ks[0], d_in, (d_in, emb)),
            b1=linear_init(ks[1], d_in, (emb,)),
            ln1w=jnp.ones((emb,), jnp.float32),           # GIN MLP LayerNorm
            ln1b=jnp.zeros((emb,), jnp.float32),
            w2=linear_init(ks[2], emb, (emb, emb)),
            b2=linear_init(ks[3], emb, (emb,)),
            ln2w=jnp.ones((emb,), jnp.float32),           # DSLayer post-norm
            ln2b=jnp.zeros((emb,), jnp.float32),
        )

    layers, d_in, d_pos = [], IN_DIM, K_POS
    for _ in range(NUM_LAYERS):
        key, kg, kp = jax.random.split(key, 3)
        layers.append(dict(gnn=make_gin_params(kg, d_in + d_pos, EMB),
                           gnn_pos=make_gin_params(kp, d_pos, EMB)))
        d_in, d_pos = EMB, EMB

    key, k3, k3b, k4, k4b = jax.random.split(key, 5)
    head = dict(w3=linear_init(k3, EMB, (EMB, 2 * EMB)),
                b3=linear_init(k3b, EMB, (2 * EMB,)),
                w4=linear_init(k4, 2 * EMB, (2 * EMB, NUM_TASKS)),
                b4=linear_init(k4b, 2 * EMB, (NUM_TASKS,)))
    params = dict(layers=layers, head=head)

    out = dsnetwork_forward(x, adj, pool_mat, params,
                            k=K_POS, add_residual=ADD_RESIDUAL)
    out = jax.block_until_ready(out)
    assert out.shape == (4, NUM_TASKS)

    ref_match = _reference_forward(x, adj, pool_mat, params, k=K_POS,
                                   add_residual=ADD_RESIDUAL,
                                   gin_fn=_gin_ref_matched, matched=True)
    ref_f32 = _reference_forward(x, adj, pool_mat, params, k=K_POS,
                                 add_residual=ADD_RESIDUAL,
                                 gin_fn=_gin_ref_f32, matched=False)
    assert jnp.allclose(out, ref_match, atol=5e-3, rtol=5e-3), \
        "mismatch vs matched-precision reference"
    assert jnp.allclose(out, ref_f32, atol=1e-1, rtol=1e-1), \
        "mismatch vs f32 reference"

    print("KERNEL_OK")
</pallas_src>

<mosaic_0001>
module attributes {stable_mosaic.version = 11 : i64} {
  func.func @_xw_kernel(%arg0: i32, %arg1: memref<128x128xf32, #tpu.memory_space<vmem>>, %arg2: memref<128x128xbf16, #tpu.memory_space<vmem>>, %arg3: memref<128x128xf32, #tpu.memory_space<vmem>>) attributes {dimension_semantics = [#tpu.dimension_semantics<parallel>], iteration_bounds = array<i64: 1>, scalar_prefetch = 0 : i64, scratch_operands = 0 : i64, tpu.core_type = #tpu.core_type<tc>, window_params = [{transform_indices = @transform_0, window_bounds = array<i64: 128, 128>}, {pipeline_mode = #tpu.pipeline_mode<synchronous>, transform_indices = @transform_1, window_bounds = array<i64: 128, 128>}, {transform_indices = @transform_2, window_bounds = array<i64: 128, 128>}]} {
    %c0 = arith.constant 0 : index
    %c0_0 = arith.constant 0 : index
    %0 = vector.load %arg1[%c0, %c0_0] : memref<128x128xf32, #tpu.memory_space<vmem>>, vector<128x128xf32>
    %1 = arith.truncf %0 : vector<128x128xf32> to vector<128x128xbf16>
    %c0_1 = arith.constant 0 : index
    %c0_2 = arith.constant 0 : index
    %2 = vector.load %arg2[%c0_1, %c0_2] : memref<128x128xbf16, #tpu.memory_space<vmem>>, vector<128x128xbf16>
    %cst = arith.constant dense<0.000000e+00> : vector<128x128xf32>
    %3 = tpu.matmul %1, %2, %cst {dimension_numbers = #tpu.dot_dimension_numbers<[1], [0], [0], [1], [0, 0, 1, 1], [], []>} : vector<128x128xbf16>, vector<128x128xbf16>, vector<128x128xf32> -> vector<128x128xf32>
    %c0_3 = arith.constant 0 : index
    %c0_4 = arith.constant 0 : index
    %4 = vector.load %arg3[%c0_3, %c0_4] : memref<128x128xf32, #tpu.memory_space<vmem>>, vector<128x128xf32>
    tpu.vector_store %arg3[%c0_3, %c0_4], %3 {strides = array<i32>} : memref<128x128xf32, #tpu.memory_space<vmem>>, vector<128x128xf32>,
    return
  }
  func.func @transform_0(%arg0: i32) -> (i32, i32) {
    %c0_i32 = arith.constant 0 : i32
    %c0_i32_0 = arith.constant 0 : i32
    return %arg0, %c0_i32 : i32, i32
  }
  func.func @transform_1(%arg0: i32) -> (i32, i32) {
    %c0_i32 = arith.constant 0 : i32
    %c0_i32_0 = arith.constant 0 : i32
    %c0_i32_1 = arith.constant 0 : i32
    return %c0_i32, %c0_i32_0 : i32, i32
  }
  func.func @transform_2(%arg0: i32) -> (i32, i32) {
    %c0_i32 = arith.constant 0 : i32
    %c0_i32_0 = arith.constant 0 : i32
    return %arg0, %c0_i32 : i32, i32
  }
}

module attributes {stable_mosaic.version = 11 : i64} {
  func.func @_gin_layer_kernel(%arg0: i32, %arg1: i32, %arg2: memref<1x1xf32, #tpu.memory_space<vmem>>, %arg3: memref<128x128xbf16, #tpu.memory_space<vmem>>, %arg4: memref<128x128xf32, #tpu.memory_space<vmem>>, %arg5: memref<128x128xf32, #tpu.memory_space<vmem>>, %arg6: memref<8x128xf32, #tpu.memory_space<vmem>>, %arg7: memref<128x128xbf16, #tpu.memory_space<vmem>>, %arg8: memref<128x128xf32, #tpu.memory_space<vmem>>, %arg9: memref<128x128xf32, #tpu.memory_space<vmem>>, %arg10: memref<128x128xf32, #tpu.memory_space<vmem>>) attributes {dimension_semantics = [#tpu.dimension_semantics<parallel>, #tpu.dimension_semantics<arbitrary>], iteration_bounds = array<i64: 1, 1>, scalar_prefetch = 0 : i64, scratch_operands = 1 : i64, tpu.core_type = #tpu.core_type<tc>, window_params = [{pipeline_mode = #tpu.pipeline_mode<synchronous>, transform_indices = @transform_0, window_bounds = array<i64: 1, 1>}, {transform_indices = @transform_1, window_bounds = array<i64: 128, 128>}, {transform_indices = @transform_2, window_bounds = array<i64: 128, 128>}, {transform_indices = @transform_3, window_bounds = array<i64: 128, 128>}, {pipeline_mode = #tpu.pipeline_mode<synchronous>, transform_indices = @transform_4, window_bounds = array<i64: 8, 128>}, {pipeline_mode = #tpu.pipeline_mode<synchronous>, transform_indices = @transform_5, window_bounds = array<i64: 128, 128>}, {transform_indices = @transform_6, window_bounds = array<i64: 128, 128>}, {transform_indices = @transform_7, window_bounds = array<i64: 128, 128>}]} {
    %c0_i32 = arith.constant 0 : i32
    %0 = arith.cmpi eq, %arg1, %c0_i32 : i32
    %1 = arith.extui %0 : i1 to i32
    %c0_i32_0 = arith.constant 0 : i32
    %2 = arith.cmpi ne, %1, %c0_i32_0 : i32
    scf.if %2 {
      %cst_10 = arith.constant 0.000000e+00 : f32
      %13 = vector.broadcast %cst_10 : f32 to vector<128x128xf32>
      %c0_11 = arith.constant 0 : index
      %c0_12 = arith.constant 0 : index
      %14 = vector.load %arg10[%c0_11, %c0_12] : memref<128x128xf32, #tpu.memory_space<vmem>>, vector<128x128xf32>
      tpu.vector_store %arg10[%c0_11, %c0_12], %13 {strides = array<i32>} : memref<128x128xf32, #tpu.memory_space<vmem>>, vector<128x128xf32>,
    } else {
    }
    %c0 = arith.constant 0 : index
    %c0_1 = arith.constant 0 : index
    %3 = vector.load %arg10[%c0, %c0_1] : memref<128x128xf32, #tpu.memory_space<vmem>>, vector<128x128xf32>
    %c0_2 = arith.constant 0 : index
    %c0_3 = arith.constant 0 : index
    %4 = vector.load %arg3[%c0_2, %c0_3] : memref<128x128xbf16, #tpu.memory_space<vmem>>, vector<128x128xbf16>
    %c0_4 = arith.constant 0 : index
    %c0_5 = arith.constant 0 : index
    %5 = vector.load %arg4[%c0_4, %c0_5] : memref<128x128xf32, #tpu.memory_space<vmem>>, vector<128x128xf32>
    %6 = arith.truncf %5 : vector<128x128xf32> to vector<128x128xbf16>
    %cst = arith.constant dense<0.000000e+00> : vector<128x128xf32>
    %7 = tpu.matmul %4, %6, %cst {dimension_numbers = #tpu.dot_dimension_numbers<[1], [0], [0], [1], [0, 0, 1, 1], [], []>} : vector<128x128xbf16>, vector<128x128xbf16>, vector<128x128xf32> -> vector<128x128xf32>
    %8 = arith.addf %3, %7 : vector<128x128xf32>
    %c0_6 = arith.constant 0 : index
    %c0_7 = arith.constant 0 : index
    %9 = vector.load %arg10[%c0_6, %c0_7] : memref<128x128xf32, #tpu.memory_space<vmem>>, vector<128x128xf32>
    tpu.vector_store %arg10[%c0_6, %c0_7], %8 {strides = array<i32>} : memref<128x128xf32, #tpu.memory_space<vmem>>, vector<128x128xf32>,
    %c0_i32_8 = arith.constant 0 : i32
    %10 = arith.cmpi eq, %arg1, %c0_i32_8 : i32
    %11 = arith.extui %10 : i1 to i32
    %c0_i32_9 = arith.constant 0 : i32
    %12 = arith.cmpi ne, %11, %c0_i32_9 : i32
    scf.if %12 {
      %c0_10 = arith.constant 0 : index
      %c0_11 = arith.constant 0 : index
      %13 = vector.load %arg6[%c0_10, %c0_11] : memref<8x128xf32, #tpu.memory_space<vmem>>, vector<1x128xf32>
      %c1 = arith.constant 1 : index
      %c0_12 = arith.constant 0 : index
      %14 = vector.load %arg6[%c1, %c0_12] : memref<8x128xf32, #tpu.memory_space<vmem>>, vector<1x128xf32>
      %c2 = arith.constant 2 : index
      %c0_13 = arith.constant 0 : index
      %15 = vector.load %arg6[%c2, %c0_13] : memref<8x128xf32, #tpu.memory_space<vmem>>, vector<1x128xf32>
      %c3 = arith.constant 3 : index
      %c0_14 = arith.constant 0 : index
      %16 = vector.load %arg6[%c3, %c0_14] : memref<8x128xf32, #tpu.memory_space<vmem>>, vector<1x128xf32>
      %c4 = arith.constant 4 : index
      %c0_15 = arith.constant 0 : index
      %17 = vector.load %arg6[%c4, %c0_15] : memref<8x128xf32, #tpu.memory_space<vmem>>, vector<1x128xf32>
      %c5 = arith.constant 5 : index
      %c0_16 = arith.constant 0 : index
      %18 = vector.load %arg6[%c5, %c0_16] : memref<8x128xf32, #tpu.memory_space<vmem>>, vector<1x128xf32>
      %c0_17 = arith.constant 0 : index
      %c0_18 = arith.constant 0 : index
      %19 = vector.load %arg2[%c0_17, %c0_18] : memref<1x1xf32, #tpu.memory_space<vmem>>, vector<1x1xf32>
      %cst_19 = arith.constant 1.000000e+00 : f32
      %20 = vector.broadcast %cst_19 : f32 to vector<1x1xf32>
      %21 = arith.addf %20, %19 : vector<1x1xf32>
      %c0_20 = arith.constant 0 : index
      %c0_21 = arith.constant 0 : index
      %22 = vector.load %arg5[%c0_20, %c0_21] : memref<128x128xf32, #tpu.memory_space<vmem>>, vector<128x128xf32>
      %23 = vector.broadcast %21 : vector<1x1xf32> to vector<128x128xf32>
      %24 = arith.mulf %23, %22 : vector<128x128xf32>
      %c0_22 = arith.constant 0 : index
      %c0_23 = arith.constant 0 : index
      %25 = vector.load %arg10[%c0_22, %c0_23] : memref<128x128xf32, #tpu.memory_space<vmem>>, vector<128x128xf32>
      %26 = arith.addf %24, %25 : vector<128x128xf32>
      %27 = vector.broadcast %13 : vector<1x128xf32> to vector<128x128xf32>
      %28 = arith.addf %26, %27 : vector<128x128xf32>
      %29 = tpu.iota {dimensions = array<i32: 1>} : vector<128x128xi32>
      %c32_i32 = arith.constant 32 : i32
      %30 = vector.broadcast %c32_i32 : i32 to vector<128x128xi32>
      %31 = arith.cmpi slt, %29, %30 : vector<128x128xi32>
      %32 = arith.extui %31 : vector<128x128xi1> to vector<128x128xi32>
      %33 = arith.sitofp %32 : vector<128x128xi32> to vector<128x128xf32>
      %34 = arith.mulf %28, %33 : vector<128x128xf32>
      %cst_24 = arith.constant dense<0.000000e+00> : vector<128xf32>
      %35 = vector.multi_reduction <add>, %34, %cst_24 [1] : vector<128x128xf32> to vector<128xf32>
      %36 = vector.shape_cast %35 : vector<128xf32> to vector<128x1xf32>
      %cst_25 = arith.constant 3.125000e-02 : f32
      %37 = vector.broadcast %cst_25 : f32 to vector<128x1xf32>
      %38 = arith.mulf %36, %37 : vector<128x1xf32>
      %39 = vector.broadcast %38 : vector<128x1xf32> to vector<128x128xf32>
      %40 = arith.subf %34, %39 : vector<128x128xf32>
      %41 = arith.mulf %40, %33 : vector<128x128xf32>
      %42 = arith.mulf %41, %41 : vector<128x128xf32>
      %cst_26 = arith.constant dense<0.000000e+00> : vector<128xf32>
      %43 = vector.multi_reduction <add>, %42, %cst_26 [1] : vector<128x128xf32> to vector<128xf32>
      %44 = vector.shape_cast %43 : vector<128xf32> to vector<128x1xf32>
      %cst_27 = arith.constant 3.125000e-02 : f32
      %45 = vector.broadcast %cst_27 : f32 to vector<128x1xf32>
      %46 = arith.mulf %44, %45 : vector<128x1xf32>
      %cst_28 = arith.constant 9.99999974E-6 : f32
      %47 = vector.broadcast %cst_28 : f32 to vector<128x1xf32>
      %48 = arith.addf %46, %47 : vector<128x1xf32>
      %49 = math.rsqrt %48 : vector<128x1xf32>
      %50 = vector.broadcast %49 : vector<128x1xf32> to vector<128x128xf32>
      %51 = arith.mulf %41, %50 : vector<128x128xf32>
      %52 = vector.broadcast %14 : vector<1x128xf32> to vector<128x128xf32>
      %53 = arith.mulf %51, %52 : vector<128x128xf32>
      %54 = vector.broadcast %15 : vector<1x128xf32> to vector<128x128xf32>
      %55 = arith.addf %53, %54 : vector<128x128xf32>
      %cst_29 = arith.constant 0.000000e+00 : f32
      %56 = vector.broadcast %cst_29 : f32 to vector<128x128xf32>
      %57 = arith.maximumf %55, %56 : vector<128x128xf32>
      %58 = arith.truncf %57 : vector<128x128xf32> to vector<128x128xbf16>
      %c0_30 = arith.constant 0 : index
      %c0_31 = arith.constant 0 : index
      %59 = vector.load %arg7[%c0_30, %c0_31] : memref<128x128xbf16, #tpu.memory_space<vmem>>, vector<128x128xbf16>
      %cst_32 = arith.constant dense<0.000000e+00> : vector<128x128xf32>
      %60 = tpu.matmul %58, %59, %cst_32 {dimension_numbers = #tpu.dot_dimension_numbers<[1], [0], [0], [1], [0, 0, 1, 1], [], []>} : vector<128x128xbf16>, vector<128x128xbf16>, vector<128x128xf32> -> vector<128x128xf32>
      %61 = vector.broadcast %16 : vector<1x128xf32> to vector<128x128xf32>
      %62 = arith.addf %60, %61 : vector<128x128xf32>
      %63 = tpu.iota {dimensions = array<i32: 1>} : vector<128x128xi32>
      %c32_i32_33 = arith.constant 32 : i32
      %64 = vector.broadcast %c32_i32_33 : i32 to vector<128x128xi32>
      %65 = arith.cmpi slt, %63, %64 : vector<128x128xi32>
      %66 = arith.extui %65 : vector<128x128xi1> to vector<128x128xi32>
      %67 = arith.sitofp %66 : vector<128x128xi32> to vector<128x128xf32>
      %68 = arith.mulf %62, %67 : vector<128x128xf32>
      %cst_34 = arith.constant dense<0.000000e+00> : vector<128xf32>
      %69 = vector.multi_reduction <add>, %68, %cst_34 [1] : vector<128x128xf32> to vector<128xf32>
      %70 = vector.shape_cast %69 : vector<128xf32> to vector<128x1xf32>
      %cst_35 = arith.constant 3.125000e-02 : f32
      %71 = vector.broadcast %cst_35 : f32 to vector<128x1xf32>
      %72 = arith.mulf %70, %71 : vector<128x1xf32>
      %73 = vector.broadcast %72 : vector<128x1xf32> to vector<128x128xf32>
      %74 = arith.subf %68, %73 : vector<128x128xf32>
      %75 = arith.mulf %74, %67 : vector<128x128xf32>
      %76 = arith.mulf %75, %75 : vector<128x128xf32>
      %cst_36 = arith.constant dense<0.000000e+00> : vector<128xf32>
      %77 = vector.multi_reduction <add>, %76, %cst_36 [1] : vector<128x128xf32> to vector<128xf32>
      %78 = vector.shape_cast %77 : vector<128xf32> to vector<128x1xf32>
      %cst_37 = arith.constant 3.125000e-02 : f32
      %79 = vector.broadcast %cst_37 : f32 to vector<128x1xf32>
      %80 = arith.mulf %78, %79 : vector<128x1xf32>
      %cst_38 = arith.constant 9.99999974E-6 : f32
      %81 = vector.broadcast %cst_38 : f32 to vector<128x1xf32>
      %82 = arith.addf %80, %81 : vector<128x1xf32>
      %83 = math.rsqrt %82 : vector<128x1xf32>
      %84 = vector.broadcast %83 : vector<128x1xf32> to vector<128x128xf32>
      %85 = arith.mulf %75, %84 : vector<128x128xf32>
      %86 = vector.broadcast %17 : vector<1x128xf32> to vector<128x128xf32>
      %87 = arith.mulf %85, %86 : vector<128x128xf32>
      %88 = vector.broadcast %18 : vector<1x128xf32> to vector<128x128xf32>
      %89 = arith.addf %87, %88 : vector<128x128xf32>
      %cst_39 = arith.constant 0.000000e+00 : f32
      %90 = vector.broadcast %cst_39 : f32 to vector<128x128xf32>
      %91 = arith.maximumf %89, %90 : vector<128x128xf32>
      %c0_40 = arith.constant 0 : index
      %c0_41 = arith.constant 0 : index
      %92 = vector.load %arg8[%c0_40, %c0_41] : memref<128x128xf32, #tpu.memory_space<vmem>>, vector<128x128xf32>
      %93 = arith.addf %91, %92 : vector<128x128xf32>
      %c0_42 = arith.constant 0 : index
      %c0_43 = arith.constant 0 : index
      %94 = vector.load %arg9[%c0_42, %c0_43] : memref<128x128xf32, #tpu.memory_space<vmem>>, vector<128x128xf32>
      tpu.vector_store %arg9[%c0_42, %c0_43], %93 {strides = array<i32>} : memref<128x128xf32, #tpu.memory_space<vmem>>, vector<128x128xf32>,
    } else {
    }
    return
  }
  func.func @transform_0(%arg0: i32, %arg1: i32) -> (i32, i32) {
    %c0_i32 = arith.constant 0 : i32
    %c0_i32_0 = arith.constant 0 : i32
    %c0_i32_1 = arith.constant 0 : i32
    return %c0_i32, %c0_i32_0 : i32, i32
  }
  func.func @transform_1(%arg0: i32, %arg1: i32) -> (i32, i32) {
    %c0_i32 = arith.constant 0 : i32
    return %arg0, %arg1 : i32, i32
  }
  func.func @transform_2(%arg0: i32, %arg1: i32) -> (i32, i32) {
    %c0_i32 = arith.constant 0 : i32
    %c0_i32_0 = arith.constant 0 : i32
    return %arg1, %c0_i32 : i32, i32
  }
  func.func @transform_3(%arg0: i32, %arg1: i32) -> (i32, i32) {
    %c0_i32 = arith.constant 0 : i32
    %c0_i32_0 = arith.constant 0 : i32
    return %arg0, %c0_i32 : i32, i32
  }
  func.func @transform_4(%arg0: i32, %arg1: i32) -> (i32, i32) {
    %c0_i32 = arith.constant 0 : i32
    %c0_i32_0 = arith.constant 0 : i32
    %c0_i32_1 = arith.constant 0 : i32
    return %c0_i32, %c0_i32_0 : i32, i32
  }
  func.func @transform_5(%arg0: i32, %arg1: i32) -> (i32, i32) {
    %c0_i32 = arith.constant 0 : i32
    %c0_i32_0 = arith.constant 0 : i32
    %c0_i32_1 = arith.constant 0 : i32
    return %c0_i32, %c0_i32_0 : i32, i32
  }
  func.func @transform_6(%arg0: i32, %arg1: i32) -> (i32, i32) {
    %c0_i32 = arith.constant 0 : i32
    %c0_i32_0 = arith.constant 0 : i32
    return %arg0, %c0_i32 : i32, i32
  }
  func.func @transform_7(%arg0: i32, %arg1: i32) -> (i32, i32) {
    %c0_i32 = arith.constant 0 : i32
    %c0_i32_0 = arith.constant 0 : i32
    return %arg0, %c0_i32 : i32, i32
  }
}

module attributes {stable_mosaic.version = 11 : i64} {
  func.func @_gin_layer_kernel(%arg0: i32, %arg1: i32, %arg2: memref<1x1xf32, #tpu.memory_space<vmem>>, %arg3: memref<128x128xbf16, #tpu.memory_space<vmem>>, %arg4: memref<128x128xf32, #tpu.memory_space<vmem>>, %arg5: memref<128x128xf32, #tpu.memory_space<vmem>>, %arg6: memref<8x128xf32, #tpu.memory_space<vmem>>, %arg7: memref<128x128xbf16, #tpu.memory_space<vmem>>, %arg8: memref<128x128xf32, #tpu.memory_space<vmem>>, %arg9: memref<128x128xf32, #tpu.memory_space<vmem>>, %arg10: memref<128x128xf32, #tpu.memory_space<vmem>>) attributes {dimension_semantics = [#tpu.dimension_semantics<parallel>, #tpu.dimension_semantics<arbitrary>], iteration_bounds = array<i64: 1, 1>, scalar_prefetch = 0 : i64, scratch_operands = 1 : i64, tpu.core_type = #tpu.core_type<tc>, window_params = [{pipeline_mode = #tpu.pipeline_mode<synchronous>, transform_indices = @transform_0, window_bounds = array<i64: 1, 1>}, {transform_indices = @transform_1, window_bounds = array<i64: 128, 128>}, {transform_indices = @transform_2, window_bounds = array<i64: 128, 128>}, {transform_indices = @transform_3, window_bounds = array<i64: 128, 128>}, {pipeline_mode = #tpu.pipeline_mode<synchronous>, transform_indices = @transform_4, window_bounds = array<i64: 8, 128>}, {pipeline_mode = #tpu.pipeline_mode<synchronous>, transform_indices = @transform_5, window_bounds = array<i64: 128, 128>}, {pipeline_mode = #tpu.pipeline_mode<synchronous>, transform_indices = @transform_6, window_bounds = array<i64: 128, 128>}, {transform_indices = @transform_7, window_bounds = array<i64: 128, 128>}]} {
    %c0_i32 = arith.constant 0 : i32
    %0 = arith.cmpi eq, %arg1, %c0_i32 : i32
    %1 = arith.extui %0 : i1 to i32
    %c0_i32_0 = arith.constant 0 : i32
    %2 = arith.cmpi ne, %1, %c0_i32_0 : i32
    scf.if %2 {
      %cst_10 = arith.constant 0.000000e+00 : f32
      %13 = vector.broadcast %cst_10 : f32 to vector<128x128xf32>
      %c0_11 = arith.constant 0 : index
      %c0_12 = arith.constant 0 : index
      %14 = vector.load %arg10[%c0_11, %c0_12] : memref<128x128xf32, #tpu.memory_space<vmem>>, vector<128x128xf32>
      tpu.vector_store %arg10[%c0_11, %c0_12], %13 {strides = array<i32>} : memref<128x128xf32, #tpu.memory_space<vmem>>, vector<128x128xf32>,
    } else {
    }
    %c0 = arith.constant 0 : index
    %c0_1 = arith.constant 0 : index
    %3 = vector.load %arg10[%c0, %c0_1] : memref<128x128xf32, #tpu.memory_space<vmem>>, vector<128x128xf32>
    %c0_2 = arith.constant 0 : index
    %c0_3 = arith.constant 0 : index
    %4 = vector.load %arg3[%c0_2, %c0_3] : memref<128x128xbf16, #tpu.memory_space<vmem>>, vector<128x128xbf16>
    %c0_4 = arith.constant 0 : index
    %c0_5 = arith.constant 0 : index
    %5 = vector.load %arg4[%c0_4, %c0_5] : memref<128x128xf32, #tpu.memory_space<vmem>>, vector<128x128xf32>
    %6 = arith.truncf %5 : vector<128x128xf32> to vector<128x128xbf16>
    %cst = arith.constant dense<0.000000e+00> : vector<128x128xf32>
    %7 = tpu.matmul %4, %6, %cst {dimension_numbers = #tpu.dot_dimension_numbers<[1], [0], [0], [1], [0, 0, 1, 1], [], []>} : vector<128x128xbf16>, vector<128x128xbf16>, vector<128x128xf32> -> vector<128x128xf32>
    %8 = arith.addf %3, %7 : vector<128x128xf32>
    %c0_6 = arith.constant 0 : index
    %c0_7 = arith.constant 0 : index
    %9 = vector.load %arg10[%c0_6, %c0_7] : memref<128x128xf32, #tpu.memory_space<vmem>>, vector<128x128xf32>
    tpu.vector_store %arg10[%c0_6, %c0_7], %8 {strides = array<i32>} : memref<128x128xf32, #tpu.memory_space<vmem>>, vector<128x128xf32>,
    %c0_i32_8 = arith.constant 0 : i32
    %10 = arith.cmpi eq, %arg1, %c0_i32_8 : i32
    %11 = arith.extui %10 : i1 to i32
    %c0_i32_9 = arith.constant 0 : i32
    %12 = arith.cmpi ne, %11, %c0_i32_9 : i32
    scf.if %12 {
      %c0_10 = arith.constant 0 : index
      %c0_11 = arith.constant 0 : index
      %13 = vector.load %arg6[%c0_10, %c0_11] : memref<8x128xf32, #tpu.memory_space<vmem>>, vector<1x128xf32>
      %c1 = arith.constant 1 : index
      %c0_12 = arith.constant 0 : index
      %14 = vector.load %arg6[%c1, %c0_12] : memref<8x128xf32, #tpu.memory_space<vmem>>, vector<1x128xf32>
      %c2 = arith.constant 2 : index
      %c0_13 = arith.constant 0 : index
      %15 = vector.load %arg6[%c2, %c0_13] : memref<8x128xf32, #tpu.memory_space<vmem>>, vector<1x128xf32>
      %c3 = arith.constant 3 : index
      %c0_14 = arith.constant 0 : index
      %16 = vector.load %arg6[%c3, %c0_14] : memref<8x128xf32, #tpu.memory_space<vmem>>, vector<1x128xf32>
      %c4 = arith.constant 4 : index
      %c0_15 = arith.constant 0 : index
      %17 = vector.load %arg6[%c4, %c0_15] : memref<8x128xf32, #tpu.memory_space<vmem>>, vector<1x128xf32>
      %c5 = arith.constant 5 : index
      %c0_16 = arith.constant 0 : index
      %18 = vector.load %arg6[%c5, %c0_16] : memref<8x128xf32, #tpu.memory_space<vmem>>, vector<1x128xf32>
      %c0_17 = arith.constant 0 : index
      %c0_18 = arith.constant 0 : index
      %19 = vector.load %arg2[%c0_17, %c0_18] : memref<1x1xf32, #tpu.memory_space<vmem>>, vector<1x1xf32>
      %cst_19 = arith.constant 1.000000e+00 : f32
      %20 = vector.broadcast %cst_19 : f32 to vector<1x1xf32>
      %21 = arith.addf %20, %19 : vector<1x1xf32>
      %c0_20 = arith.constant 0 : index
      %c0_21 = arith.constant 0 : index
      %22 = vector.load %arg5[%c0_20, %c0_21] : memref<128x128xf32, #tpu.memory_space<vmem>>, vector<128x128xf32>
      %23 = vector.broadcast %21 : vector<1x1xf32> to vector<128x128xf32>
      %24 = arith.mulf %23, %22 : vector<128x128xf32>
      %c0_22 = arith.constant 0 : index
      %c0_23 = arith.constant 0 : index
      %25 = vector.load %arg10[%c0_22, %c0_23] : memref<128x128xf32, #tpu.memory_space<vmem>>, vector<128x128xf32>
      %26 = arith.addf %24, %25 : vector<128x128xf32>
      %27 = vector.broadcast %13 : vector<1x128xf32> to vector<128x128xf32>
      %28 = arith.addf %26, %27 : vector<128x128xf32>
      %29 = tpu.iota {dimensions = array<i32: 1>} : vector<128x128xi32>
      %c32_i32 = arith.constant 32 : i32
      %30 = vector.broadcast %c32_i32 : i32 to vector<128x128xi32>
      %31 = arith.cmpi slt, %29, %30 : vector<128x128xi32>
      %32 = arith.extui %31 : vector<128x128xi1> to vector<128x128xi32>
      %33 = arith.sitofp %32 : vector<128x128xi32> to vector<128x128xf32>
      %34 = arith.mulf %28, %33 : vector<128x128xf32>
      %cst_24 = arith.constant dense<0.000000e+00> : vector<128xf32>
      %35 = vector.multi_reduction <add>, %34, %cst_24 [1] : vector<128x128xf32> to vector<128xf32>
      %36 = vector.shape_cast %35 : vector<128xf32> to vector<128x1xf32>
      %cst_25 = arith.constant 3.125000e-02 : f32
      %37 = vector.broadcast %cst_25 : f32 to vector<128x1xf32>
      %38 = arith.mulf %36, %37 : vector<128x1xf32>
      %39 = vector.broadcast %38 : vector<128x1xf32> to vector<128x128xf32>
      %40 = arith.subf %34, %39 : vector<128x128xf32>
      %41 = arith.mulf %40, %33 : vector<128x128xf32>
      %42 = arith.mulf %41, %41 : vector<128x128xf32>
      %cst_26 = arith.constant dense<0.000000e+00> : vector<128xf32>
      %43 = vector.multi_reduction <add>, %42, %cst_26 [1] : vector<128x128xf32> to vector<128xf32>
      %44 = vector.shape_cast %43 : vector<128xf32> to vector<128x1xf32>
      %cst_27 = arith.constant 3.125000e-02 : f32
      %45 = vector.broadcast %cst_27 : f32 to vector<128x1xf32>
      %46 = arith.mulf %44, %45 : vector<128x1xf32>
      %cst_28 = arith.constant 9.99999974E-6 : f32
      %47 = vector.broadcast %cst_28 : f32 to vector<128x1xf32>
      %48 = arith.addf %46, %47 : vector<128x1xf32>
      %49 = math.rsqrt %48 : vector<128x1xf32>
      %50 = vector.broadcast %49 : vector<128x1xf32> to vector<128x128xf32>
      %51 = arith.mulf %41, %50 : vector<128x128xf32>
      %52 = vector.broadcast %14 : vector<1x128xf32> to vector<128x128xf32>
      %53 = arith.mulf %51, %52 : vector<128x128xf32>
      %54 = vector.broadcast %15 : vector<1x128xf32> to vector<128x128xf32>
      %55 = arith.addf %53, %54 : vector<128x128xf32>
      %cst_29 = arith.constant 0.000000e+00 : f32
      %56 = vector.broadcast %cst_29 : f32 to vector<128x128xf32>
      %57 = arith.maximumf %55, %56 : vector<128x128xf32>
      %58 = arith.truncf %57 : vector<128x128xf32> to vector<128x128xbf16>
      %c0_30 = arith.constant 0 : index
      %c0_31 = arith.constant 0 : index
      %59 = vector.load %arg7[%c0_30, %c0_31] : memref<128x128xbf16, #tpu.memory_space<vmem>>, vector<128x128xbf16>
      %cst_32 = arith.constant dense<0.000000e+00> : vector<128x128xf32>
      %60 = tpu.matmul %58, %59, %cst_32 {dimension_numbers = #tpu.dot_dimension_numbers<[1], [0], [0], [1], [0, 0, 1, 1], [], []>} : vector<128x128xbf16>, vector<128x128xbf16>, vector<128x128xf32> -> vector<128x128xf32>
      %61 = vector.broadcast %16 : vector<1x128xf32> to vector<128x128xf32>
      %62 = arith.addf %60, %61 : vector<128x128xf32>
      %63 = tpu.iota {dimensions = array<i32: 1>} : vector<128x128xi32>
      %c32_i32_33 = arith.constant 32 : i32
      %64 = vector.broadcast %c32_i32_33 : i32 to vector<128x128xi32>
      %65 = arith.cmpi slt, %63, %64 : vector<128x128xi32>
      %66 = arith.extui %65 : vector<128x128xi1> to vector<128x128xi32>
      %67 = arith.sitofp %66 : vector<128x128xi32> to vector<128x128xf32>
      %68 = arith.mulf %62, %67 : vector<128x128xf32>
      %cst_34 = arith.constant dense<0.000000e+00> : vector<128xf32>
      %69 = vector.multi_reduction <add>, %68, %cst_34 [1] : vector<128x128xf32> to vector<128xf32>
      %70 = vector.shape_cast %69 : vector<128xf32> to vector<128x1xf32>
      %cst_35 = arith.constant 3.125000e-02 : f32
      %71 = vector.broadcast %cst_35 : f32 to vector<128x1xf32>
      %72 = arith.mulf %70, %71 : vector<128x1xf32>
      %73 = vector.broadcast %72 : vector<128x1xf32> to vector<128x128xf32>
      %74 = arith.subf %68, %73 : vector<128x128xf32>
      %75 = arith.mulf %74, %67 : vector<128x128xf32>
      %76 = arith.mulf %75, %75 : vector<128x128xf32>
      %cst_36 = arith.constant dense<0.000000e+00> : vector<128xf32>
      %77 = vector.multi_reduction <add>, %76, %cst_36 [1] : vector<128x128xf32> to vector<128xf32>
      %78 = vector.shape_cast %77 : vector<128xf32> to vector<128x1xf32>
      %cst_37 = arith.constant 3.125000e-02 : f32
      %79 = vector.broadcast %cst_37 : f32 to vector<128x1xf32>
      %80 = arith.mulf %78, %79 : vector<128x1xf32>
      %cst_38 = arith.constant 9.99999974E-6 : f32
      %81 = vector.broadcast %cst_38 : f32 to vector<128x1xf32>
      %82 = arith.addf %80, %81 : vector<128x1xf32>
      %83 = math.rsqrt %82 : vector<128x1xf32>
      %84 = vector.broadcast %83 : vector<128x1xf32> to vector<128x128xf32>
      %85 = arith.mulf %75, %84 : vector<128x128xf32>
      %86 = vector.broadcast %17 : vector<1x128xf32> to vector<128x128xf32>
      %87 = arith.mulf %85, %86 : vector<128x128xf32>
      %88 = vector.broadcast %18 : vector<1x128xf32> to vector<128x128xf32>
      %89 = arith.addf %87, %88 : vector<128x128xf32>
      %cst_39 = arith.constant 0.000000e+00 : f32
      %90 = vector.broadcast %cst_39 : f32 to vector<128x128xf32>
      %91 = arith.maximumf %89, %90 : vector<128x128xf32>
      %c0_40 = arith.constant 0 : index
      %c0_41 = arith.constant 0 : index
      %92 = vector.load %arg9[%c0_40, %c0_41] : memref<128x128xf32, #tpu.memory_space<vmem>>, vector<128x128xf32>
      tpu.vector_store %arg9[%c0_40, %c0_41], %91 {strides = array<i32>} : memref<128x128xf32, #tpu.memory_space<vmem>>, vector<128x128xf32>,
    } else {
    }
    return
  }
  func.func @transform_0(%arg0: i32, %arg1: i32) -> (i32, i32) {
    %c0_i32 = arith.constant 0 : i32
    %c0_i32_0 = arith.constant 0 : i32
    %c0_i32_1 = arith.constant 0 : i32
    return %c0_i32, %c0_i32_0 : i32, i32
  }
  func.func @transform_1(%arg0: i32, %arg1: i32) -> (i32, i32) {
    %c0_i32 = arith.constant 0 : i32
    return %arg0, %arg1 : i32, i32
  }
  func.func @transform_2(%arg0: i32, %arg1: i32) -> (i32, i32) {
    %c0_i32 = arith.constant 0 : i32
    %c0_i32_0 = arith.constant 0 : i32
    return %arg1, %c0_i32 : i32, i32
  }
  func.func @transform_3(%arg0: i32, %arg1: i32) -> (i32, i32) {
    %c0_i32 = arith.constant 0 : i32
    %c0_i32_0 = arith.constant 0 : i32
    return %arg0, %c0_i32 : i32, i32
  }
  func.func @transform_4(%arg0: i32, %arg1: i32) -> (i32, i32) {
    %c0_i32 = arith.constant 0 : i32
    %c0_i32_0 = arith.constant 0 : i32
    %c0_i32_1 = arith.constant 0 : i32
    return %c0_i32, %c0_i32_0 : i32, i32
  }
  func.func @transform_5(%arg0: i32, %arg1: i32) -> (i32, i32) {
    %c0_i32 = arith.constant 0 : i32
    %c0_i32_0 = arith.constant 0 : i32
    %c0_i32_1 = arith.constant 0 : i32
    return %c0_i32, %c0_i32_0 : i32, i32
  }
  func.func @transform_6(%arg0: i32, %arg1: i32) -> (i32, i32) {
    %c0_i32 = arith.constant 0 : i32
    %c0_i32_0 = arith.constant 0 : i32
    %c0_i32_1 = arith.constant 0 : i32
    return %c0_i32, %c0_i32_0 : i32, i32
  }
  func.func @transform_7(%arg0: i32, %arg1: i32) -> (i32, i32) {
    %c0_i32 = arith.constant 0 : i32
    %c0_i32_0 = arith.constant 0 : i32
    return %arg0, %c0_i32 : i32, i32
  }
}

module attributes {stable_mosaic.version = 11 : i64} {
  func.func @_pool_head_kernel(%arg0: i32, %arg1: i32, %arg2: memref<8x128xbf16, #tpu.memory_space<vmem>>, %arg3: memref<128x128xf32, #tpu.memory_space<vmem>>, %arg4: memref<128x128xbf16, #tpu.memory_space<vmem>>, %arg5: memref<1x128xf32, #tpu.memory_space<vmem>>, %arg6: memref<128x128xbf16, #tpu.memory_space<vmem>>, %arg7: memref<1x128xf32, #tpu.memory_space<vmem>>, %arg8: memref<8x128xf32, #tpu.memory_space<vmem>>, %arg9: memref<8x128xf32, #tpu.memory_space<vmem>>) attributes {dimension_semantics = [#tpu.dimension_semantics<parallel>, #tpu.dimension_semantics<arbitrary>], iteration_bounds = array<i64: 1, 1>, scalar_prefetch = 0 : i64, scratch_operands = 1 : i64, tpu.core_type = #tpu.core_type<tc>, window_params = [{transform_indices = @transform_0, window_bounds = array<i64: 8, 128>}, {transform_indices = @transform_1, window_bounds = array<i64: 128, 128>}, {pipeline_mode = #tpu.pipeline_mode<synchronous>, transform_indices = @transform_2, window_bounds = array<i64: 128, 128>}, {pipeline_mode = #tpu.pipeline_mode<synchronous>, transform_indices = @transform_3, window_bounds = array<i64: 1, 128>}, {pipeline_mode = #tpu.pipeline_mode<synchronous>, transform_indices = @transform_4, window_bounds = array<i64: 128, 128>}, {pipeline_mode = #tpu.pipeline_mode<synchronous>, transform_indices = @transform_5, window_bounds = array<i64: 1, 128>}, {transform_indices = @transform_6, window_bounds = array<i64: 8, 128>}]} {
    %c0_i32 = arith.constant 0 : i32
    %0 = arith.cmpi eq, %arg1, %c0_i32 : i32
    %1 = arith.extui %0 : i1 to i32
    %c0_i32_0 = arith.constant 0 : i32
    %2 = arith.cmpi ne, %1, %c0_i32_0 : i32
    scf.if %2 {
      %cst_10 = arith.constant 0.000000e+00 : f32
      %13 = vector.broadcast %cst_10 : f32 to vector<8x128xf32>
      %c0_11 = arith.constant 0 : index
      %c0_12 = arith.constant 0 : index
      %14 = vector.load %arg9[%c0_11, %c0_12] : memref<8x128xf32, #tpu.memory_space<vmem>>, vector<8x128xf32>
      tpu.vector_store %arg9[%c0_11, %c0_12], %13 {strides = array<i32>} : memref<8x128xf32, #tpu.memory_space<vmem>>, vector<8x128xf32>,
    } else {
    }
    %c0 = arith.constant 0 : index
    %c0_1 = arith.constant 0 : index
    %3 = vector.load %arg9[%c0, %c0_1] : memref<8x128xf32, #tpu.memory_space<vmem>>, vector<8x128xf32>
    %c0_2 = arith.constant 0 : index
    %c0_3 = arith.constant 0 : index
    %4 = vector.load %arg2[%c0_2, %c0_3] : memref<8x128xbf16, #tpu.memory_space<vmem>>, vector<8x128xbf16>
    %c0_4 = arith.constant 0 : index
    %c0_5 = arith.constant 0 : index
    %5 = vector.load %arg3[%c0_4, %c0_5] : memref<128x128xf32, #tpu.memory_space<vmem>>, vector<128x128xf32>
    %6 = arith.truncf %5 : vector<128x128xf32> to vector<128x128xbf16>
    %cst = arith.constant dense<0.000000e+00> : vector<8x128xf32>
    %7 = tpu.matmul %4, %6, %cst {dimension_numbers = #tpu.dot_dimension_numbers<[1], [0], [0], [1], [0, 0, 1, 1], [], []>} : vector<8x128xbf16>, vector<128x128xbf16>, vector<8x128xf32> -> vector<8x128xf32>
    %8 = arith.addf %3, %7 : vector<8x128xf32>
    %c0_6 = arith.constant 0 : index
    %c0_7 = arith.constant 0 : index
    %9 = vector.load %arg9[%c0_6, %c0_7] : memref<8x128xf32, #tpu.memory_space<vmem>>, vector<8x128xf32>
    tpu.vector_store %arg9[%c0_6, %c0_7], %8 {strides = array<i32>} : memref<8x128xf32, #tpu.memory_space<vmem>>, vector<8x128xf32>,
    %c0_i32_8 = arith.constant 0 : i32
    %10 = arith.cmpi eq, %arg1, %c0_i32_8 : i32
    %11 = arith.extui %10 : i1 to i32
    %c0_i32_9 = arith.constant 0 : i32
    %12 = arith.cmpi ne, %11, %c0_i32_9 : i32
    scf.if %12 {
      %c0_10 = arith.constant 0 : index
      %c0_11 = arith.constant 0 : index
      %13 = vector.load %arg9[%c0_10, %c0_11] : memref<8x128xf32, #tpu.memory_space<vmem>>, vector<8x128xf32>
      %14 = arith.truncf %13 : vector<8x128xf32> to vector<8x128xbf16>
      %c0_12 = arith.constant 0 : index
      %c0_13 = arith.constant 0 : index
      %15 = vector.load %arg4[%c0_12, %c0_13] : memref<128x128xbf16, #tpu.memory_space<vmem>>, vector<128x128xbf16>
      %cst_14 = arith.constant dense<0.000000e+00> : vector<8x128xf32>
      %16 = tpu.matmul %14, %15, %cst_14 {dimension_numbers = #tpu.dot_dimension_numbers<[1], [0], [0], [1], [0, 0, 1, 1], [], []>} : vector<8x128xbf16>, vector<128x128xbf16>, vector<8x128xf32> -> vector<8x128xf32>
      %c0_15 = arith.constant 0 : index
      %c0_16 = arith.constant 0 : index
      %17 = vector.load %arg5[%c0_15, %c0_16] : memref<1x128xf32, #tpu.memory_space<vmem>>, vector<1x128xf32>
      %18 = vector.broadcast %17 : vector<1x128xf32> to vector<8x128xf32>
      %19 = arith.addf %16, %18 : vector<8x128xf32>
      %cst_17 = arith.constant 0.000000e+00 : f32
      %20 = vector.broadcast %cst_17 : f32 to vector<8x128xf32>
      %21 = arith.maximumf %19, %20 : vector<8x128xf32>
      %22 = arith.truncf %21 : vector<8x128xf32> to vector<8x128xbf16>
      %c0_18 = arith.constant 0 : index
      %c0_19 = arith.constant 0 : index
      %23 = vector.load %arg6[%c0_18, %c0_19] : memref<128x128xbf16, #tpu.memory_space<vmem>>, vector<128x128xbf16>
      %cst_20 = arith.constant dense<0.000000e+00> : vector<8x128xf32>
      %24 = tpu.matmul %22, %23, %cst_20 {dimension_numbers = #tpu.dot_dimension_numbers<[1], [0], [0], [1], [0, 0, 1, 1], [], []>} : vector<8x128xbf16>, vector<128x128xbf16>, vector<8x128xf32> -> vector<8x128xf32>
      %c0_21 = arith.constant 0 : index
      %c0_22 = arith.constant 0 : index
      %25 = vector.load %arg7[%c0_21, %c0_22] : memref<1x128xf32, #tpu.memory_space<vmem>>, vector<1x128xf32>
      %26 = vector.broadcast %25 : vector<1x128xf32> to vector<8x128xf32>
      %27 = arith.addf %24, %26 : vector<8x128xf32>
      %c0_23 = arith.constant 0 : index
      %c0_24 = arith.constant 0 : index
      %28 = vector.load %arg8[%c0_23, %c0_24] : memref<8x128xf32, #tpu.memory_space<vmem>>, vector<8x128xf32>
      tpu.vector_store %arg8[%c0_23, %c0_24], %27 {strides = array<i32>} : memref<8x128xf32, #tpu.memory_space<vmem>>, vector<8x128xf32>,
    } else {
    }
    return
  }
  func.func @transform_0(%arg0: i32, %arg1: i32) -> (i32, i32) {
    %c0_i32 = arith.constant 0 : i32
    return %arg0, %arg1 : i32, i32
  }
  func.func @transform_1(%arg0: i32, %arg1: i32) -> (i32, i32) {
    %c0_i32 = arith.constant 0 : i32
    %c0_i32_0 = arith.constant 0 : i32
    return %arg1, %c0_i32 : i32, i32
  }
  func.func @transform_2(%arg0: i32, %arg1: i32) -> (i32, i32) {
    %c0_i32 = arith.constant 0 : i32
    %c0_i32_0 = arith.constant 0 : i32
    %c0_i32_1 = arith.constant 0 : i32
    return %c0_i32, %c0_i32_0 : i32, i32
  }
  func.func @transform_3(%arg0: i32, %arg1: i32) -> (i32, i32) {
    %c0_i32 = arith.constant 0 : i32
    %c0_i32_0 = arith.constant 0 : i32
    %c0_i32_1 = arith.constant 0 : i32
    return %c0_i32, %c0_i32_0 : i32, i32
  }
  func.func @transform_4(%arg0: i32, %arg1: i32) -> (i32, i32) {
    %c0_i32 = arith.constant 0 : i32
    %c0_i32_0 = arith.constant 0 : i32
    %c0_i32_1 = arith.constant 0 : i32
    return %c0_i32, %c0_i32_0 : i32, i32
  }
  func.func @transform_5(%arg0: i32, %arg1: i32) -> (i32, i32) {
    %c0_i32 = arith.constant 0 : i32
    %c0_i32_0 = arith.constant 0 : i32
    %c0_i32_1 = arith.constant 0 : i32
    return %c0_i32, %c0_i32_0 : i32, i32
  }
  func.func @transform_6(%arg0: i32, %arg1: i32) -> (i32, i32) {
    %c0_i32 = arith.constant 0 : i32
    %c0_i32_0 = arith.constant 0 : i32
    return %arg0, %c0_i32 : i32, i32
  }
}

</mosaic_0001>

<bundles_post_ra>
// kernel: dsnetwork_forward.9
= control target key start
LH: loop header
LB: loop body
LE: loop exit
PB: predicated region body
PF: predicated region fallthrough
CT: control target
= control target key end

     0   :  { %s432_s1 = inlined_call_operand.vmem [shape: bf16[128,128], index: 1, kind: input, shape index: {}]   ;;  %s433_s0 = inlined_call_operand.vmem [shape: f32[128,128], index: 0, kind: input, shape index: {}]   ;;  %s434_s2 = inlined_call_operand.vmem [shape: f32[128,128], index: 2, kind: output, shape index: {}]  }
   0x1   :  { %v289_v0 = vld [vmem:[%s432_s1 + $0x38] sm:$0xff]   ;;  %v290_v1 = vld [vmem:[%s432_s1 + $0x30] sm:$0xff]   ;;  %v291_v2 = vld [vmem:[%s432_s1 + $0x28] sm:$0xff]  }
   0x2   :  { %241 = vmatprep.subr.bf16.mxu0 %v289_v0  ;;  %273 = vmatprep.subr.bf16.mxu1 %v289_v0  ;;  %v292_v3 = vld [vmem:[%s432_s1 + $0x20] sm:$0xff]   ;;  %v13_v5 = vld [vmem:[%s433_s0 + $0x8] sm:$0xff]  ;;  %v293_v10 = vld [vmem:[%s432_s1 + $0x18] sm:$0xff]  }
   0x3   :  { %242 = vmatpush3.bf16.msra.mxu0 %v289_v0  ;;  %281 = vmatpush3.bf16.msra.mxu1 %v289_v0  ;;  %v12_v4 = vld [vmem:[%s433_s0] sm:$0xff]  ;;  %v21_v8 = vld [vmem:[%s433_s0 + $0x48] sm:$0xff]  ;;  %v294_v11 = vld [vmem:[%s432_s1 + $0x10] sm:$0xff]  }
   0x4   :  { %243 = vmatprep.subr.bf16.mxu0 %v290_v1  ;;  %274 = vmatprep.subr.bf16.mxu1 %v290_v1  ;;  %v20_v6 = vld [vmem:[%s433_s0 + $0x40] sm:$0xff]  ;;  %v28_v7 = vpack.c.bf16 %v13_v5, %v12_v4  ;;  %v295_v12 = vld [vmem:[%s432_s1 + $0x8] sm:$0xff]   ;;  %v14_v14 = vld [vmem:[%s433_s0 + $0x10] sm:$0xff] }
   0x5   :  { %v32_v9 = vpack.c.bf16 %v21_v8, %v20_v6  ;;  %v296_v13 = vld [vmem:[%s432_s1] sm:$0xff]   ;;  %v15_v15 = vld [vmem:[%s433_s0 + $0x18] sm:$0xff]  ;;  %v22_v16 = vld [vmem:[%s433_s0 + $0x50] sm:$0xff] }
   0x6   :  { %257 = vmatprep.mubr.bf16.mxu0 %v28_v7  ;;  %v23_v17 = vld [vmem:[%s433_s0 + $0x58] sm:$0xff]  ;;  %v16_v18 = vld [vmem:[%s433_s0 + $0x20] sm:$0xff]  ;;  %v17_v19 = vld [vmem:[%s433_s0 + $0x28] sm:$0xff]  ;;  %v29_v22 = vpack.c.bf16 %v15_v15, %v14_v14 }
   0x7   :  { %244 = vmatpush3.bf16.msra.mxu0 %v290_v1  ;;  %282 = vmatpush3.bf16.msra.mxu1 %v290_v1  ;;  %v24_v20 = vld [vmem:[%s433_s0 + $0x60] sm:$0xff]  ;;  %v25_v21 = vld [vmem:[%s433_s0 + $0x68] sm:$0xff]  ;;  %v33_v23 = vpack.c.bf16 %v23_v17, %v22_v16  ;;  %v30_v24 = vpack.c.bf16 %v17_v19, %v16_v18  ;;  %v18_v26 = vld [vmem:[%s433_s0 + $0x30] sm:$0xff] }
   0x8   :  { %245 = vmatprep.subr.bf16.mxu0 %v291_v2  ;;  %275 = vmatprep.subr.bf16.mxu1 %v291_v2  ;;  %v34_v25 = vpack.c.bf16 %v25_v21, %v24_v20  ;;  %v19_v27 = vld [vmem:[%s433_s0 + $0x38] sm:$0xff]  ;;  %v26_v28 = vld [vmem:[%s433_s0 + $0x70] sm:$0xff] }
   0x9   :  { %265 = vmatprep.mubr.bf16.mxu1 %v32_v9  ;;  %v27_v29 = vld [vmem:[%s433_s0 + $0x78] sm:$0xff]  ;;  %v31_v30 = vpack.c.bf16 %v19_v27, %v18_v26 }
   0xa   :  { %v35_v31 = vpack.c.bf16 %v27_v29, %v26_v28 }
   0xb   :  { %246 = vmatpush3.bf16.msra.mxu0 %v291_v2  ;;  %283 = vmatpush3.bf16.msra.mxu1 %v291_v2 }
   0xc   :  { %247 = vmatprep.subr.bf16.mxu0 %v292_v3  ;;  %276 = vmatprep.subr.bf16.mxu1 %v292_v3 }
   0xf   :  { %248 = vmatpush3.bf16.msra.mxu0 %v292_v3  ;;  %284 = vmatpush3.bf16.msra.mxu1 %v292_v3 }
  0x10   :  { %249 = vmatprep.subr.bf16.mxu0 %v293_v10  ;;  %277 = vmatprep.subr.bf16.mxu1 %v293_v10 }
  0x13   :  { %250 = vmatpush3.bf16.msra.mxu0 %v293_v10  ;;  %285 = vmatpush3.bf16.msra.mxu1 %v293_v10 }
  0x14   :  { %251 = vmatprep.subr.bf16.mxu0 %v294_v11  ;;  %278 = vmatprep.subr.bf16.mxu1 %v294_v11 }
  0x17   :  { %252 = vmatpush3.bf16.msra.mxu0 %v294_v11  ;;  %286 = vmatpush3.bf16.msra.mxu1 %v294_v11 }
  0x18   :  { %253 = vmatprep.subr.bf16.mxu0 %v295_v12  ;;  %279 = vmatprep.subr.bf16.mxu1 %v295_v12 }
  0x1b   :  { %254 = vmatpush3.bf16.msra.mxu0 %v295_v12  ;;  %287 = vmatpush3.bf16.msra.mxu1 %v295_v12 }
  0x1c   :  { %255 = vmatprep.subr.bf16.mxu0 %v296_v13  ;;  %280 = vmatprep.subr.bf16.mxu1 %v296_v13 }
  0x1f   :  { %256 = vmatpush3.bf16.msra.mxu0 %v296_v13  ;;  %288 = vmatpush3.bf16.msra.mxu1 %v296_v13 }
  0x22   :  { %258 = vmatmul.mubr.bf16.vlgmr.msra.gmra.mxu0 %v29_v22  ;;  %266 = vmatmul.mubr.bf16.vlgmr.msra.gmra.mxu1 %v33_v23 }
  0x23   :  { %261 = vmatprep.mubr.bf16.mxu0 %v30_v24  ;;  %269 = vmatprep.mubr.bf16.mxu1 %v34_v25 }
  0x2a   :  { %262 = vmatmul.mubr.bf16.gmra.mxu0 %v31_v30  ;;  %270 = vmatmul.mubr.bf16.gmra.mxu1 %v35_v31 }
  0xe2   :  { %v259_v32 = vpop.f32.mrf.mxu0  ;;  %v267_v33 = vpop.f32.mrf.mxu1 }
  0xe3   :  { %199 = vst [vmem:[%s434_s2 + $0x10] sm:$0xff] %v259_v32  ;;  %207 = vst [vmem:[%s434_s2 + $0x50] sm:$0xff] %v267_v33 }
  0xe4   :  { %v134_v34 = vpop.f32.mrf.mxu0  ;;  %v166_v35 = vpop.f32.mrf.mxu1 }
  0xe5   :  { %197 = vst [vmem:[%s434_s2] sm:$0xff] %v134_v34  ;;  %205 = vst [vmem:[%s434_s2 + $0x40] sm:$0xff] %v166_v35 }
  0xe6   :  { %v260_v36 = vpop.f32.mrf.mxu0  ;;  %v268_v37 = vpop.f32.mrf.mxu1 }
  0xe7   :  { %200 = vst [vmem:[%s434_s2 + $0x18] sm:$0xff] %v260_v36  ;;  %208 = vst [vmem:[%s434_s2 + $0x58] sm:$0xff] %v268_v37 }
  0xe8   :  { %v137_v38 = vpop.f32.mrf.mxu0  ;;  %v169_v39 = vpop.f32.mrf.mxu1 }
  0xe9   :  { %198 = vst [vmem:[%s434_s2 + $0x8] sm:$0xff] %v137_v38  ;;  %206 = vst [vmem:[%s434_s2 + $0x48] sm:$0xff] %v169_v39 }
  0xea   :  { %v263_v40 = vpop.f32.mrf.mxu0  ;;  %v271_v41 = vpop.f32.mrf.mxu1 }
  0xeb   :  { %203 = vst [vmem:[%s434_s2 + $0x30] sm:$0xff] %v263_v40  ;;  %211 = vst [vmem:[%s434_s2 + $0x70] sm:$0xff] %v271_v41 }
  0xec   :  { %v150_v42 = vpop.f32.mrf.mxu0  ;;  %v182_v43 = vpop.f32.mrf.mxu1 }
  0xed   :  { %201 = vst [vmem:[%s434_s2 + $0x20] sm:$0xff] %v150_v42  ;;  %209 = vst [vmem:[%s434_s2 + $0x60] sm:$0xff] %v182_v43 }
  0xee   :  { %v264_v44 = vpop.f32.mrf.mxu0  ;;  %v272_v45 = vpop.f32.mrf.mxu1 }
  0xef   :  { %204 = vst [vmem:[%s434_s2 + $0x38] sm:$0xff] %v264_v44  ;;  %212 = vst [vmem:[%s434_s2 + $0x78] sm:$0xff] %v272_v45 }
  0xf0   :  { %v153_v46 = vpop.f32.mrf.mxu0  ;;  %v185_v47 = vpop.f32.mrf.mxu1 }
  0xf1   :  { %202 = vst [vmem:[%s434_s2 + $0x28] sm:$0xff] %v153_v46  ;;  %210 = vst [vmem:[%s434_s2 + $0x68] sm:$0xff] %v185_v47 }

// kernel: dsnetwork_forward.10
= control target key start
LH: loop header
LB: loop body
LE: loop exit
PB: predicated region body
PF: predicated region fallthrough
CT: control target
= control target key end

     0   :  { %v1346_v3 = vmov 0   ;;  %v310_v11 = vlaneseq  ;;  %v1347_v50 = vmov 0.0   ;;  %s2111_s2 = inlined_call_operand.vmem [shape: f32[128,128], index: 2, kind: input, shape index: {}, may-alias: {2,3}]   ;;  %s2112_s0 = inlined_call_operand.<no memory space> [shape: f32[1,1], index: 0, kind: input, shape index: {}]   ;;  %s2113_s1 = inlined_call_operand.vmem [shape: bf16[128,128], index: 1, kind: input, shape index: {}]   ;;  %s2114_s3 = inlined_call_operand.vmem [shape: f32[128,128], index: 3, kind: input, shape index: {}, may-alias: {2,3}]   ;;  %s2115_s4 = inlined_call_operand.vmem [shape: f32[8,128], index: 4, kind: input, shape index: {}]   ;;  %s2116_s5 = inlined_call_operand.vmem [shape: bf16[128,128], index: 5, kind: input, shape index: {}]   ;;  %s2117_s6 = inlined_call_operand.vmem [shape: f32[128,128], index: 6, kind: input, shape index: {}]   ;;  %s2118_s7 = inlined_call_operand.vmem [shape: f32[128,128], index: 7, kind: output, shape index: {}]  }
   0x1   :  { %v95_v0 = vld [vmem:[%s2111_s2 + $0x70] sm:$0xff]  ;;  %v96_v1 = vld [vmem:[%s2111_s2 + $0x78] sm:$0xff]  ;;  %v93_v2 = vld [vmem:[%s2111_s2 + $0x60] sm:$0xff]  ;;  %1265 = vset.pattern.permute.xlu0 %v1346_v3  ;;  %v12_v4 = vstv %s2112_s0 }
   0x2   :  { %v104_v5 = vpack.c.bf16 %v96_v1, %v95_v0  ;;  %v94_v6 = vld [vmem:[%s2111_s2 + $0x68] sm:$0xff]  ;;  %13 = vst [vmem:[#allocation3] sm:$0x1] %v12_v4  ;;  %v91_v8 = vld [vmem:[%s2111_s2 + $0x50] sm:$0xff]  ;;  %v92_v9 = vld [vmem:[%s2111_s2 + $0x58] sm:$0xff]  ;;  %v311_v15 = vshrl.u32 %v310_v11, 7 }
   0x3   :  { %v103_v7 = vpack.c.bf16 %v94_v6, %v93_v2  ;;  %v89_v10 = vld [vmem:[%s2111_s2 + $0x40] sm:$0xff]  ;;  %v102_v12 = vpack.c.bf16 %v92_v9, %v91_v8  ;;  %v90_v13 = vld [vmem:[%s2111_s2 + $0x48] sm:$0xff]  ;;  %v87_v17 = vld [vmem:[%s2111_s2 + $0x30] sm:$0xff]  ;;  %v387_v42 = vand.u32 127, %v310_v11 }
   0x4   :  { %1199 = vmatprep.subr.bf16.mxu0 %v104_v5  ;;  %v1266_v14 = vld [vmem:[%s2113_s1] sm:$0xff]   ;;  %v101_v16 = vpack.c.bf16 %v90_v13, %v89_v10  ;;  %v88_v18 = vld [vmem:[%s2111_s2 + $0x38] sm:$0xff]  ;;  %v312_v19 = vsub.s32 0, %v311_v15  ;;  %v86_v23 = vld [vmem:[%s2111_s2 + $0x28] sm:$0xff] }
   0x5   :  { %1200 = vmatpush3.bf16.msra.mxu0 %v104_v5  ;;  %1215 = vmatprep.mubr.bf16.mxu0 %v1266_v14  ;;  %v100_v20 = vpack.c.bf16 %v88_v18, %v87_v17  ;;  %v85_v22 = vld [vmem:[%s2111_s2 + $0x20] sm:$0xff]  ;;  %v83_v27 = vld [vmem:[%s2111_s2 + $0x10] sm:$0xff]  ;;  %v84_v28 = vld [vmem:[%s2111_s2 + $0x18] sm:$0xff]  ;;  %vm388_vm0 = vcmp.lt.s32.totalorder %v387_v42, 32 }
   0x6   :  { %1201 = vmatprep.subr.bf16.mxu0 %v103_v7  ;;  %v99_v26 = vpack.c.bf16 %v86_v23, %v85_v22  ;;  %v98_v29 = vpack.c.bf16 %v84_v28, %v83_v27  ;;  %v81_v30 = vld [vmem:[%s2111_s2] sm:$0xff]  ;;  %v82_v31 = vld [vmem:[%s2111_s2 + $0x8] sm:$0xff]  ;;  %v1268_v34 = vld [vmem:[%s2113_s1 + $0x10] sm:$0xff]   ;;  %v1481_v51 = vsel %vm388_vm0, 1.0, %v1347_v50 }
   0x7   :  { %v97_v32 = vpack.c.bf16 %v82_v31, %v81_v30  ;;  %v1267_v33 = vld [vmem:[%s2113_s1 + $0x8] sm:$0xff]   ;;  %v1269_v35 = vld [vmem:[%s2113_s1 + $0x18] sm:$0xff]   ;;  %v1270_v36 = vld [vmem:[%s2113_s1 + $0x20] sm:$0xff]  }
   0x8   :  { %v1271_v37 = vld [vmem:[%s2113_s1 + $0x28] sm:$0xff]   ;;  %v1272_v38 = vld [vmem:[%s2113_s1 + $0x30] sm:$0xff]   ;;  %v1273_v39 = vld [vmem:[%s2113_s1 + $0x38] sm:$0xff]  }
   0x9   :  { %1202 = vmatpush3.bf16.msra.mxu0 %v103_v7  ;;  %v291_v21 = vld [vmem:[#allocation3] sm:$0x1]  ;;  %v295_v41 = vld [vmem:[%s2114_s3 + $0x10] sm:$0xff]  ;;  %v296_v47 = vld [vmem:[%s2114_s3 + $0x18] sm:$0xff] }
   0xa   :  { %1203 = vmatprep.subr.bf16.mxu0 %v102_v12  ;;  %v292_v24 = vadd.f32 1.0, %v291_v21  ;;  %v293_v44 = vld [vmem:[%s2114_s3] sm:$0xff]  ;;  %v294_v53 = vld [vmem:[%s2114_s3 + $0x8] sm:$0xff]  ;;  %v299_v58 = vld [vmem:[%s2114_s3 + $0x30] sm:$0xff] }
   0xb   :  { %v1475_v46 = vld [vmem:[%s2115_s4] ss:$0 sm:$0xff]  ;;  %v303_v13 = vld [vmem:[%s2114_s3 + $0x50] sm:$0xff] }
   0xc   :  { %v313_v25 = vrot.slane %v292_v24, %v312_v19  ;;  %v297_v5 = vld [vmem:[%s2114_s3 + $0x20] sm:$0xff] }
   0xd   :  { %1204 = vmatpush3.bf16.msra.mxu0 %v102_v12  ;;  %v300_v12 = vld [vmem:[%s2114_s3 + $0x38] sm:$0xff] }
   0xe   :  { %1205 = vmatprep.subr.bf16.mxu0 %v101_v16  ;;  %315 = vperm.xlu0 %1265, %v313_v25  }
  0x11   :  { %1206 = vmatpush3.bf16.msra.mxu0 %v101_v16 }
  0x12   :  { %1207 = vmatprep.subr.bf16.mxu0 %v100_v20 }
  0x15   :  { %1208 = vmatpush3.bf16.msra.mxu0 %v100_v20  ;;  %v298_v20 = vld [vmem:[%s2114_s3 + $0x28] sm:$0xff] }
  0x16   :  { %1209 = vmatprep.subr.bf16.mxu0 %v99_v26 }
  0x19   :  { %1210 = vmatpush3.bf16.msra.mxu0 %v99_v26 }
  0x1a   :  { %1211 = vmatprep.subr.bf16.mxu0 %v98_v29 }
  0x1d   :  { %1212 = vmatpush3.bf16.msra.mxu0 %v98_v29  ;;  %v301_v29 = vld [vmem:[%s2114_s3 + $0x40] sm:$0xff] }
  0x1e   :  { %1213 = vmatprep.subr.bf16.mxu0 %v97_v32 }
  0x21   :  { %1214 = vmatpush3.bf16.msra.mxu0 %v97_v32 }
  0x24   :  { %1216 = vmatmul.mubr.bf16.vlgmr.msra.gmra.mxu0 %v1267_v33 }
  0x25   :  { %1219 = vmatprep.mubr.bf16.mxu0 %v1268_v34 }
  0x2c   :  { %1220 = vmatmul.mubr.bf16.gmra.mxu0 %v1269_v35  ;;  %v307_v35 = vld [vmem:[%s2114_s3 + $0x70] sm:$0xff] }
  0x2d   :  { %1223 = vmatprep.mubr.bf16.mxu0 %v1270_v36 }
  0x34   :  { %1224 = vmatmul.mubr.bf16.gmra.mxu0 %v1271_v37  ;;  %v305_v37 = vld [vmem:[%s2114_s3 + $0x60] sm:$0xff] }
  0x35   :  { %1227 = vmatprep.mubr.bf16.mxu0 %v1272_v38 }
  0x3c   :  { %1228 = vmatmul.mubr.bf16.gmra.mxu0 %v1273_v39  ;;  %v302_v39 = vld [vmem:[%s2114_s3 + $0x48] sm:$0xff] }
  0x89   :  { %v1463_v40 = vpop.permute.xlu0 %315 }
  0x8a   :  { %v320_v43 = vmul.f32 %v1463_v40, %v295_v41  ;;  %v318_v49 = vmul.f32 %v1463_v40, %v293_v44  ;;  %v321_v56 = vmul.f32 %v1463_v40, %v296_v47  ;;  %v319_v61 = vmul.f32 %v1463_v40, %v294_v53  ;;  %v304_v53 = vld [vmem:[%s2114_s3 + $0x58] sm:$0xff] }
  0x8b   :  { %v324_v2 = vmul.f32 %v1463_v40, %v299_v58  ;;  %v322_v10 = vmul.f32 %v1463_v40, %v297_v5  ;;  %v325_v18 = vmul.f32 %v1463_v40, %v300_v12  ;;  %v328_v19 = vmul.f32 %v1463_v40, %v303_v13 }
  0x8c   :  { %v323_v27 = vmul.f32 %v1463_v40, %v298_v20  ;;  %v326_v38 = vmul.f32 %v1463_v40, %v301_v29  ;;  %v332_v42 = vmul.f32 %v1463_v40, %v307_v35 }
  0xe4   :  { %v1217_v45 = vpop.f32.mrf.mxu0 }
  0xe5   :  { %v352_v48 = vadd.f32 %v1217_v45, %v320_v43  ;;  %v330_v45 = vmul.f32 %v1463_v40, %v305_v37 }
  0xe6   :  { %v187_v52 = vpop.f32.mrf.mxu0 }
  0xe7   :  { %v372_v54 = vadd.f32 %v1475_v46, %v352_v48  ;;  %v350_v55 = vadd.f32 %v318_v49, %v187_v52  ;;  %v327_v49 = vmul.f32 %v1463_v40, %v302_v39 }
  0xe8   :  { %v1218_v57 = vpop.f32.mrf.mxu0 }
  0xe9   :  { %v370_v59 = vadd.f32 %v1475_v46, %v350_v55  ;;  %v353_v60 = vadd.f32 %v1218_v57, %v321_v56  ;;  %v1494_v62 = vmul.f32 %v1481_v51, %v372_v54 }
  0xea   :  { %v190_v63 = vpop.f32.mrf.mxu0 }
  0xeb   :  { %v373_v0 = vadd.f32 %v1475_v46, %v353_v60  ;;  %v351_v1 = vadd.f32 %v319_v61, %v190_v63  ;;  %411 = vadd.xlane.f32.xlu1 %v1494_v62  ;;  %v1500_v3 = vmul.f32 %v1481_v51, %v370_v59  ;;  %v329_v59 = vmul.f32 %v1463_v40, %v304_v53  ;;  %v306_v63 = vld [vmem:[%s2114_s3 + $0x68] sm:$0xff] }
  0xec   :  { %v1221_v4 = vpop.f32.mrf.mxu0  ;;  %v331_v5 = vmul.f32 %v1463_v40, %v306_v63 }
  0xed   :  { %v371_v6 = vadd.f32 %v1475_v46, %v351_v1  ;;  %v356_v7 = vadd.f32 %v1221_v4, %v324_v2  ;;  %407 = vadd.xlane.f32.xlu0 %v1500_v3  ;;  %v1508_v8 = vmul.f32 %v1481_v51, %v373_v0 }
  0xee   :  { %v203_v9 = vpop.f32.mrf.mxu0 }
  0xef   :  { %413 = vadd.xlane.f32.xlu1 %v1508_v8  ;;  %v376_v14 = vadd.f32 %v1475_v46, %v356_v7  ;;  %v354_v15 = vadd.f32 %v322_v10, %v203_v9  ;;  %v1520_v16 = vmul.f32 %v1481_v51, %v371_v6  ;;  %v308_v7 = vld [vmem:[%s2114_s3 + $0x78] sm:$0xff] }
  0xf0   :  { %v1222_v11 = vpop.f32.mrf.mxu0  ;;  %v333_v12 = vmul.f32 %v1463_v40, %v308_v7 }
  0xf1   :  { %v374_v22 = vadd.f32 %v1475_v46, %v354_v15  ;;  %v357_v23 = vadd.f32 %v1222_v11, %v325_v18  ;;  %v1530_v25 = vmul.f32 %v1481_v51, %v376_v14 }
  0xf2   :  { %v206_v17 = vpop.f32.mrf.mxu0 }
  0xf3   :  { %409 = vadd.xlane.f32.xlu1 %v1520_v16  ;;  %v377_v31 = vadd.f32 %v1475_v46, %v357_v23  ;;  %v355_v32 = vadd.f32 %v323_v27, %v206_v17  ;;  %v1540_v33 = vmul.f32 %v1481_v51, %v374_v22 }
  0xf4   :  { %v1225_v21 = vpop.f32.mrf.mxu0 }
  0xf5   :  { %v360_v24 = vadd.f32 %v1225_v21, %v328_v19  ;;  %v375_v43 = vadd.f32 %v1475_v46, %v355_v32  ;;  %v1561_v47 = vmul.f32 %v1481_v51, %v377_v31 }
  0xf6   :  { %v219_v26 = vpop.f32.mrf.mxu0 }
  0xf7   :  { %v380_v28 = vadd.f32 %v1475_v46, %v360_v24  ;;  %419 = vadd.xlane.f32.xlu1 %v1530_v25  ;;  %v358_v44 = vadd.f32 %v326_v38, %v219_v26  ;;  %v1571_v57 = vmul.f32 %v1481_v51, %v375_v43 }
  0xf8   :  { %v1226_v30 = vpop.f32.mrf.mxu0 }
  0xf9   :  { %v1543_v34 = vmul.f32 %v1481_v51, %v380_v28  ;;  %v378_v54 = vadd.f32 %v1475_v46, %v358_v44  ;;  %v361_v0 = vadd.f32 %v1226_v30, %v329_v59 }
  0xfa   :  { %v222_v36 = vpop.f32.mrf.mxu0 }
  0xfb   :  { %415 = vadd.xlane.f32.xlu1 %v1540_v33  ;;  %427 = vadd.xlane.f32.xlu0 %v1543_v34  ;;  %v359_v55 = vadd.f32 %v327_v49, %v222_v36  ;;  %v1585_v2 = vmul.f32 %v1481_v51, %v378_v54  ;;  %v381_v9 = vadd.f32 %v1475_v46, %v361_v0 }
  0xfc   :  { %v1229_v41 = vpop.f32.mrf.mxu0 }
  0xfd   :  { %v364_v50 = vadd.f32 %v1229_v41, %v332_v42  ;;  %v379_v1 = vadd.f32 %v1475_v46, %v359_v55  ;;  %v1604_v15 = vmul.f32 %v1481_v51, %v381_v9 }
  0xfe   :  { %v235_v48 = vpop.f32.mrf.mxu0 }
  0xff   :  { %v362_v52 = vadd.f32 %v330_v45, %v235_v48  ;;  %421 = vadd.xlane.f32.xlu1 %v1561_v47  ;;  %v384_v60 = vadd.f32 %v1475_v46, %v364_v50  ;;  %v1598_v11 = vmul.f32 %v1481_v51, %v379_v1  ;;  %v1275_v1 = vld [vmem:[%s2116_s5 + $0x30] sm:$0xff]  }
 0x100   :  { %v1230_v58 = vpop.f32.mrf.mxu0 }
 0x101   :  { %v382_v56 = vadd.f32 %v1475_v46, %v362_v52  ;;  %v1590_v6 = vmul.f32 %v1481_v51, %v384_v60  ;;  %v365_v13 = vadd.f32 %v1230_v58, %v333_v12 }
 0x102   :  { %v238_v4 = vpop.f32.mrf.mxu0 }
 0x103   :  { %417 = vadd.xlane.f32.xlu1 %v1571_v57  ;;  %v1577_v61 = vmul.f32 %v1481_v51, %v382_v56  ;;  %v363_v10 = vadd.f32 %v331_v5, %v238_v4  ;;  %v385_v17 = vadd.f32 %v1475_v46, %v365_v13 }
 0x105   :  { %431 = vadd.xlane.f32.xlu0 %v1577_v61  ;;  %v383_v14 = vadd.f32 %v1475_v46, %v363_v10  ;;  %v1613_v19 = vmul.f32 %v1481_v51, %v385_v17 }
 0x107   :  { %423 = vadd.xlane.f32.xlu1 %v1585_v2  ;;  %v1609_v18 = vmul.f32 %v1481_v51, %v383_v14 }
 0x109   :  { %435 = vadd.xlane.f32.xlu0 %v1590_v6 }
 0x10b   :  { %425 = vadd.xlane.f32.xlu1 %v1598_v11 }
 0x10f   :  { %429 = vadd.xlane.f32.xlu1 %v1604_v15 }
 0x113   :  { %433 = vadd.xlane.f32.xlu1 %v1609_v18 }
 0x117   :  { %437 = vadd.xlane.f32.xlu1 %v1613_v19 }
 0x174   :  { %v412_v40 = vpop.xlane.xlu1 %411 }
 0x175   :  { %v441_v20 = vmul.f32 0.03125, %v412_v40 }
 0x176   :  { %v408_v21 = vpop.xlane.xlu0 %407 }
 0x177   :  { %v439_v22 = vmul.f32 0.03125, %v408_v21  ;;  %v457_v24 = vsub.f32 %v1494_v62, %v441_v20 }
 0x178   :  { %v414_v23 = vpop.xlane.xlu1 %413 }
 0x179   :  { %v455_v26 = vsub.f32 %v1500_v3, %v439_v22  ;;  %v442_v46 = vmul.f32 0.03125, %v414_v23  ;;  %v1624_v31 = vmul.f32 %v1481_v51, %v457_v24 }
 0x17b   :  { %v1619_v27 = vmul.f32 %v1481_v51, %v455_v26  ;;  %v458_v32 = vsub.f32 %v1508_v8, %v442_v46  ;;  %v489_v3 = vmul.f32 %v1624_v31, %v1624_v31  ;;  %v1277_v26 = vld [vmem:[%s2116_s5 + $0x20] sm:$0xff]  }
 0x17c   :  { %v410_v28 = vpop.xlane.xlu1 %409 }
 0x17d   :  { %v440_v29 = vmul.f32 0.03125, %v410_v28  ;;  %v487_v30 = vmul.f32 %v1619_v27, %v1619_v27  ;;  %v1636_v39 = vmul.f32 %v1481_v51, %v458_v32 }
 0x17f   :  { %v456_v35 = vsub.f32 %v1520_v16, %v440_v29  ;;  %503 = vadd.xlane.f32.xlu0 %v487_v30  ;;  %v490_v43 = vmul.f32 %v1636_v39, %v1636_v39 }
 0x180   :  { %v420_v62 = vpop.xlane.xlu1 %419 }
 0x181   :  { %v1631_v36 = vmul.f32 %v1481_v51, %v456_v35  ;;  %v445_v37 = vmul.f32 0.03125, %v420_v62 }
 0x183   :  { %507 = vadd.xlane.f32.xlu0 %v489_v3  ;;  %v488_v38 = vmul.f32 %v1631_v36, %v1631_v36  ;;  %v461_v16 = vsub.f32 %v1530_v25, %v445_v37 }
 0x184   :  { %v416_v41 = vpop.xlane.xlu1 %415  ;;  %v428_v45 = vpop.xlane.xlu0 %427 }
 0x185   :  { %v443_v8 = vmul.f32 0.03125, %v416_v41  ;;  %505 = vadd.xlane.f32.xlu1 %v488_v38  ;;  %v1648_v52 = vmul.f32 %v1481_v51, %v461_v16  ;;  %v449_v53 = vmul.f32 0.03125, %v428_v45  ;;  %v1280_v45 = vld [vmem:[%s2116_s5 + $0x8] sm:$0xff]  }
 0x187   :  { %v459_v42 = vsub.f32 %v1540_v33, %v443_v8  ;;  %v1274_v33 = vld [vmem:[%s2116_s5 + $0x38] sm:$0xff]   ;;  %v493_v59 = vmul.f32 %v1648_v52, %v1648_v52 }
 0x188   :  { %v422_v44 = vpop.xlane.xlu1 %421  ;;  %1231 = vmatprep.subr.bf16.mxu1 %v1274_v33 }
 0x189   :  { %509 = vadd.xlane.f32.xlu1 %v490_v43  ;;  %v1643_v48 = vmul.f32 %v1481_v51, %v459_v42  ;;  %v446_v49 = vmul.f32 0.03125, %v422_v44  ;;  %1232 = vmatpush3.bf16.msra.mxu1 %v1274_v33 }
 0x18a   :  { %1233 = vmatprep.subr.bf16.mxu1 %v1275_v1 }
 0x18b   :  { %v491_v50 = vmul.f32 %v1643_v48, %v1643_v48  ;;  %v462_v55 = vsub.f32 %v1561_v47, %v446_v49  ;;  %v465_v47 = vsub.f32 %v1543_v34, %v449_v53  ;;  %v1276_v34 = vld [vmem:[%s2116_s5 + $0x28] sm:$0xff]   ;;  %v1281_v49 = vld [vmem:[%s2116_s5] sm:$0xff]  }
 0x18c   :  { %v418_v25 = vpop.xlane.xlu1 %417 }
 0x18d   :  { %v444_v54 = vmul.f32 0.03125, %v418_v25  ;;  %511 = vadd.xlane.f32.xlu0 %v491_v50  ;;  %v1665_v4 = vmul.f32 %v1481_v51, %v462_v55  ;;  %1234 = vmatpush3.bf16.msra.mxu1 %v1275_v1 }
 0x18e   :  { %v432_v56 = vpop.xlane.xlu0 %431  ;;  %1235 = vmatprep.subr.bf16.mxu1 %v1276_v34 }
 0x18f   :  { %v460_v58 = vsub.f32 %v1571_v57, %v444_v54  ;;  %v451_v57 = vmul.f32 0.03125, %v432_v56  ;;  %v494_v14 = vmul.f32 %v1665_v4, %v1665_v4 }
 0x190   :  { %v424_v60 = vpop.xlane.xlu1 %423 }
 0x191   :  { %v447_v63 = vmul.f32 0.03125, %v424_v60  ;;  %515 = vadd.xlane.f32.xlu0 %v493_v59  ;;  %v1658_v0 = vmul.f32 %v1481_v51, %v460_v58  ;;  %v467_v17 = vsub.f32 %v1577_v61, %v451_v57  ;;  %1236 = vmatpush3.bf16.msra.mxu1 %v1276_v34 }
 0x192   :  { %v436_v9 = vpop.xlane.xlu0 %435  ;;  %1237 = vmatprep.subr.bf16.mxu1 %v1277_v26 }
 0x193   :  { %v463_v5 = vsub.f32 %v1585_v2, %v447_v63  ;;  %v492_v7 = vmul.f32 %v1658_v0, %v1658_v0  ;;  %v1679_v2 = vmul.f32 %v1481_v51, %v465_v47  ;;  %v453_v40 = vmul.f32 0.03125, %v436_v9 }
 0x194   :  { %v426_v10 = vpop.xlane.xlu1 %425  ;;  %v1698_v29 = vmul.f32 %v1481_v51, %v467_v17 }
 0x195   :  { %v448_v12 = vmul.f32 0.03125, %v426_v10  ;;  %513 = vadd.xlane.f32.xlu1 %v492_v7  ;;  %v1671_v13 = vmul.f32 %v1481_v51, %v463_v5  ;;  %v497_v61 = vmul.f32 %v1679_v2, %v1679_v2  ;;  %1238 = vmatpush3.bf16.msra.mxu1 %v1277_v26 }
 0x196   :  { %v499_v3 = vmul.f32 %v1698_v29, %v1698_v29 }
 0x197   :  { %v464_v20 = vsub.f32 %v1598_v11, %v448_v12  ;;  %v495_v21 = vmul.f32 %v1671_v13, %v1671_v13  ;;  %v469_v11 = vsub.f32 %v1590_v6, %v453_v40  ;;  %v1278_v6 = vld [vmem:[%s2116_s5 + $0x18] sm:$0xff]   ;;  %v1739_v12 = vld [vmem:[%s2115_s4 + $0x1] ss:$0 sm:$0xff] }
 0x198   :  { %v430_v22 = vpop.xlane.xlu1 %429  ;;  %1239 = vmatprep.subr.bf16.mxu1 %v1278_v6 }
 0x199   :  { %v450_v23 = vmul.f32 0.03125, %v430_v22  ;;  %517 = vadd.xlane.f32.xlu1 %v494_v14  ;;  %519 = vadd.xlane.f32.xlu0 %v495_v21  ;;  %v1686_v24 = vmul.f32 %v1481_v51, %v464_v20  ;;  %v1712_v37 = vmul.f32 %v1481_v51, %v469_v11  ;;  %v1746_v22 = vld [vmem:[%s2115_s4 + $0x2] ss:$0 sm:$0xff] }
 0x19a   :  { %1240 = vmatpush3.bf16.msra.mxu1 %v1278_v6 }
 0x19b   :  { %v466_v46 = vsub.f32 %v1604_v15, %v450_v23  ;;  %v496_v28 = vmul.f32 %v1686_v24, %v1686_v24  ;;  %v501_v43 = vmul.f32 %v1712_v37, %v1712_v37 }
 0x19c   :  { %v434_v30 = vpop.xlane.xlu1 %433 }
 0x19d   :  { %v452_v32 = vmul.f32 0.03125, %v434_v30  ;;  %521 = vadd.xlane.f32.xlu1 %v496_v28  ;;  %523 = vadd.xlane.f32.xlu0 %v497_v61  ;;  %v1701_v35 = vmul.f32 %v1481_v51, %v466_v46 }
 0x19f   :  { %v468_v15 = vsub.f32 %v1609_v18, %v452_v32  ;;  %v498_v62 = vmul.f32 %v1701_v35, %v1701_v35  ;;  %v1279_v18 = vld [vmem:[%s2116_s5 + $0x10] sm:$0xff]  }
 0x1a0   :  { %v438_v38 = vpop.xlane.xlu1 %437  ;;  %1241 = vmatprep.subr.bf16.mxu1 %v1279_v18 }
 0x1a1   :  { %v454_v41 = vmul.f32 0.03125, %v438_v38  ;;  %525 = vadd.xlane.f32.xlu1 %v498_v62  ;;  %527 = vadd.xlane.f32.xlu0 %v499_v3  ;;  %v1715_v8 = vmul.f32 %v1481_v51, %v468_v15 }
 0x1a2   :  { %1242 = vmatpush3.bf16.msra.mxu1 %v1279_v18 }
 0x1a3   :  { %v470_v16 = vsub.f32 %v1613_v19, %v454_v41  ;;  %v500_v42 = vmul.f32 %v1715_v8, %v1715_v8  ;;  %1243 = vmatprep.subr.bf16.mxu1 %v1280_v45 }
 0x1a5   :  { %529 = vadd.xlane.f32.xlu1 %v500_v42  ;;  %531 = vadd.xlane.f32.xlu0 %v501_v43  ;;  %v1726_v44 = vmul.f32 %v1481_v51, %v470_v16 }
 0x1a6   :  { %1244 = vmatpush3.bf16.msra.mxu1 %v1280_v45 }
 0x1a7   :  { %v502_v19 = vmul.f32 %v1726_v44, %v1726_v44  ;;  %1245 = vmatprep.subr.bf16.mxu1 %v1281_v49 }
 0x1a9   :  { %533 = vadd.xlane.f32.xlu1 %v502_v19 }
 0x1aa   :  { %1246 = vmatpush3.bf16.msra.mxu1 %v1281_v49 }
 0x208   :  { %v504_v50 = vpop.xlane.xlu0 %503 }
 0x209   :  { %v535_v53 = vmul.f32 0.03125, %v504_v50 }
 0x20b   :  { %v551_v25 = vadd.f32 1e-05, %v535_v53 }
 0x20c   :  { %v508_v54 = vpop.xlane.xlu0 %507 }
 0x20d   :  { %1282 = vrsqrt.f32 %v551_v25  ;;  %v537_v33 = vmul.f32 0.03125, %v508_v54 }
 0x20e   :  { %v506_v55 = vpop.xlane.xlu1 %505 }
 0x20f   :  { %v553_v56 = vadd.f32 1e-05, %v537_v33  ;;  %v536_v58 = vmul.f32 0.03125, %v506_v55 }
 0x211   :  { %1284 = vrsqrt.f32 %v553_v56  ;;  %v552_v59 = vadd.f32 1e-05, %v536_v58 }
 0x212   :  { %v510_v60 = vpop.xlane.xlu1 %509 }
 0x213   :  { %1286 = vrsqrt.f32 %v552_v59  ;;  %v538_v63 = vmul.f32 0.03125, %v510_v60 }
 0x215   :  { %v554_v1 = vadd.f32 1e-05, %v538_v63 }
 0x216   :  { %v512_v47 = vpop.xlane.xlu0 %511 }
 0x217   :  { %1288 = vrsqrt.f32 %v554_v1  ;;  %v539_v57 = vmul.f32 0.03125, %v512_v47 }
 0x219   :  { %v555_v5 = vadd.f32 1e-05, %v539_v57 }
 0x21a   :  { %v1283_v7 = vpop.eup %1282  ;;  %v516_v9 = vpop.xlane.xlu0 %515 }
 0x21b   :  { %1290 = vrsqrt.f32 %v555_v5  ;;  %v541_v10 = vmul.f32 0.03125, %v516_v9  ;;  %v583_v34 = vmul.f32 %v1283_v7, %v1619_v27 }
 0x21d   :  { %v557_v14 = vadd.f32 1e-05, %v541_v10  ;;  %v603_v20 = vmul.f32 %v1739_v12, %v583_v34 }
 0x21e   :  { %v1285_v17 = vpop.eup %1284  ;;  %v514_v40 = vpop.xlane.xlu1 %513 }
 0x21f   :  { %1292 = vrsqrt.f32 %v557_v14  ;;  %v540_v21 = vmul.f32 0.03125, %v514_v40  ;;  %v585_v26 = vmul.f32 %v1285_v17, %v1624_v31  ;;  %v623_v28 = vadd.f32 %v1746_v22, %v603_v20 }
 0x220   :  { %v1287_v23 = vpop.eup %1286 }
 0x221   :  { %v556_v61 = vadd.f32 1e-05, %v540_v21  ;;  %v584_v11 = vmul.f32 %v1287_v23, %v1631_v36  ;;  %v605_v62 = vmul.f32 %v1739_v12, %v585_v26  ;;  %v639_v16 = vmax.f32 %v623_v28, 0.0 }
 0x222   :  { %v518_v46 = vpop.xlane.xlu1 %517  ;;  %v520_v27 = vpop.xlane.xlu0 %519 }
 0x223   :  { %1294 = vrsqrt.f32 %v556_v61  ;;  %v542_v30 = vmul.f32 0.03125, %v518_v46  ;;  %v543_v32 = vmul.f32 0.03125, %v520_v27  ;;  %v604_v6 = vmul.f32 %v1739_v12, %v584_v11 }
 0x224   :  { %v1289_v15 = vpop.eup %1288  ;;  %v625_v50 = vadd.f32 %v1746_v22, %v605_v62 }
 0x225   :  { %v558_v3 = vadd.f32 1e-05, %v542_v30  ;;  %v559_v38 = vadd.f32 1e-05, %v543_v32  ;;  %v624_v41 = vadd.f32 %v1746_v22, %v604_v6  ;;  %v586_v31 = vmul.f32 %v1289_v15, %v1636_v39 }
 0x226   :  { %v522_v18 = vpop.xlane.xlu1 %521  ;;  %v524_v36 = vpop.xlane.xlu0 %523  ;;  %v641_v63 = vmax.f32 %v625_v50, 0.0 }
 0x227   :  { %1296 = vrsqrt.f32 %v558_v3  ;;  %v544_v42 = vmul.f32 0.03125, %v522_v18  ;;  %v545_v43 = vmul.f32 0.03125, %v524_v36  ;;  %v640_v45 = vmax.f32 %v624_v41, 0.0 }
 0x228   :  { %v1291_v19 = vpop.eup %1290  ;;  %1298 = vrsqrt.f32 %v559_v38  ;;  %v606_v49 = vmul.f32 %v1739_v12, %v586_v31 }
 0x229   :  { %v560_v53 = vadd.f32 1e-05, %v544_v42  ;;  %v561_v25 = vadd.f32 1e-05, %v545_v43  ;;  %v655_v54 = vpack.c.bf16 %v640_v45, %v639_v16  ;;  %v587_v56 = vmul.f32 %v1291_v19, %v1643_v48 }
 0x22a   :  { %v526_v33 = vpop.xlane.xlu1 %525  ;;  %v528_v55 = vpop.xlane.xlu0 %527  ;;  %v626_v39 = vadd.f32 %v1746_v22, %v606_v49 }
 0x22b   :  { %1300 = vrsqrt.f32 %v560_v53  ;;  %v546_v58 = vmul.f32 0.03125, %v526_v33  ;;  %v547_v59 = vmul.f32 0.03125, %v528_v55  ;;  %1247 = vmatprep.mubr.bf16.mxu1 %v655_v54  ;;  %v607_v10 = vmul.f32 %v1739_v12, %v587_v56 }
 0x22c   :  { %v1293_v60 = vpop.eup %1292  ;;  %1302 = vrsqrt.f32 %v561_v25  ;;  %v642_v1 = vmax.f32 %v626_v39, 0.0 }
 0x22d   :  { %v562_v47 = vadd.f32 1e-05, %v546_v58  ;;  %v563_v57 = vadd.f32 1e-05, %v547_v59  ;;  %v589_v48 = vmul.f32 %v1293_v60, %v1648_v52  ;;  %v627_v26 = vadd.f32 %v1746_v22, %v607_v10 }
 0x22e   :  { %v530_v5 = vpop.xlane.xlu1 %529  ;;  %v532_v7 = vpop.xlane.xlu0 %531  ;;  %v656_v9 = vpack.c.bf16 %v642_v1, %v641_v63 }
 0x22f   :  { %1304 = vrsqrt.f32 %v562_v47  ;;  %v548_v34 = vmul.f32 0.03125, %v530_v5  ;;  %v549_v14 = vmul.f32 0.03125, %v532_v7  ;;  %v609_v46 = vmul.f32 %v1739_v12, %v589_v48 }
 0x230   :  { %v1295_v17 = vpop.eup %1294  ;;  %1306 = vrsqrt.f32 %v563_v57  ;;  %1248 = vmatmul.mubr.bf16.vlgmr.msra.gmra.mxu1 %v656_v9  ;;  %v643_v6 = vmax.f32 %v627_v26, 0.0 }
 0x231   :  { %v564_v40 = vadd.f32 1e-05, %v548_v34  ;;  %v565_v20 = vadd.f32 1e-05, %v549_v14  ;;  %v588_v21 = vmul.f32 %v1295_v17, %v1658_v0  ;;  %v629_v3 = vadd.f32 %v1746_v22, %v609_v46 }
 0x232   :  { %v534_v23 = vpop.xlane.xlu1 %533 }
 0x233   :  { %1308 = vrsqrt.f32 %v564_v40  ;;  %v550_v61 = vmul.f32 0.03125, %v534_v23  ;;  %v608_v11 = vmul.f32 %v1739_v12, %v588_v21  ;;  %v645_v42 = vmax.f32 %v629_v3, 0.0 }
 0x234   :  { %v1297_v27 = vpop.eup %1296  ;;  %1310 = vrsqrt.f32 %v565_v20 }
 0x235   :  { %v1299_v28 = vpop.eup %1298  ;;  %v566_v52 = vadd.f32 1e-05, %v550_v61  ;;  %v628_v30 = vadd.f32 %v1746_v22, %v608_v11  ;;  %v590_v32 = vmul.f32 %v1297_v27, %v1665_v4  ;;  %v1156_v61 = vld [vmem:[%s2115_s4 + $0x3] ss:$0 sm:$0xff] }
 0x236   :  { %v591_v0 = vmul.f32 %v1299_v28, %v1671_v13 }
 0x237   :  { %1312 = vrsqrt.f32 %v566_v52  ;;  %v644_v15 = vmax.f32 %v628_v30, 0.0  ;;  %v610_v62 = vmul.f32 %v1739_v12, %v590_v32 }
 0x238   :  { %v1301_v38 = vpop.eup %1300  ;;  %v611_v41 = vmul.f32 %v1739_v12, %v591_v0 }
 0x239   :  { %v1303_v31 = vpop.eup %1302  ;;  %v657_v18 = vpack.c.bf16 %v644_v15, %v643_v6  ;;  %v630_v36 = vadd.f32 %v1746_v22, %v610_v62  ;;  %v592_v16 = vmul.f32 %v1301_v38, %v1686_v24 }
 0x23a   :  { %v593_v4 = vmul.f32 %v1303_v31, %v1679_v2  ;;  %v631_v45 = vadd.f32 %v1746_v22, %v611_v41 }
 0x23b   :  { %1251 = vmatprep.mubr.bf16.mxu1 %v657_v18  ;;  %v646_v13 = vmax.f32 %v630_v36, 0.0  ;;  %v612_v43 = vmul.f32 %v1739_v12, %v592_v16 }
 0x23c   :  { %v1305_v19 = vpop.eup %1304  ;;  %v613_v49 = vmul.f32 %v1739_v12, %v593_v4  ;;  %v647_v2 = vmax.f32 %v631_v45, 0.0 }
 0x23d   :  { %v1307_v50 = vpop.eup %1306  ;;  %v658_v53 = vpack.c.bf16 %v646_v13, %v645_v42  ;;  %v632_v25 = vadd.f32 %v1746_v22, %v612_v43  ;;  %v594_v54 = vmul.f32 %v1305_v19, %v1701_v35 }
 0x23e   :  { %v595_v24 = vmul.f32 %v1307_v50, %v1698_v29  ;;  %v633_v39 = vadd.f32 %v1746_v22, %v613_v49 }
 0x23f   :  { %1252 = vmatmul.mubr.bf16.gmra.mxu1 %v658_v53  ;;  %v648_v33 = vmax.f32 %v632_v25, 0.0  ;;  %v614_v55 = vmul.f32 %v1739_v12, %v594_v54 }
 0x240   :  { %v1309_v56 = vpop.eup %1308  ;;  %v615_v58 = vmul.f32 %v1739_v12, %v595_v24  ;;  %v649_v29 = vmax.f32 %v633_v39, 0.0 }
 0x241   :  { %v1311_v59 = vpop.eup %1310  ;;  %v659_v60 = vpack.c.bf16 %v648_v33, %v647_v2  ;;  %v634_v63 = vadd.f32 %v1746_v22, %v614_v55  ;;  %v596_v1 = vmul.f32 %v1309_v56, %v1715_v8 }
 0x242   :  { %v597_v35 = vmul.f32 %v1311_v59, %v1712_v37  ;;  %v635_v5 = vadd.f32 %v1746_v22, %v615_v58 }
 0x243   :  { %1255 = vmatprep.mubr.bf16.mxu1 %v659_v60  ;;  %v650_v47 = vmax.f32 %v634_v63, 0.0  ;;  %v616_v57 = vmul.f32 %v1739_v12, %v596_v1 }
 0x244   :  { %v1313_v7 = vpop.eup %1312  ;;  %v617_v9 = vmul.f32 %v1739_v12, %v597_v35  ;;  %v651_v48 = vmax.f32 %v635_v5, 0.0 }
 0x245   :  { %v660_v10 = vpack.c.bf16 %v650_v47, %v649_v29  ;;  %v636_v34 = vadd.f32 %v1746_v22, %v616_v57  ;;  %v598_v14 = vmul.f32 %v1313_v7, %v1726_v44 }
 0x246   :  { %v637_v17 = vadd.f32 %v1746_v22, %v617_v9 }
 0x247   :  { %1256 = vmatmul.mubr.bf16.gmra.mxu1 %v660_v10  ;;  %v652_v8 = vmax.f32 %v636_v34, 0.0  ;;  %v618_v37 = vmul.f32 %v1739_v12, %v598_v14 }
 0x248   :  { %v653_v21 = vmax.f32 %v637_v17, 0.0 }
 0x249   :  { %v661_v40 = vpack.c.bf16 %v652_v8, %v651_v48  ;;  %v638_v20 = vadd.f32 %v1746_v22, %v618_v37 }
 0x24b   :  { %1259 = vmatprep.mubr.bf16.mxu1 %v661_v40  ;;  %v654_v23 = vmax.f32 %v638_v20, 0.0 }
 0x24d   :  { %v662_v26 = vpack.c.bf16 %v654_v23, %v653_v21 }
 0x24f   :  { %1260 = vmatmul.mubr.bf16.gmra.mxu1 %v662_v26 }
 0x2f0   :  { %v1249_v44 = vpop.f32.mrf.mxu1 }
 0x2f1   :  { %v774_v11 = vadd.f32 %v1249_v44, %v1156_v61 }
 0x2f2   :  { %v765_v46 = vpop.f32.mrf.mxu1 }
 0x2f3   :  { %v766_v27 = vadd.f32 %v1156_v61, %v765_v46  ;;  %v1798_v12 = vmul.f32 %v1481_v51, %v774_v11 }
 0x2f4   :  { %v1250_v28 = vpop.f32.mrf.mxu1 }
 0x2f5   :  { %v777_v52 = vadd.f32 %v1250_v28, %v1156_v61  ;;  %848 = vadd.xlane.f32.xlu0 %v1798_v12  ;;  %v1805_v6 = vmul.f32 %v1481_v51, %v766_v27 }
 0x2f6   :  { %v768_v22 = vpop.f32.mrf.mxu1 }
 0x2f7   :  { %v769_v30 = vadd.f32 %v1156_v61, %v768_v22  ;;  %v1802_v32 = vmul.f32 %v1481_v51, %v777_v52 }
 0x2f9   :  { %850 = vadd.xlane.f32.xlu1 %v1802_v32  ;;  %844 = vadd.xlane.f32.xlu0 %v1805_v6  ;;  %v1810_v0 = vmul.f32 %v1481_v51, %v769_v30 }
 0x2fd   :  { %846 = vadd.xlane.f32.xlu1 %v1810_v0 }
 0x2ff   :  { %v1253_v15 = vpop.f32.mrf.mxu1 }
 0x300   :  { %v790_v62 = vadd.f32 %v1253_v15, %v1156_v61 }
 0x301   :  { %v781_v3 = vpop.f32.mrf.mxu1 }
 0x302   :  { %v782_v38 = vadd.f32 %v1156_v61, %v781_v3  ;;  %v1814_v41 = vmul.f32 %v1481_v51, %v790_v62 }
 0x303   :  { %v1254_v31 = vpop.f32.mrf.mxu1 }
 0x304   :  { %v793_v18 = vadd.f32 %v1254_v31, %v1156_v61  ;;  %856 = vadd.xlane.f32.xlu0 %v1814_v41  ;;  %v1821_v42 = vmul.f32 %v1481_v51, %v782_v38 }
 0x305   :  { %v784_v36 = vpop.f32.mrf.mxu1 }
 0x306   :  { %v785_v16 = vadd.f32 %v1156_v61, %v784_v36  ;;  %v1818_v4 = vmul.f32 %v1481_v51, %v793_v18 }
 0x307   :  { %v1257_v13 = vpop.f32.mrf.mxu1 }
 0x308   :  { %v806_v43 = vadd.f32 %v1257_v13, %v1156_v61  ;;  %858 = vadd.xlane.f32.xlu1 %v1818_v4  ;;  %852 = vadd.xlane.f32.xlu0 %v1821_v42  ;;  %v1826_v49 = vmul.f32 %v1481_v51, %v785_v16 }
 0x309   :  { %v797_v45 = vpop.f32.mrf.mxu1 }
 0x30a   :  { %v798_v19 = vadd.f32 %v1156_v61, %v797_v45  ;;  %v1829_v50 = vmul.f32 %v1481_v51, %v806_v43 }
 0x30b   :  { %v1258_v53 = vpop.f32.mrf.mxu1 }
 0x30c   :  { %v809_v25 = vadd.f32 %v1258_v53, %v1156_v61  ;;  %854 = vadd.xlane.f32.xlu1 %v1826_v49  ;;  %864 = vadd.xlane.f32.xlu0 %v1829_v50  ;;  %v1837_v33 = vmul.f32 %v1481_v51, %v798_v19 }
 0x30d   :  { %v800_v54 = vpop.f32.mrf.mxu1 }
 0x30e   :  { %v801_v24 = vadd.f32 %v1156_v61, %v800_v54  ;;  %v1834_v2 = vmul.f32 %v1481_v51, %v809_v25 }
 0x30f   :  { %v1261_v55 = vpop.f32.mrf.mxu1 }
 0x310   :  { %866 = vadd.xlane.f32.xlu1 %v1834_v2  ;;  %860 = vadd.xlane.f32.xlu0 %v1837_v33  ;;  %v1842_v58 = vmul.f32 %v1481_v51, %v801_v24  ;;  %v822_v60 = vadd.f32 %v1261_v55, %v1156_v61 }
 0x311   :  { %v813_v39 = vpop.f32.mrf.mxu1 }
 0x312   :  { %v814_v56 = vadd.f32 %v1156_v61, %v813_v39  ;;  %v1853_v57 = vmul.f32 %v1481_v51, %v822_v60 }
 0x313   :  { %v1262_v59 = vpop.f32.mrf.mxu1 }
 0x314   :  { %862 = vadd.xlane.f32.xlu1 %v1842_v58  ;;  %v1846_v63 = vmul.f32 %v1481_v51, %v814_v56  ;;  %v825_v29 = vadd.f32 %v1262_v59, %v1156_v61 }
 0x315   :  { %v816_v1 = vpop.f32.mrf.mxu1 }
 0x316   :  { %v817_v35 = vadd.f32 %v1156_v61, %v816_v1  ;;  %868 = vadd.xlane.f32.xlu0 %v1846_v63  ;;  %v1858_v5 = vmul.f32 %v1481_v51, %v825_v29 }
 0x318   :  { %v1850_v47 = vmul.f32 %v1481_v51, %v817_v35 }
 0x31a   :  { %870 = vadd.xlane.f32.xlu1 %v1850_v47  ;;  %872 = vadd.xlane.f32.xlu0 %v1853_v57 }
 0x31e   :  { %874 = vadd.xlane.f32.xlu1 %v1858_v5 }
 0x37e   :  { %v849_v7 = vpop.xlane.xlu0 %848 }
 0x37f   :  { %v878_v9 = vmul.f32 0.03125, %v849_v7 }
 0x381   :  { %v894_v10 = vsub.f32 %v1798_v12, %v878_v9 }
 0x382   :  { %v851_v34 = vpop.xlane.xlu1 %850  ;;  %v845_v14 = vpop.xlane.xlu0 %844 }
 0x383   :  { %v879_v48 = vmul.f32 0.03125, %v851_v34  ;;  %v876_v8 = vmul.f32 0.03125, %v845_v14  ;;  %v1863_v37 = vmul.f32 %v1481_v51, %v894_v10 }
 0x385   :  { %v895_v17 = vsub.f32 %v1802_v32, %v879_v48  ;;  %v892_v40 = vsub.f32 %v1805_v6, %v876_v8  ;;  %v926_v20 = vmul.f32 %v1863_v37, %v1863_v37 }
 0x386   :  { %v847_v21 = vpop.xlane.xlu1 %846 }
 0x387   :  { %v877_v23 = vmul.f32 0.03125, %v847_v21  ;;  %944 = vadd.xlane.f32.xlu0 %v926_v20  ;;  %v1870_v26 = vmul.f32 %v1481_v51, %v895_v17  ;;  %v1873_v61 = vmul.f32 %v1481_v51, %v892_v40 }
 0x389   :  { %v893_v44 = vsub.f32 %v1810_v0, %v877_v23  ;;  %v927_v11 = vmul.f32 %v1870_v26, %v1870_v26  ;;  %v924_v46 = vmul.f32 %v1873_v61, %v1873_v61 }
 0x38b   :  { %946 = vadd.xlane.f32.xlu1 %v927_v11  ;;  %940 = vadd.xlane.f32.xlu0 %v924_v46  ;;  %v1881_v27 = vmul.f32 %v1481_v51, %v893_v44 }
 0x38d   :  { %v857_v12 = vpop.xlane.xlu0 %856  ;;  %v925_v28 = vmul.f32 %v1881_v27, %v1881_v27 }
 0x38e   :  { %v882_v52 = vmul.f32 0.03125, %v857_v12 }
 0x38f   :  { %942 = vadd.xlane.f32.xlu1 %v925_v28 }
 0x390   :  { %v898_v22 = vsub.f32 %v1814_v41, %v882_v52 }
 0x391   :  { %v859_v30 = vpop.xlane.xlu1 %858  ;;  %v853_v32 = vpop.xlane.xlu0 %852 }
 0x392   :  { %v883_v6 = vmul.f32 0.03125, %v859_v30  ;;  %v880_v0 = vmul.f32 0.03125, %v853_v32  ;;  %v1887_v15 = vmul.f32 %v1481_v51, %v898_v22 }
 0x394   :  { %v899_v62 = vsub.f32 %v1818_v4, %v883_v6  ;;  %v896_v3 = vsub.f32 %v1821_v42, %v880_v0  ;;  %v930_v38 = vmul.f32 %v1887_v15, %v1887_v15 }
 0x395   :  { %v855_v31 = vpop.xlane.xlu1 %854  ;;  %v865_v18 = vpop.xlane.xlu0 %864 }
 0x396   :  { %v881_v36 = vmul.f32 0.03125, %v855_v31  ;;  %v886_v16 = vmul.f32 0.03125, %v865_v18  ;;  %952 = vadd.xlane.f32.xlu0 %v930_v38  ;;  %v1894_v41 = vmul.f32 %v1481_v51, %v899_v62  ;;  %v1897_v13 = vmul.f32 %v1481_v51, %v896_v3 }
 0x398   :  { %v897_v43 = vsub.f32 %v1826_v49, %v881_v36  ;;  %v902_v4 = vsub.f32 %v1829_v50, %v886_v16  ;;  %v931_v42 = vmul.f32 %v1894_v41, %v1894_v41  ;;  %v928_v45 = vmul.f32 %v1897_v13, %v1897_v13 }
 0x399   :  { %v867_v19 = vpop.xlane.xlu1 %866  ;;  %v861_v53 = vpop.xlane.xlu0 %860 }
 0x39a   :  { %v887_v25 = vmul.f32 0.03125, %v867_v19  ;;  %v884_v54 = vmul.f32 0.03125, %v861_v53  ;;  %954 = vadd.xlane.f32.xlu1 %v931_v42  ;;  %948 = vadd.xlane.f32.xlu0 %v928_v45  ;;  %v1906_v24 = vmul.f32 %v1481_v51, %v897_v43  ;;  %v1909_v55 = vmul.f32 %v1481_v51, %v902_v4  ;;  %v1960_v4 = vld [vmem:[%s2115_s4 + $0x4] ss:$0 sm:$0xff] }
 0x39c   :  { %v903_v49 = vsub.f32 %v1834_v2, %v887_v25  ;;  %v900_v50 = vsub.f32 %v1837_v33, %v884_v54  ;;  %v929_v39 = vmul.f32 %v1906_v24, %v1906_v24  ;;  %v934_v56 = vmul.f32 %v1909_v55, %v1909_v55  ;;  %v1966_v25 = vld [vmem:[%s2115_s4 + $0x5] ss:$0 sm:$0xff] }
 0x39d   :  { %v863_v59 = vpop.xlane.xlu1 %862 }
 0x39e   :  { %v885_v60 = vmul.f32 0.03125, %v863_v59  ;;  %950 = vadd.xlane.f32.xlu1 %v929_v39  ;;  %960 = vadd.xlane.f32.xlu0 %v934_v56  ;;  %v1918_v1 = vmul.f32 %v1481_v51, %v903_v49  ;;  %v1921_v35 = vmul.f32 %v1481_v51, %v900_v50 }
 0x39f   :  { %v869_v29 = vpop.xlane.xlu0 %868 }
 0x3a0   :  { %v901_v2 = vsub.f32 %v1842_v58, %v885_v60  ;;  %v888_v33 = vmul.f32 0.03125, %v869_v29  ;;  %v935_v7 = vmul.f32 %v1918_v1, %v1918_v1  ;;  %v932_v9 = vmul.f32 %v1921_v35, %v1921_v35 }
 0x3a2   :  { %v904_v10 = vsub.f32 %v1846_v63, %v888_v33  ;;  %962 = vadd.xlane.f32.xlu1 %v935_v7  ;;  %956 = vadd.xlane.f32.xlu0 %v932_v9  ;;  %v1930_v34 = vmul.f32 %v1481_v51, %v901_v2  ;;  %v1094_v7 = vld [vmem:[%s2117_s6 + $0x10] sm:$0xff] }
 0x3a3   :  { %v871_v14 = vpop.xlane.xlu1 %870  ;;  %v873_v48 = vpop.xlane.xlu0 %872 }
 0x3a4   :  { %v889_v8 = vmul.f32 0.03125, %v871_v14  ;;  %v890_v17 = vmul.f32 0.03125, %v873_v48  ;;  %v933_v58 = vmul.f32 %v1930_v34, %v1930_v34  ;;  %v1935_v40 = vmul.f32 %v1481_v51, %v904_v10 }
 0x3a6   :  { %v905_v20 = vsub.f32 %v1850_v47, %v889_v8  ;;  %v906_v21 = vsub.f32 %v1853_v57, %v890_v17  ;;  %958 = vadd.xlane.f32.xlu1 %v933_v58  ;;  %v936_v63 = vmul.f32 %v1935_v40, %v1935_v40 }
 0x3a7   :  { %v875_v23 = vpop.xlane.xlu1 %874 }
 0x3a8   :  { %v891_v44 = vmul.f32 0.03125, %v875_v23  ;;  %964 = vadd.xlane.f32.xlu0 %v936_v63  ;;  %v1942_v11 = vmul.f32 %v1481_v51, %v905_v20  ;;  %v1945_v46 = vmul.f32 %v1481_v51, %v906_v21 }
 0x3aa   :  { %v907_v12 = vsub.f32 %v1858_v5, %v891_v44  ;;  %v937_v47 = vmul.f32 %v1942_v11, %v1942_v11  ;;  %v938_v57 = vmul.f32 %v1945_v46, %v1945_v46 }
 0x3ac   :  { %966 = vadd.xlane.f32.xlu1 %v937_v47  ;;  %968 = vadd.xlane.f32.xlu0 %v938_v57  ;;  %v1953_v28 = vmul.f32 %v1481_v51, %v907_v12 }
 0x3ae   :  { %v939_v52 = vmul.f32 %v1953_v28, %v1953_v28 }
 0x3b0   :  { %970 = vadd.xlane.f32.xlu1 %v939_v52 }
 0x410   :  { %v945_v22 = vpop.xlane.xlu0 %944 }
 0x411   :  { %v974_v30 = vmul.f32 0.03125, %v945_v22 }
 0x413   :  { %v990_v32 = vadd.f32 1e-05, %v974_v30 }
 0x414   :  { %v947_v6 = vpop.xlane.xlu1 %946  ;;  %v941_v5 = vpop.xlane.xlu0 %940 }
 0x415   :  { %1314 = vrsqrt.f32 %v990_v32  ;;  %v975_v0 = vmul.f32 0.03125, %v947_v6  ;;  %v972_v62 = vmul.f32 0.03125, %v941_v5 }
 0x417   :  { %v991_v3 = vadd.f32 1e-05, %v975_v0  ;;  %v988_v38 = vadd.f32 1e-05, %v972_v62 }
 0x418   :  { %v943_v31 = vpop.xlane.xlu1 %942 }
 0x419   :  { %1316 = vrsqrt.f32 %v991_v3  ;;  %v973_v18 = vmul.f32 0.03125, %v943_v31  ;;  %v1093_v31 = vld [vmem:[%s2117_s6 + $0x8] sm:$0xff] }
 0x41a   :  { %1318 = vrsqrt.f32 %v988_v38 }
 0x41b   :  { %v989_v51 = vadd.f32 1e-05, %v973_v18 }
 0x41d   :  { %1320 = vrsqrt.f32 %v989_v51 }
 0x41f   :  { %v953_v36 = vpop.xlane.xlu0 %952 }
 0x420   :  { %v978_v16 = vmul.f32 0.03125, %v953_v36 }
 0x422   :  { %v1315_v43 = vpop.eup %1314  ;;  %v994_v42 = vadd.f32 1e-05, %v978_v16 }
 0x423   :  { %v1022_v45 = vmul.f32 %v1315_v43, %v1863_v37  ;;  %v955_v19 = vpop.xlane.xlu1 %954  ;;  %v949_v53 = vpop.xlane.xlu0 %948 }
 0x424   :  { %1322 = vrsqrt.f32 %v994_v42  ;;  %v979_v54 = vmul.f32 0.03125, %v955_v19  ;;  %v976_v49 = vmul.f32 0.03125, %v949_v53 }
 0x425   :  { %v1042_v50 = vmul.f32 %v1960_v4, %v1022_v45 }
 0x426   :  { %v1317_v39 = vpop.eup %1316  ;;  %v995_v56 = vadd.f32 1e-05, %v979_v54  ;;  %v992_v59 = vadd.f32 1e-05, %v976_v49 }
 0x427   :  { %v1319_v60 = vpop.eup %1318  ;;  %v1062_v29 = vadd.f32 %v1966_v25, %v1042_v50  ;;  %v1023_v37 = vmul.f32 %v1317_v39, %v1870_v26  ;;  %v951_v2 = vpop.xlane.xlu1 %950 }
 0x428   :  { %v961_v33 = vpop.xlane.xlu0 %960  ;;  %v1020_v9 = vmul.f32 %v1319_v60, %v1873_v61  ;;  %1324 = vrsqrt.f32 %v995_v56  ;;  %v977_v10 = vmul.f32 0.03125, %v951_v2  ;;  %v1095_v61 = vld [vmem:[%s2117_s6 + $0x18] sm:$0xff] }
 0x429   :  { %v982_v14 = vmul.f32 0.03125, %v961_v33  ;;  %v1078_v48 = vmax.f32 %v1062_v29, 0.0  ;;  %v1043_v8 = vmul.f32 %v1960_v4, %v1023_v37  ;;  %1326 = vrsqrt.f32 %v992_v59  ;;  %v1098_v29 = vld [vmem:[%s2117_s6 + $0x30] sm:$0xff] }
 0x42a   :  { %v1321_v17 = vpop.eup %1320  ;;  %v1040_v58 = vmul.f32 %v1960_v4, %v1020_v9  ;;  %v993_v20 = vadd.f32 1e-05, %v977_v10 }
 0x42b   :  { %v998_v26 = vadd.f32 1e-05, %v982_v14  ;;  %v1110_v21 = vadd.f32 %v1094_v7, %v1078_v48  ;;  %v1063_v63 = vadd.f32 %v1966_v25, %v1043_v8  ;;  %v1021_v23 = vmul.f32 %v1321_v17, %v1881_v27  ;;  %v963_v44 = vpop.xlane.xlu1 %962  ;;  %v1092_v27 = vld [vmem:[%s2117_s6] sm:$0xff] }
 0x42c   :  { %v957_v12 = vpop.xlane.xlu0 %956  ;;  %v1060_v47 = vadd.f32 %v1966_v25, %v1040_v58  ;;  %1328 = vrsqrt.f32 %v993_v20  ;;  %v983_v57 = vmul.f32 0.03125, %v963_v44 }
 0x42d   :  { %v980_v52 = vmul.f32 0.03125, %v957_v12  ;;  %1126 = vst [vmem:[%s2118_s7 + $0x10] sm:$0xff] %v1110_v21  ;;  %v1079_v22 = vmax.f32 %v1063_v63, 0.0  ;;  %v1041_v30 = vmul.f32 %v1960_v4, %v1021_v23  ;;  %1330 = vrsqrt.f32 %v998_v26 }
 0x42e   :  { %v1076_v32 = vmax.f32 %v1060_v47, 0.0  ;;  %v999_v6 = vadd.f32 1e-05, %v983_v57 }
 0x42f   :  { %v996_v5 = vadd.f32 1e-05, %v980_v52  ;;  %v1111_v0 = vadd.f32 %v1095_v61, %v1079_v22  ;;  %v1061_v62 = vadd.f32 %v1966_v25, %v1041_v30  ;;  %v959_v3 = vpop.xlane.xlu1 %958 }
 0x430   :  { %v1108_v38 = vadd.f32 %v1092_v27, %v1076_v32  ;;  %1332 = vrsqrt.f32 %v999_v6  ;;  %v981_v18 = vmul.f32 0.03125, %v959_v3  ;;  %v1097_v32 = vld [vmem:[%s2117_s6 + $0x28] sm:$0xff] }
 0x431   :  { %v1323_v51 = vpop.eup %1322  ;;  %1127 = vst [vmem:[%s2118_s7 + $0x18] sm:$0xff] %v1111_v0  ;;  %v1077_v36 = vmax.f32 %v1061_v62, 0.0  ;;  %1334 = vrsqrt.f32 %v996_v5  ;;  %v965_v16 = vpop.xlane.xlu0 %964  ;;  %v1102_v62 = vld [vmem:[%s2117_s6 + $0x50] sm:$0xff] }
 0x432   :  { %1124 = vst [vmem:[%s2118_s7] sm:$0xff] %v1108_v38  ;;  %v1026_v43 = vmul.f32 %v1323_v51, %v1887_v15  ;;  %v997_v42 = vadd.f32 1e-05, %v981_v18  ;;  %v984_v45 = vmul.f32 0.03125, %v965_v16 }
 0x433   :  { %v1109_v19 = vadd.f32 %v1093_v31, %v1077_v36 }
 0x434   :  { %v1046_v53 = vmul.f32 %v1960_v4, %v1026_v43  ;;  %1336 = vrsqrt.f32 %v997_v42  ;;  %v1000_v54 = vadd.f32 1e-05, %v984_v45  ;;  %v1103_v43 = vld [vmem:[%s2117_s6 + $0x58] sm:$0xff] }
 0x435   :  { %v1325_v49 = vpop.eup %1324  ;;  %1125 = vst [vmem:[%s2118_s7 + $0x8] sm:$0xff] %v1109_v19  ;;  %v967_v50 = vpop.xlane.xlu1 %966  ;;  %v1100_v19 = vld [vmem:[%s2117_s6 + $0x40] sm:$0xff] }
 0x436   :  { %v969_v39 = vpop.xlane.xlu0 %968  ;;  %v1327_v56 = vpop.eup %1326  ;;  %v1066_v59 = vadd.f32 %v1966_v25, %v1046_v53  ;;  %v1027_v60 = vmul.f32 %v1325_v49, %v1894_v41  ;;  %1338 = vrsqrt.f32 %v1000_v54  ;;  %v985_v15 = vmul.f32 0.03125, %v967_v50 }
 0x437   :  { %v1024_v37 = vmul.f32 %v1327_v56, %v1897_v13  ;;  %v986_v2 = vmul.f32 0.03125, %v969_v39  ;;  %v1099_v13 = vld [vmem:[%s2117_s6 + $0x38] sm:$0xff] }
 0x438   :  { %v1082_v33 = vmax.f32 %v1066_v59, 0.0  ;;  %v1047_v7 = vmul.f32 %v1960_v4, %v1027_v60  ;;  %v1001_v9 = vadd.f32 1e-05, %v985_v15  ;;  %v1101_v60 = vld [vmem:[%s2117_s6 + $0x48] sm:$0xff] }
 0x439   :  { %v1329_v10 = vpop.eup %1328  ;;  %v1044_v14 = vmul.f32 %v1960_v4, %v1024_v37  ;;  %v1002_v48 = vadd.f32 1e-05, %v986_v2  ;;  %v971_v8 = vpop.xlane.xlu1 %970  ;;  %v1104_v2 = vld [vmem:[%s2117_s6 + $0x60] sm:$0xff] }
 0x43a   :  { %v1331_v17 = vpop.eup %1330  ;;  %v1114_v41 = vadd.f32 %v1098_v29, %v1082_v33  ;;  %v1067_v58 = vadd.f32 %v1966_v25, %v1047_v7  ;;  %v1025_v20 = vmul.f32 %v1329_v10, %v1906_v24  ;;  %1340 = vrsqrt.f32 %v1001_v9  ;;  %v1096_v24 = vld [vmem:[%s2117_s6 + $0x20] sm:$0xff] }
 0x43b   :  { %v1064_v26 = vadd.f32 %v1966_v25, %v1044_v14  ;;  %v1030_v21 = vmul.f32 %v1331_v17, %v1909_v55  ;;  %1342 = vrsqrt.f32 %v1002_v48  ;;  %v987_v63 = vmul.f32 0.03125, %v971_v8  ;;  %v1105_v17 = vld [vmem:[%s2117_s6 + $0x68] sm:$0xff] }
 0x43c   :  { %1130 = vst [vmem:[%s2118_s7 + $0x30] sm:$0xff] %v1114_v41  ;;  %v1083_v23 = vmax.f32 %v1067_v58, 0.0  ;;  %v1045_v44 = vmul.f32 %v1960_v4, %v1025_v20  ;;  %v1106_v20 = vld [vmem:[%s2117_s6 + $0x70] sm:$0xff] }
 0x43d   :  { %v1333_v12 = vpop.eup %1332  ;;  %v1080_v61 = vmax.f32 %v1064_v26, 0.0  ;;  %v1050_v47 = vmul.f32 %v1960_v4, %v1030_v21  ;;  %v1003_v57 = vadd.f32 1e-05, %v987_v63 }
 0x43e   :  { %v1335_v52 = vpop.eup %1334  ;;  %v1115_v55 = vadd.f32 %v1099_v13, %v1083_v23  ;;  %v1065_v22 = vadd.f32 %v1966_v25, %v1045_v44  ;;  %v1031_v27 = vmul.f32 %v1333_v12, %v1918_v1 }
 0x43f   :  { %v1112_v30 = vadd.f32 %v1096_v24, %v1080_v61  ;;  %v1070_v6 = vadd.f32 %v1966_v25, %v1050_v47  ;;  %v1028_v5 = vmul.f32 %v1335_v52, %v1921_v35  ;;  %1344 = vrsqrt.f32 %v1003_v57 }
 0x440   :  { %1131 = vst [vmem:[%s2118_s7 + $0x38] sm:$0xff] %v1115_v55  ;;  %v1081_v0 = vmax.f32 %v1065_v22, 0.0  ;;  %v1051_v1 = vmul.f32 %v1960_v4, %v1031_v27 }
 0x441   :  { %v1337_v3 = vpop.eup %1336  ;;  %1128 = vst [vmem:[%s2118_s7 + $0x20] sm:$0xff] %v1112_v30  ;;  %v1086_v38 = vmax.f32 %v1070_v6, 0.0  ;;  %v1048_v35 = vmul.f32 %v1960_v4, %v1028_v5 }
 0x442   :  { %v1113_v31 = vadd.f32 %v1097_v32, %v1081_v0  ;;  %v1071_v18 = vadd.f32 %v1966_v25, %v1051_v1  ;;  %v1029_v51 = vmul.f32 %v1337_v3, %v1930_v34 }
 0x443   :  { %v1339_v36 = vpop.eup %1338  ;;  %v1118_v16 = vadd.f32 %v1102_v62, %v1086_v38  ;;  %v1068_v42 = vadd.f32 %v1966_v25, %v1048_v35 }
 0x444   :  { %1129 = vst [vmem:[%s2118_s7 + $0x28] sm:$0xff] %v1113_v31  ;;  %v1087_v45 = vmax.f32 %v1071_v18, 0.0  ;;  %v1049_v53 = vmul.f32 %v1960_v4, %v1029_v51  ;;  %v1032_v34 = vmul.f32 %v1339_v36, %v1935_v40 }
 0x445   :  { %1134 = vst [vmem:[%s2118_s7 + $0x50] sm:$0xff] %v1118_v16  ;;  %v1084_v54 = vmax.f32 %v1068_v42, 0.0 }
 0x446   :  { %v1119_v49 = vadd.f32 %v1103_v43, %v1087_v45  ;;  %v1069_v50 = vadd.f32 %v1966_v25, %v1049_v53  ;;  %v1052_v39 = vmul.f32 %v1960_v4, %v1032_v34 }
 0x447   :  { %v1341_v56 = vpop.eup %1340  ;;  %v1116_v59 = vadd.f32 %v1100_v19, %v1084_v54 }
 0x448   :  { %v1343_v15 = vpop.eup %1342  ;;  %1135 = vst [vmem:[%s2118_s7 + $0x58] sm:$0xff] %v1119_v49  ;;  %v1085_v40 = vmax.f32 %v1069_v50, 0.0  ;;  %v1072_v29 = vadd.f32 %v1966_v25, %v1052_v39  ;;  %v1033_v37 = vmul.f32 %v1341_v56, %v1942_v11 }
 0x449   :  { %1132 = vst [vmem:[%s2118_s7 + $0x40] sm:$0xff] %v1116_v59  ;;  %v1034_v33 = vmul.f32 %v1343_v15, %v1945_v46 }
 0x44a   :  { %v1117_v7 = vadd.f32 %v1101_v60, %v1085_v40  ;;  %v1088_v9 = vmax.f32 %v1072_v29, 0.0  ;;  %v1053_v10 = vmul.f32 %v1960_v4, %v1033_v37 }
 0x44b   :  { %v1054_v14 = vmul.f32 %v1960_v4, %v1034_v33 }
 0x44c   :  { %v1345_v48 = vpop.eup %1344  ;;  %1133 = vst [vmem:[%s2118_s7 + $0x48] sm:$0xff] %v1117_v7  ;;  %v1120_v11 = vadd.f32 %v1104_v2, %v1088_v9  ;;  %v1073_v8 = vadd.f32 %v1966_v25, %v1053_v10 }
 0x44d   :  { %v1074_v46 = vadd.f32 %v1966_v25, %v1054_v14  ;;  %v1035_v41 = vmul.f32 %v1345_v48, %v1953_v28  ;;  %v1107_v28 = vld [vmem:[%s2117_s6 + $0x78] sm:$0xff] }
 0x44e   :  { %1136 = vst [vmem:[%s2118_s7 + $0x60] sm:$0xff] %v1120_v11  ;;  %v1089_v58 = vmax.f32 %v1073_v8, 0.0 }
 0x44f   :  { %v1090_v13 = vmax.f32 %v1074_v46, 0.0  ;;  %v1055_v26 = vmul.f32 %v1960_v4, %v1035_v41 }
 0x450   :  { %v1121_v21 = vadd.f32 %v1105_v17, %v1089_v58 }
 0x451   :  { %v1122_v63 = vadd.f32 %v1106_v20, %v1090_v13  ;;  %v1075_v23 = vadd.f32 %v1966_v25, %v1055_v26 }
 0x452   :  { %1137 = vst [vmem:[%s2118_s7 + $0x68] sm:$0xff] %v1121_v21 }
 0x453   :  { %1138 = vst [vmem:[%s2118_s7 + $0x70] sm:$0xff] %v1122_v63  ;;  %v1091_v24 = vmax.f32 %v1075_v23, 0.0 }
 0x455   :  { %v1123_v44 = vadd.f32 %v1107_v28, %v1091_v24 }
 0x457   :  { %1139 = vst [vmem:[%s2118_s7 + $0x78] sm:$0xff] %v1123_v44 }

// kernel: dsnetwork_forward.12
= control target key start
LH: loop header
LB: loop body
LE: loop exit
PB: predicated region body
PF: predicated region fallthrough
CT: control target
= control target key end

     0   :  { %v1314_v3 = vmov 0   ;;  %v310_v11 = vlaneseq  ;;  %v1315_v50 = vmov 0.0   ;;  %s2031_s2 = inlined_call_operand.vmem [shape: f32[128,128], index: 2, kind: input, shape index: {}, may-alias: {2,3}]   ;;  %s2032_s6 = inlined_call_operand.vmem [shape: f32[128,128], index: 6, kind: input, shape index: {}]   ;;  %s2033_s0 = inlined_call_operand.<no memory space> [shape: f32[1,1], index: 0, kind: input, shape index: {}]   ;;  %s2034_s1 = inlined_call_operand.vmem [shape: bf16[128,128], index: 1, kind: input, shape index: {}]   ;;  %s2035_s3 = inlined_call_operand.vmem [shape: f32[128,128], index: 3, kind: input, shape index: {}, may-alias: {2,3}]   ;;  %s2036_s4 = inlined_call_operand.vmem [shape: f32[8,128], index: 4, kind: input, shape index: {}]   ;;  %s2037_s5 = inlined_call_operand.vmem [shape: bf16[128,128], index: 5, kind: input, shape index: {}]   ;;  %s2038_s7 = inlined_call_operand.vmem [shape: f32[128,128], index: 7, kind: output, shape index: {}]  }
   0x1   :  { %v95_v0 = vld [vmem:[%s2031_s2 + $0x70] sm:$0xff]  ;;  %v96_v1 = vld [vmem:[%s2031_s2 + $0x78] sm:$0xff]  ;;  %v93_v2 = vld [vmem:[%s2031_s2 + $0x60] sm:$0xff]  ;;  %1233 = vset.pattern.permute.xlu0 %v1314_v3  ;;  %v12_v4 = vstv %s2033_s0 }
   0x2   :  { %v104_v5 = vpack.c.bf16 %v96_v1, %v95_v0  ;;  %v94_v6 = vld [vmem:[%s2031_s2 + $0x68] sm:$0xff]  ;;  %13 = vst [vmem:[#allocation3] sm:$0x1] %v12_v4  ;;  %v91_v8 = vld [vmem:[%s2031_s2 + $0x50] sm:$0xff]  ;;  %v92_v9 = vld [vmem:[%s2031_s2 + $0x58] sm:$0xff]  ;;  %v311_v15 = vshrl.u32 %v310_v11, 7 }
   0x3   :  { %v103_v7 = vpack.c.bf16 %v94_v6, %v93_v2  ;;  %v89_v10 = vld [vmem:[%s2031_s2 + $0x40] sm:$0xff]  ;;  %v102_v12 = vpack.c.bf16 %v92_v9, %v91_v8  ;;  %v90_v13 = vld [vmem:[%s2031_s2 + $0x48] sm:$0xff]  ;;  %v87_v17 = vld [vmem:[%s2031_s2 + $0x30] sm:$0xff]  ;;  %v387_v42 = vand.u32 127, %v310_v11 }
   0x4   :  { %1167 = vmatprep.subr.bf16.mxu0 %v104_v5  ;;  %v1234_v14 = vld [vmem:[%s2034_s1] sm:$0xff]   ;;  %v101_v16 = vpack.c.bf16 %v90_v13, %v89_v10  ;;  %v88_v18 = vld [vmem:[%s2031_s2 + $0x38] sm:$0xff]  ;;  %v312_v19 = vsub.s32 0, %v311_v15  ;;  %v86_v23 = vld [vmem:[%s2031_s2 + $0x28] sm:$0xff] }
   0x5   :  { %1168 = vmatpush3.bf16.msra.mxu0 %v104_v5  ;;  %1183 = vmatprep.mubr.bf16.mxu0 %v1234_v14  ;;  %v100_v20 = vpack.c.bf16 %v88_v18, %v87_v17  ;;  %v85_v22 = vld [vmem:[%s2031_s2 + $0x20] sm:$0xff]  ;;  %v83_v27 = vld [vmem:[%s2031_s2 + $0x10] sm:$0xff]  ;;  %v84_v28 = vld [vmem:[%s2031_s2 + $0x18] sm:$0xff]  ;;  %vm388_vm0 = vcmp.lt.s32.totalorder %v387_v42, 32 }
   0x6   :  { %1169 = vmatprep.subr.bf16.mxu0 %v103_v7  ;;  %v99_v26 = vpack.c.bf16 %v86_v23, %v85_v22  ;;  %v98_v29 = vpack.c.bf16 %v84_v28, %v83_v27  ;;  %v81_v30 = vld [vmem:[%s2031_s2] sm:$0xff]  ;;  %v82_v31 = vld [vmem:[%s2031_s2 + $0x8] sm:$0xff]  ;;  %v1236_v34 = vld [vmem:[%s2034_s1 + $0x10] sm:$0xff]   ;;  %v1449_v51 = vsel %vm388_vm0, 1.0, %v1315_v50 }
   0x7   :  { %v97_v32 = vpack.c.bf16 %v82_v31, %v81_v30  ;;  %v1235_v33 = vld [vmem:[%s2034_s1 + $0x8] sm:$0xff]   ;;  %v1237_v35 = vld [vmem:[%s2034_s1 + $0x18] sm:$0xff]   ;;  %v1238_v36 = vld [vmem:[%s2034_s1 + $0x20] sm:$0xff]  }
   0x8   :  { %v1239_v37 = vld [vmem:[%s2034_s1 + $0x28] sm:$0xff]   ;;  %v1240_v38 = vld [vmem:[%s2034_s1 + $0x30] sm:$0xff]   ;;  %v1241_v39 = vld [vmem:[%s2034_s1 + $0x38] sm:$0xff]  }
   0x9   :  { %1170 = vmatpush3.bf16.msra.mxu0 %v103_v7  ;;  %v291_v21 = vld [vmem:[#allocation3] sm:$0x1]  ;;  %v295_v41 = vld [vmem:[%s2035_s3 + $0x10] sm:$0xff]  ;;  %v296_v47 = vld [vmem:[%s2035_s3 + $0x18] sm:$0xff] }
   0xa   :  { %1171 = vmatprep.subr.bf16.mxu0 %v102_v12  ;;  %v292_v24 = vadd.f32 1.0, %v291_v21  ;;  %v293_v44 = vld [vmem:[%s2035_s3] sm:$0xff]  ;;  %v294_v53 = vld [vmem:[%s2035_s3 + $0x8] sm:$0xff]  ;;  %v299_v58 = vld [vmem:[%s2035_s3 + $0x30] sm:$0xff] }
   0xb   :  { %v1443_v46 = vld [vmem:[%s2036_s4] ss:$0 sm:$0xff]  ;;  %v303_v13 = vld [vmem:[%s2035_s3 + $0x50] sm:$0xff] }
   0xc   :  { %v313_v25 = vrot.slane %v292_v24, %v312_v19  ;;  %v297_v5 = vld [vmem:[%s2035_s3 + $0x20] sm:$0xff] }
   0xd   :  { %1172 = vmatpush3.bf16.msra.mxu0 %v102_v12  ;;  %v300_v12 = vld [vmem:[%s2035_s3 + $0x38] sm:$0xff] }
   0xe   :  { %1173 = vmatprep.subr.bf16.mxu0 %v101_v16  ;;  %315 = vperm.xlu0 %1233, %v313_v25  }
  0x11   :  { %1174 = vmatpush3.bf16.msra.mxu0 %v101_v16 }
  0x12   :  { %1175 = vmatprep.subr.bf16.mxu0 %v100_v20 }
  0x15   :  { %1176 = vmatpush3.bf16.msra.mxu0 %v100_v20  ;;  %v298_v20 = vld [vmem:[%s2035_s3 + $0x28] sm:$0xff] }
  0x16   :  { %1177 = vmatprep.subr.bf16.mxu0 %v99_v26 }
  0x19   :  { %1178 = vmatpush3.bf16.msra.mxu0 %v99_v26 }
  0x1a   :  { %1179 = vmatprep.subr.bf16.mxu0 %v98_v29 }
  0x1d   :  { %1180 = vmatpush3.bf16.msra.mxu0 %v98_v29  ;;  %v301_v29 = vld [vmem:[%s2035_s3 + $0x40] sm:$0xff] }
  0x1e   :  { %1181 = vmatprep.subr.bf16.mxu0 %v97_v32 }
  0x21   :  { %1182 = vmatpush3.bf16.msra.mxu0 %v97_v32 }
  0x24   :  { %1184 = vmatmul.mubr.bf16.vlgmr.msra.gmra.mxu0 %v1235_v33 }
  0x25   :  { %1187 = vmatprep.mubr.bf16.mxu0 %v1236_v34 }
  0x2c   :  { %1188 = vmatmul.mubr.bf16.gmra.mxu0 %v1237_v35  ;;  %v307_v35 = vld [vmem:[%s2035_s3 + $0x70] sm:$0xff] }
  0x2d   :  { %1191 = vmatprep.mubr.bf16.mxu0 %v1238_v36 }
  0x34   :  { %1192 = vmatmul.mubr.bf16.gmra.mxu0 %v1239_v37  ;;  %v305_v37 = vld [vmem:[%s2035_s3 + $0x60] sm:$0xff] }
  0x35   :  { %1195 = vmatprep.mubr.bf16.mxu0 %v1240_v38 }
  0x3c   :  { %1196 = vmatmul.mubr.bf16.gmra.mxu0 %v1241_v39  ;;  %v302_v39 = vld [vmem:[%s2035_s3 + $0x48] sm:$0xff] }
  0x89   :  { %v1431_v40 = vpop.permute.xlu0 %315 }
  0x8a   :  { %v320_v43 = vmul.f32 %v1431_v40, %v295_v41  ;;  %v318_v49 = vmul.f32 %v1431_v40, %v293_v44  ;;  %v321_v56 = vmul.f32 %v1431_v40, %v296_v47  ;;  %v319_v61 = vmul.f32 %v1431_v40, %v294_v53  ;;  %v304_v53 = vld [vmem:[%s2035_s3 + $0x58] sm:$0xff] }
  0x8b   :  { %v324_v2 = vmul.f32 %v1431_v40, %v299_v58  ;;  %v322_v10 = vmul.f32 %v1431_v40, %v297_v5  ;;  %v325_v18 = vmul.f32 %v1431_v40, %v300_v12  ;;  %v328_v19 = vmul.f32 %v1431_v40, %v303_v13 }
  0x8c   :  { %v323_v27 = vmul.f32 %v1431_v40, %v298_v20  ;;  %v326_v38 = vmul.f32 %v1431_v40, %v301_v29  ;;  %v332_v42 = vmul.f32 %v1431_v40, %v307_v35 }
  0xe4   :  { %v1185_v45 = vpop.f32.mrf.mxu0 }
  0xe5   :  { %v352_v48 = vadd.f32 %v1185_v45, %v320_v43  ;;  %v330_v45 = vmul.f32 %v1431_v40, %v305_v37 }
  0xe6   :  { %v187_v52 = vpop.f32.mrf.mxu0 }
  0xe7   :  { %v372_v54 = vadd.f32 %v1443_v46, %v352_v48  ;;  %v350_v55 = vadd.f32 %v318_v49, %v187_v52  ;;  %v327_v49 = vmul.f32 %v1431_v40, %v302_v39 }
  0xe8   :  { %v1186_v57 = vpop.f32.mrf.mxu0 }
  0xe9   :  { %v370_v59 = vadd.f32 %v1443_v46, %v350_v55  ;;  %v353_v60 = vadd.f32 %v1186_v57, %v321_v56  ;;  %v1462_v62 = vmul.f32 %v1449_v51, %v372_v54 }
  0xea   :  { %v190_v63 = vpop.f32.mrf.mxu0 }
  0xeb   :  { %v373_v0 = vadd.f32 %v1443_v46, %v353_v60  ;;  %v351_v1 = vadd.f32 %v319_v61, %v190_v63  ;;  %411 = vadd.xlane.f32.xlu1 %v1462_v62  ;;  %v1468_v3 = vmul.f32 %v1449_v51, %v370_v59  ;;  %v329_v59 = vmul.f32 %v1431_v40, %v304_v53  ;;  %v306_v63 = vld [vmem:[%s2035_s3 + $0x68] sm:$0xff] }
  0xec   :  { %v1189_v4 = vpop.f32.mrf.mxu0  ;;  %v331_v5 = vmul.f32 %v1431_v40, %v306_v63 }
  0xed   :  { %v371_v6 = vadd.f32 %v1443_v46, %v351_v1  ;;  %v356_v7 = vadd.f32 %v1189_v4, %v324_v2  ;;  %407 = vadd.xlane.f32.xlu0 %v1468_v3  ;;  %v1476_v8 = vmul.f32 %v1449_v51, %v373_v0 }
  0xee   :  { %v203_v9 = vpop.f32.mrf.mxu0 }
  0xef   :  { %413 = vadd.xlane.f32.xlu1 %v1476_v8  ;;  %v376_v14 = vadd.f32 %v1443_v46, %v356_v7  ;;  %v354_v15 = vadd.f32 %v322_v10, %v203_v9  ;;  %v1488_v16 = vmul.f32 %v1449_v51, %v371_v6  ;;  %v308_v7 = vld [vmem:[%s2035_s3 + $0x78] sm:$0xff] }
  0xf0   :  { %v1190_v11 = vpop.f32.mrf.mxu0  ;;  %v333_v12 = vmul.f32 %v1431_v40, %v308_v7 }
  0xf1   :  { %v374_v22 = vadd.f32 %v1443_v46, %v354_v15  ;;  %v357_v23 = vadd.f32 %v1190_v11, %v325_v18  ;;  %v1498_v25 = vmul.f32 %v1449_v51, %v376_v14 }
  0xf2   :  { %v206_v17 = vpop.f32.mrf.mxu0 }
  0xf3   :  { %409 = vadd.xlane.f32.xlu1 %v1488_v16  ;;  %v377_v31 = vadd.f32 %v1443_v46, %v357_v23  ;;  %v355_v32 = vadd.f32 %v323_v27, %v206_v17  ;;  %v1508_v33 = vmul.f32 %v1449_v51, %v374_v22 }
  0xf4   :  { %v1193_v21 = vpop.f32.mrf.mxu0 }
  0xf5   :  { %v360_v24 = vadd.f32 %v1193_v21, %v328_v19  ;;  %v375_v43 = vadd.f32 %v1443_v46, %v355_v32  ;;  %v1529_v47 = vmul.f32 %v1449_v51, %v377_v31 }
  0xf6   :  { %v219_v26 = vpop.f32.mrf.mxu0 }
  0xf7   :  { %v380_v28 = vadd.f32 %v1443_v46, %v360_v24  ;;  %419 = vadd.xlane.f32.xlu1 %v1498_v25  ;;  %v358_v44 = vadd.f32 %v326_v38, %v219_v26  ;;  %v1539_v57 = vmul.f32 %v1449_v51, %v375_v43 }
  0xf8   :  { %v1194_v30 = vpop.f32.mrf.mxu0 }
  0xf9   :  { %v1511_v34 = vmul.f32 %v1449_v51, %v380_v28  ;;  %v378_v54 = vadd.f32 %v1443_v46, %v358_v44  ;;  %v361_v0 = vadd.f32 %v1194_v30, %v329_v59 }
  0xfa   :  { %v222_v36 = vpop.f32.mrf.mxu0 }
  0xfb   :  { %415 = vadd.xlane.f32.xlu1 %v1508_v33  ;;  %427 = vadd.xlane.f32.xlu0 %v1511_v34  ;;  %v359_v55 = vadd.f32 %v327_v49, %v222_v36  ;;  %v1553_v2 = vmul.f32 %v1449_v51, %v378_v54  ;;  %v381_v9 = vadd.f32 %v1443_v46, %v361_v0 }
  0xfc   :  { %v1197_v41 = vpop.f32.mrf.mxu0 }
  0xfd   :  { %v364_v50 = vadd.f32 %v1197_v41, %v332_v42  ;;  %v379_v1 = vadd.f32 %v1443_v46, %v359_v55  ;;  %v1572_v15 = vmul.f32 %v1449_v51, %v381_v9 }
  0xfe   :  { %v235_v48 = vpop.f32.mrf.mxu0 }
  0xff   :  { %v362_v52 = vadd.f32 %v330_v45, %v235_v48  ;;  %421 = vadd.xlane.f32.xlu1 %v1529_v47  ;;  %v384_v60 = vadd.f32 %v1443_v46, %v364_v50  ;;  %v1566_v11 = vmul.f32 %v1449_v51, %v379_v1  ;;  %v1243_v1 = vld [vmem:[%s2037_s5 + $0x30] sm:$0xff]  }
 0x100   :  { %v1198_v58 = vpop.f32.mrf.mxu0 }
 0x101   :  { %v382_v56 = vadd.f32 %v1443_v46, %v362_v52  ;;  %v1558_v6 = vmul.f32 %v1449_v51, %v384_v60  ;;  %v365_v13 = vadd.f32 %v1198_v58, %v333_v12 }
 0x102   :  { %v238_v4 = vpop.f32.mrf.mxu0 }
 0x103   :  { %417 = vadd.xlane.f32.xlu1 %v1539_v57  ;;  %v1545_v61 = vmul.f32 %v1449_v51, %v382_v56  ;;  %v363_v10 = vadd.f32 %v331_v5, %v238_v4  ;;  %v385_v17 = vadd.f32 %v1443_v46, %v365_v13 }
 0x105   :  { %431 = vadd.xlane.f32.xlu0 %v1545_v61  ;;  %v383_v14 = vadd.f32 %v1443_v46, %v363_v10  ;;  %v1581_v19 = vmul.f32 %v1449_v51, %v385_v17 }
 0x107   :  { %423 = vadd.xlane.f32.xlu1 %v1553_v2  ;;  %v1577_v18 = vmul.f32 %v1449_v51, %v383_v14 }
 0x109   :  { %435 = vadd.xlane.f32.xlu0 %v1558_v6 }
 0x10b   :  { %425 = vadd.xlane.f32.xlu1 %v1566_v11 }
 0x10f   :  { %429 = vadd.xlane.f32.xlu1 %v1572_v15 }
 0x113   :  { %433 = vadd.xlane.f32.xlu1 %v1577_v18 }
 0x117   :  { %437 = vadd.xlane.f32.xlu1 %v1581_v19 }
 0x174   :  { %v412_v40 = vpop.xlane.xlu1 %411 }
 0x175   :  { %v441_v20 = vmul.f32 0.03125, %v412_v40 }
 0x176   :  { %v408_v21 = vpop.xlane.xlu0 %407 }
 0x177   :  { %v439_v22 = vmul.f32 0.03125, %v408_v21  ;;  %v457_v24 = vsub.f32 %v1462_v62, %v441_v20 }
 0x178   :  { %v414_v23 = vpop.xlane.xlu1 %413 }
 0x179   :  { %v455_v26 = vsub.f32 %v1468_v3, %v439_v22  ;;  %v442_v46 = vmul.f32 0.03125, %v414_v23  ;;  %v1592_v31 = vmul.f32 %v1449_v51, %v457_v24 }
 0x17b   :  { %v1587_v27 = vmul.f32 %v1449_v51, %v455_v26  ;;  %v458_v32 = vsub.f32 %v1476_v8, %v442_v46  ;;  %v489_v3 = vmul.f32 %v1592_v31, %v1592_v31  ;;  %v1245_v26 = vld [vmem:[%s2037_s5 + $0x20] sm:$0xff]  }
 0x17c   :  { %v410_v28 = vpop.xlane.xlu1 %409 }
 0x17d   :  { %v440_v29 = vmul.f32 0.03125, %v410_v28  ;;  %v487_v30 = vmul.f32 %v1587_v27, %v1587_v27  ;;  %v1604_v39 = vmul.f32 %v1449_v51, %v458_v32 }
 0x17f   :  { %v456_v35 = vsub.f32 %v1488_v16, %v440_v29  ;;  %503 = vadd.xlane.f32.xlu0 %v487_v30  ;;  %v490_v43 = vmul.f32 %v1604_v39, %v1604_v39 }
 0x180   :  { %v420_v62 = vpop.xlane.xlu1 %419 }
 0x181   :  { %v1599_v36 = vmul.f32 %v1449_v51, %v456_v35  ;;  %v445_v37 = vmul.f32 0.03125, %v420_v62 }
 0x183   :  { %507 = vadd.xlane.f32.xlu0 %v489_v3  ;;  %v488_v38 = vmul.f32 %v1599_v36, %v1599_v36  ;;  %v461_v16 = vsub.f32 %v1498_v25, %v445_v37 }
 0x184   :  { %v416_v41 = vpop.xlane.xlu1 %415  ;;  %v428_v45 = vpop.xlane.xlu0 %427 }
 0x185   :  { %v443_v8 = vmul.f32 0.03125, %v416_v41  ;;  %505 = vadd.xlane.f32.xlu1 %v488_v38  ;;  %v1616_v52 = vmul.f32 %v1449_v51, %v461_v16  ;;  %v449_v53 = vmul.f32 0.03125, %v428_v45  ;;  %v1248_v45 = vld [vmem:[%s2037_s5 + $0x8] sm:$0xff]  }
 0x187   :  { %v459_v42 = vsub.f32 %v1508_v33, %v443_v8  ;;  %v1242_v33 = vld [vmem:[%s2037_s5 + $0x38] sm:$0xff]   ;;  %v493_v59 = vmul.f32 %v1616_v52, %v1616_v52 }
 0x188   :  { %v422_v44 = vpop.xlane.xlu1 %421  ;;  %1199 = vmatprep.subr.bf16.mxu1 %v1242_v33 }
 0x189   :  { %509 = vadd.xlane.f32.xlu1 %v490_v43  ;;  %v1611_v48 = vmul.f32 %v1449_v51, %v459_v42  ;;  %v446_v49 = vmul.f32 0.03125, %v422_v44  ;;  %1200 = vmatpush3.bf16.msra.mxu1 %v1242_v33 }
 0x18a   :  { %1201 = vmatprep.subr.bf16.mxu1 %v1243_v1 }
 0x18b   :  { %v491_v50 = vmul.f32 %v1611_v48, %v1611_v48  ;;  %v462_v55 = vsub.f32 %v1529_v47, %v446_v49  ;;  %v465_v47 = vsub.f32 %v1511_v34, %v449_v53  ;;  %v1244_v34 = vld [vmem:[%s2037_s5 + $0x28] sm:$0xff]   ;;  %v1249_v49 = vld [vmem:[%s2037_s5] sm:$0xff]  }
 0x18c   :  { %v418_v25 = vpop.xlane.xlu1 %417 }
 0x18d   :  { %v444_v54 = vmul.f32 0.03125, %v418_v25  ;;  %511 = vadd.xlane.f32.xlu0 %v491_v50  ;;  %v1633_v4 = vmul.f32 %v1449_v51, %v462_v55  ;;  %1202 = vmatpush3.bf16.msra.mxu1 %v1243_v1 }
 0x18e   :  { %v432_v56 = vpop.xlane.xlu0 %431  ;;  %1203 = vmatprep.subr.bf16.mxu1 %v1244_v34 }
 0x18f   :  { %v460_v58 = vsub.f32 %v1539_v57, %v444_v54  ;;  %v451_v57 = vmul.f32 0.03125, %v432_v56  ;;  %v494_v14 = vmul.f32 %v1633_v4, %v1633_v4 }
 0x190   :  { %v424_v60 = vpop.xlane.xlu1 %423 }
 0x191   :  { %v447_v63 = vmul.f32 0.03125, %v424_v60  ;;  %515 = vadd.xlane.f32.xlu0 %v493_v59  ;;  %v1626_v0 = vmul.f32 %v1449_v51, %v460_v58  ;;  %v467_v17 = vsub.f32 %v1545_v61, %v451_v57  ;;  %1204 = vmatpush3.bf16.msra.mxu1 %v1244_v34 }
 0x192   :  { %v436_v9 = vpop.xlane.xlu0 %435  ;;  %1205 = vmatprep.subr.bf16.mxu1 %v1245_v26 }
 0x193   :  { %v463_v5 = vsub.f32 %v1553_v2, %v447_v63  ;;  %v492_v7 = vmul.f32 %v1626_v0, %v1626_v0  ;;  %v1647_v2 = vmul.f32 %v1449_v51, %v465_v47  ;;  %v453_v40 = vmul.f32 0.03125, %v436_v9 }
 0x194   :  { %v426_v10 = vpop.xlane.xlu1 %425  ;;  %v1666_v29 = vmul.f32 %v1449_v51, %v467_v17 }
 0x195   :  { %v448_v12 = vmul.f32 0.03125, %v426_v10  ;;  %513 = vadd.xlane.f32.xlu1 %v492_v7  ;;  %v1639_v13 = vmul.f32 %v1449_v51, %v463_v5  ;;  %v497_v61 = vmul.f32 %v1647_v2, %v1647_v2  ;;  %1206 = vmatpush3.bf16.msra.mxu1 %v1245_v26 }
 0x196   :  { %v499_v3 = vmul.f32 %v1666_v29, %v1666_v29 }
 0x197   :  { %v464_v20 = vsub.f32 %v1566_v11, %v448_v12  ;;  %v495_v21 = vmul.f32 %v1639_v13, %v1639_v13  ;;  %v469_v11 = vsub.f32 %v1558_v6, %v453_v40  ;;  %v1246_v6 = vld [vmem:[%s2037_s5 + $0x18] sm:$0xff]   ;;  %v1707_v12 = vld [vmem:[%s2036_s4 + $0x1] ss:$0 sm:$0xff] }
 0x198   :  { %v430_v22 = vpop.xlane.xlu1 %429  ;;  %1207 = vmatprep.subr.bf16.mxu1 %v1246_v6 }
 0x199   :  { %v450_v23 = vmul.f32 0.03125, %v430_v22  ;;  %517 = vadd.xlane.f32.xlu1 %v494_v14  ;;  %519 = vadd.xlane.f32.xlu0 %v495_v21  ;;  %v1654_v24 = vmul.f32 %v1449_v51, %v464_v20  ;;  %v1680_v37 = vmul.f32 %v1449_v51, %v469_v11  ;;  %v1714_v22 = vld [vmem:[%s2036_s4 + $0x2] ss:$0 sm:$0xff] }
 0x19a   :  { %1208 = vmatpush3.bf16.msra.mxu1 %v1246_v6 }
 0x19b   :  { %v466_v46 = vsub.f32 %v1572_v15, %v450_v23  ;;  %v496_v28 = vmul.f32 %v1654_v24, %v1654_v24  ;;  %v501_v43 = vmul.f32 %v1680_v37, %v1680_v37 }
 0x19c   :  { %v434_v30 = vpop.xlane.xlu1 %433 }
 0x19d   :  { %v452_v32 = vmul.f32 0.03125, %v434_v30  ;;  %521 = vadd.xlane.f32.xlu1 %v496_v28  ;;  %523 = vadd.xlane.f32.xlu0 %v497_v61  ;;  %v1669_v35 = vmul.f32 %v1449_v51, %v466_v46 }
 0x19f   :  { %v468_v15 = vsub.f32 %v1577_v18, %v452_v32  ;;  %v498_v62 = vmul.f32 %v1669_v35, %v1669_v35  ;;  %v1247_v18 = vld [vmem:[%s2037_s5 + $0x10] sm:$0xff]  }
 0x1a0   :  { %v438_v38 = vpop.xlane.xlu1 %437  ;;  %1209 = vmatprep.subr.bf16.mxu1 %v1247_v18 }
 0x1a1   :  { %v454_v41 = vmul.f32 0.03125, %v438_v38  ;;  %525 = vadd.xlane.f32.xlu1 %v498_v62  ;;  %527 = vadd.xlane.f32.xlu0 %v499_v3  ;;  %v1683_v8 = vmul.f32 %v1449_v51, %v468_v15 }
 0x1a2   :  { %1210 = vmatpush3.bf16.msra.mxu1 %v1247_v18 }
 0x1a3   :  { %v470_v16 = vsub.f32 %v1581_v19, %v454_v41  ;;  %v500_v42 = vmul.f32 %v1683_v8, %v1683_v8  ;;  %1211 = vmatprep.subr.bf16.mxu1 %v1248_v45 }
 0x1a5   :  { %529 = vadd.xlane.f32.xlu1 %v500_v42  ;;  %531 = vadd.xlane.f32.xlu0 %v501_v43  ;;  %v1694_v44 = vmul.f32 %v1449_v51, %v470_v16 }
 0x1a6   :  { %1212 = vmatpush3.bf16.msra.mxu1 %v1248_v45 }
 0x1a7   :  { %v502_v19 = vmul.f32 %v1694_v44, %v1694_v44  ;;  %1213 = vmatprep.subr.bf16.mxu1 %v1249_v49 }
 0x1a9   :  { %533 = vadd.xlane.f32.xlu1 %v502_v19 }
 0x1aa   :  { %1214 = vmatpush3.bf16.msra.mxu1 %v1249_v49 }
 0x208   :  { %v504_v50 = vpop.xlane.xlu0 %503 }
 0x209   :  { %v535_v53 = vmul.f32 0.03125, %v504_v50 }
 0x20b   :  { %v551_v25 = vadd.f32 1e-05, %v535_v53 }
 0x20c   :  { %v508_v54 = vpop.xlane.xlu0 %507 }
 0x20d   :  { %1250 = vrsqrt.f32 %v551_v25  ;;  %v537_v33 = vmul.f32 0.03125, %v508_v54 }
 0x20e   :  { %v506_v55 = vpop.xlane.xlu1 %505 }
 0x20f   :  { %v553_v56 = vadd.f32 1e-05, %v537_v33  ;;  %v536_v58 = vmul.f32 0.03125, %v506_v55 }
 0x211   :  { %1252 = vrsqrt.f32 %v553_v56  ;;  %v552_v59 = vadd.f32 1e-05, %v536_v58 }
 0x212   :  { %v510_v60 = vpop.xlane.xlu1 %509 }
 0x213   :  { %1254 = vrsqrt.f32 %v552_v59  ;;  %v538_v63 = vmul.f32 0.03125, %v510_v60 }
 0x215   :  { %v554_v1 = vadd.f32 1e-05, %v538_v63 }
 0x216   :  { %v512_v47 = vpop.xlane.xlu0 %511 }
 0x217   :  { %1256 = vrsqrt.f32 %v554_v1  ;;  %v539_v57 = vmul.f32 0.03125, %v512_v47 }
 0x219   :  { %v555_v5 = vadd.f32 1e-05, %v539_v57 }
 0x21a   :  { %v1251_v7 = vpop.eup %1250  ;;  %v516_v9 = vpop.xlane.xlu0 %515 }
 0x21b   :  { %1258 = vrsqrt.f32 %v555_v5  ;;  %v541_v10 = vmul.f32 0.03125, %v516_v9  ;;  %v583_v34 = vmul.f32 %v1251_v7, %v1587_v27 }
 0x21d   :  { %v557_v14 = vadd.f32 1e-05, %v541_v10  ;;  %v603_v20 = vmul.f32 %v1707_v12, %v583_v34 }
 0x21e   :  { %v1253_v17 = vpop.eup %1252  ;;  %v514_v40 = vpop.xlane.xlu1 %513 }
 0x21f   :  { %1260 = vrsqrt.f32 %v557_v14  ;;  %v540_v21 = vmul.f32 0.03125, %v514_v40  ;;  %v585_v26 = vmul.f32 %v1253_v17, %v1592_v31  ;;  %v623_v28 = vadd.f32 %v1714_v22, %v603_v20 }
 0x220   :  { %v1255_v23 = vpop.eup %1254 }
 0x221   :  { %v556_v61 = vadd.f32 1e-05, %v540_v21  ;;  %v584_v11 = vmul.f32 %v1255_v23, %v1599_v36  ;;  %v605_v62 = vmul.f32 %v1707_v12, %v585_v26  ;;  %v639_v16 = vmax.f32 %v623_v28, 0.0 }
 0x222   :  { %v518_v46 = vpop.xlane.xlu1 %517  ;;  %v520_v27 = vpop.xlane.xlu0 %519 }
 0x223   :  { %1262 = vrsqrt.f32 %v556_v61  ;;  %v542_v30 = vmul.f32 0.03125, %v518_v46  ;;  %v543_v32 = vmul.f32 0.03125, %v520_v27  ;;  %v604_v6 = vmul.f32 %v1707_v12, %v584_v11 }
 0x224   :  { %v1257_v15 = vpop.eup %1256  ;;  %v625_v50 = vadd.f32 %v1714_v22, %v605_v62 }
 0x225   :  { %v558_v3 = vadd.f32 1e-05, %v542_v30  ;;  %v559_v38 = vadd.f32 1e-05, %v543_v32  ;;  %v624_v41 = vadd.f32 %v1714_v22, %v604_v6  ;;  %v586_v31 = vmul.f32 %v1257_v15, %v1604_v39 }
 0x226   :  { %v522_v18 = vpop.xlane.xlu1 %521  ;;  %v524_v36 = vpop.xlane.xlu0 %523  ;;  %v641_v63 = vmax.f32 %v625_v50, 0.0 }
 0x227   :  { %1264 = vrsqrt.f32 %v558_v3  ;;  %v544_v42 = vmul.f32 0.03125, %v522_v18  ;;  %v545_v43 = vmul.f32 0.03125, %v524_v36  ;;  %v640_v45 = vmax.f32 %v624_v41, 0.0 }
 0x228   :  { %v1259_v19 = vpop.eup %1258  ;;  %1266 = vrsqrt.f32 %v559_v38  ;;  %v606_v49 = vmul.f32 %v1707_v12, %v586_v31 }
 0x229   :  { %v560_v53 = vadd.f32 1e-05, %v544_v42  ;;  %v561_v25 = vadd.f32 1e-05, %v545_v43  ;;  %v655_v54 = vpack.c.bf16 %v640_v45, %v639_v16  ;;  %v587_v56 = vmul.f32 %v1259_v19, %v1611_v48 }
 0x22a   :  { %v526_v33 = vpop.xlane.xlu1 %525  ;;  %v528_v55 = vpop.xlane.xlu0 %527  ;;  %v626_v39 = vadd.f32 %v1714_v22, %v606_v49 }
 0x22b   :  { %1268 = vrsqrt.f32 %v560_v53  ;;  %v546_v58 = vmul.f32 0.03125, %v526_v33  ;;  %v547_v59 = vmul.f32 0.03125, %v528_v55  ;;  %1215 = vmatprep.mubr.bf16.mxu1 %v655_v54  ;;  %v607_v10 = vmul.f32 %v1707_v12, %v587_v56 }
 0x22c   :  { %v1261_v60 = vpop.eup %1260  ;;  %1270 = vrsqrt.f32 %v561_v25  ;;  %v642_v1 = vmax.f32 %v626_v39, 0.0 }
 0x22d   :  { %v562_v47 = vadd.f32 1e-05, %v546_v58  ;;  %v563_v57 = vadd.f32 1e-05, %v547_v59  ;;  %v589_v48 = vmul.f32 %v1261_v60, %v1616_v52  ;;  %v627_v26 = vadd.f32 %v1714_v22, %v607_v10 }
 0x22e   :  { %v530_v5 = vpop.xlane.xlu1 %529  ;;  %v532_v7 = vpop.xlane.xlu0 %531  ;;  %v656_v9 = vpack.c.bf16 %v642_v1, %v641_v63 }
 0x22f   :  { %1272 = vrsqrt.f32 %v562_v47  ;;  %v548_v34 = vmul.f32 0.03125, %v530_v5  ;;  %v549_v14 = vmul.f32 0.03125, %v532_v7  ;;  %v609_v46 = vmul.f32 %v1707_v12, %v589_v48 }
 0x230   :  { %v1263_v17 = vpop.eup %1262  ;;  %1274 = vrsqrt.f32 %v563_v57  ;;  %1216 = vmatmul.mubr.bf16.vlgmr.msra.gmra.mxu1 %v656_v9  ;;  %v643_v6 = vmax.f32 %v627_v26, 0.0 }
 0x231   :  { %v564_v40 = vadd.f32 1e-05, %v548_v34  ;;  %v565_v20 = vadd.f32 1e-05, %v549_v14  ;;  %v588_v21 = vmul.f32 %v1263_v17, %v1626_v0  ;;  %v629_v3 = vadd.f32 %v1714_v22, %v609_v46 }
 0x232   :  { %v534_v23 = vpop.xlane.xlu1 %533 }
 0x233   :  { %1276 = vrsqrt.f32 %v564_v40  ;;  %v550_v61 = vmul.f32 0.03125, %v534_v23  ;;  %v608_v11 = vmul.f32 %v1707_v12, %v588_v21  ;;  %v645_v42 = vmax.f32 %v629_v3, 0.0 }
 0x234   :  { %v1265_v27 = vpop.eup %1264  ;;  %1278 = vrsqrt.f32 %v565_v20 }
 0x235   :  { %v1267_v28 = vpop.eup %1266  ;;  %v566_v52 = vadd.f32 1e-05, %v550_v61  ;;  %v628_v30 = vadd.f32 %v1714_v22, %v608_v11  ;;  %v590_v32 = vmul.f32 %v1265_v27, %v1633_v4  ;;  %v1124_v61 = vld [vmem:[%s2036_s4 + $0x3] ss:$0 sm:$0xff] }
 0x236   :  { %v591_v0 = vmul.f32 %v1267_v28, %v1639_v13 }
 0x237   :  { %1280 = vrsqrt.f32 %v566_v52  ;;  %v644_v15 = vmax.f32 %v628_v30, 0.0  ;;  %v610_v62 = vmul.f32 %v1707_v12, %v590_v32 }
 0x238   :  { %v1269_v38 = vpop.eup %1268  ;;  %v611_v41 = vmul.f32 %v1707_v12, %v591_v0 }
 0x239   :  { %v1271_v31 = vpop.eup %1270  ;;  %v657_v18 = vpack.c.bf16 %v644_v15, %v643_v6  ;;  %v630_v36 = vadd.f32 %v1714_v22, %v610_v62  ;;  %v592_v16 = vmul.f32 %v1269_v38, %v1654_v24 }
 0x23a   :  { %v593_v4 = vmul.f32 %v1271_v31, %v1647_v2  ;;  %v631_v45 = vadd.f32 %v1714_v22, %v611_v41 }
 0x23b   :  { %1219 = vmatprep.mubr.bf16.mxu1 %v657_v18  ;;  %v646_v13 = vmax.f32 %v630_v36, 0.0  ;;  %v612_v43 = vmul.f32 %v1707_v12, %v592_v16 }
 0x23c   :  { %v1273_v19 = vpop.eup %1272  ;;  %v613_v49 = vmul.f32 %v1707_v12, %v593_v4  ;;  %v647_v2 = vmax.f32 %v631_v45, 0.0 }
 0x23d   :  { %v1275_v50 = vpop.eup %1274  ;;  %v658_v53 = vpack.c.bf16 %v646_v13, %v645_v42  ;;  %v632_v25 = vadd.f32 %v1714_v22, %v612_v43  ;;  %v594_v54 = vmul.f32 %v1273_v19, %v1669_v35 }
 0x23e   :  { %v595_v24 = vmul.f32 %v1275_v50, %v1666_v29  ;;  %v633_v39 = vadd.f32 %v1714_v22, %v613_v49 }
 0x23f   :  { %1220 = vmatmul.mubr.bf16.gmra.mxu1 %v658_v53  ;;  %v648_v33 = vmax.f32 %v632_v25, 0.0  ;;  %v614_v55 = vmul.f32 %v1707_v12, %v594_v54 }
 0x240   :  { %v1277_v56 = vpop.eup %1276  ;;  %v615_v58 = vmul.f32 %v1707_v12, %v595_v24  ;;  %v649_v29 = vmax.f32 %v633_v39, 0.0 }
 0x241   :  { %v1279_v59 = vpop.eup %1278  ;;  %v659_v60 = vpack.c.bf16 %v648_v33, %v647_v2  ;;  %v634_v63 = vadd.f32 %v1714_v22, %v614_v55  ;;  %v596_v1 = vmul.f32 %v1277_v56, %v1683_v8 }
 0x242   :  { %v597_v35 = vmul.f32 %v1279_v59, %v1680_v37  ;;  %v635_v5 = vadd.f32 %v1714_v22, %v615_v58 }
 0x243   :  { %1223 = vmatprep.mubr.bf16.mxu1 %v659_v60  ;;  %v650_v47 = vmax.f32 %v634_v63, 0.0  ;;  %v616_v57 = vmul.f32 %v1707_v12, %v596_v1 }
 0x244   :  { %v1281_v7 = vpop.eup %1280  ;;  %v617_v9 = vmul.f32 %v1707_v12, %v597_v35  ;;  %v651_v48 = vmax.f32 %v635_v5, 0.0 }
 0x245   :  { %v660_v10 = vpack.c.bf16 %v650_v47, %v649_v29  ;;  %v636_v34 = vadd.f32 %v1714_v22, %v616_v57  ;;  %v598_v14 = vmul.f32 %v1281_v7, %v1694_v44 }
 0x246   :  { %v637_v17 = vadd.f32 %v1714_v22, %v617_v9 }
 0x247   :  { %1224 = vmatmul.mubr.bf16.gmra.mxu1 %v660_v10  ;;  %v652_v8 = vmax.f32 %v636_v34, 0.0  ;;  %v618_v37 = vmul.f32 %v1707_v12, %v598_v14 }
 0x248   :  { %v653_v21 = vmax.f32 %v637_v17, 0.0 }
 0x249   :  { %v661_v40 = vpack.c.bf16 %v652_v8, %v651_v48  ;;  %v638_v20 = vadd.f32 %v1714_v22, %v618_v37 }
 0x24b   :  { %1227 = vmatprep.mubr.bf16.mxu1 %v661_v40  ;;  %v654_v23 = vmax.f32 %v638_v20, 0.0 }
 0x24d   :  { %v662_v26 = vpack.c.bf16 %v654_v23, %v653_v21 }
 0x24f   :  { %1228 = vmatmul.mubr.bf16.gmra.mxu1 %v662_v26 }
 0x2f0   :  { %v1217_v44 = vpop.f32.mrf.mxu1 }
 0x2f1   :  { %v774_v11 = vadd.f32 %v1217_v44, %v1124_v61 }
 0x2f2   :  { %v765_v46 = vpop.f32.mrf.mxu1 }
 0x2f3   :  { %v766_v27 = vadd.f32 %v1124_v61, %v765_v46  ;;  %v1766_v12 = vmul.f32 %v1449_v51, %v774_v11 }
 0x2f4   :  { %v1218_v28 = vpop.f32.mrf.mxu1 }
 0x2f5   :  { %v777_v52 = vadd.f32 %v1218_v28, %v1124_v61  ;;  %848 = vadd.xlane.f32.xlu0 %v1766_v12  ;;  %v1773_v6 = vmul.f32 %v1449_v51, %v766_v27 }
 0x2f6   :  { %v768_v22 = vpop.f32.mrf.mxu1 }
 0x2f7   :  { %v769_v30 = vadd.f32 %v1124_v61, %v768_v22  ;;  %v1770_v32 = vmul.f32 %v1449_v51, %v777_v52 }
 0x2f9   :  { %850 = vadd.xlane.f32.xlu1 %v1770_v32  ;;  %844 = vadd.xlane.f32.xlu0 %v1773_v6  ;;  %v1778_v0 = vmul.f32 %v1449_v51, %v769_v30 }
 0x2fd   :  { %846 = vadd.xlane.f32.xlu1 %v1778_v0 }
 0x2ff   :  { %v1221_v15 = vpop.f32.mrf.mxu1 }
 0x300   :  { %v790_v62 = vadd.f32 %v1221_v15, %v1124_v61 }
 0x301   :  { %v781_v3 = vpop.f32.mrf.mxu1 }
 0x302   :  { %v782_v38 = vadd.f32 %v1124_v61, %v781_v3  ;;  %v1782_v41 = vmul.f32 %v1449_v51, %v790_v62 }
 0x303   :  { %v1222_v31 = vpop.f32.mrf.mxu1 }
 0x304   :  { %v793_v18 = vadd.f32 %v1222_v31, %v1124_v61  ;;  %856 = vadd.xlane.f32.xlu0 %v1782_v41  ;;  %v1789_v42 = vmul.f32 %v1449_v51, %v782_v38 }
 0x305   :  { %v784_v36 = vpop.f32.mrf.mxu1 }
 0x306   :  { %v785_v16 = vadd.f32 %v1124_v61, %v784_v36  ;;  %v1786_v4 = vmul.f32 %v1449_v51, %v793_v18 }
 0x307   :  { %v1225_v13 = vpop.f32.mrf.mxu1 }
 0x308   :  { %v806_v43 = vadd.f32 %v1225_v13, %v1124_v61  ;;  %858 = vadd.xlane.f32.xlu1 %v1786_v4  ;;  %852 = vadd.xlane.f32.xlu0 %v1789_v42  ;;  %v1794_v49 = vmul.f32 %v1449_v51, %v785_v16 }
 0x309   :  { %v797_v45 = vpop.f32.mrf.mxu1 }
 0x30a   :  { %v798_v19 = vadd.f32 %v1124_v61, %v797_v45  ;;  %v1797_v50 = vmul.f32 %v1449_v51, %v806_v43 }
 0x30b   :  { %v1226_v53 = vpop.f32.mrf.mxu1 }
 0x30c   :  { %v809_v25 = vadd.f32 %v1226_v53, %v1124_v61  ;;  %854 = vadd.xlane.f32.xlu1 %v1794_v49  ;;  %864 = vadd.xlane.f32.xlu0 %v1797_v50  ;;  %v1805_v33 = vmul.f32 %v1449_v51, %v798_v19 }
 0x30d   :  { %v800_v54 = vpop.f32.mrf.mxu1 }
 0x30e   :  { %v801_v24 = vadd.f32 %v1124_v61, %v800_v54  ;;  %v1802_v2 = vmul.f32 %v1449_v51, %v809_v25 }
 0x30f   :  { %v1229_v55 = vpop.f32.mrf.mxu1 }
 0x310   :  { %866 = vadd.xlane.f32.xlu1 %v1802_v2  ;;  %860 = vadd.xlane.f32.xlu0 %v1805_v33  ;;  %v1810_v58 = vmul.f32 %v1449_v51, %v801_v24  ;;  %v822_v60 = vadd.f32 %v1229_v55, %v1124_v61 }
 0x311   :  { %v813_v39 = vpop.f32.mrf.mxu1 }
 0x312   :  { %v814_v56 = vadd.f32 %v1124_v61, %v813_v39  ;;  %v1821_v57 = vmul.f32 %v1449_v51, %v822_v60 }
 0x313   :  { %v1230_v59 = vpop.f32.mrf.mxu1 }
 0x314   :  { %862 = vadd.xlane.f32.xlu1 %v1810_v58  ;;  %v1814_v63 = vmul.f32 %v1449_v51, %v814_v56  ;;  %v825_v29 = vadd.f32 %v1230_v59, %v1124_v61 }
 0x315   :  { %v816_v1 = vpop.f32.mrf.mxu1 }
 0x316   :  { %v817_v35 = vadd.f32 %v1124_v61, %v816_v1  ;;  %868 = vadd.xlane.f32.xlu0 %v1814_v63  ;;  %v1826_v5 = vmul.f32 %v1449_v51, %v825_v29 }
 0x318   :  { %v1818_v47 = vmul.f32 %v1449_v51, %v817_v35 }
 0x31a   :  { %870 = vadd.xlane.f32.xlu1 %v1818_v47  ;;  %872 = vadd.xlane.f32.xlu0 %v1821_v57 }
 0x31e   :  { %874 = vadd.xlane.f32.xlu1 %v1826_v5 }
 0x37e   :  { %v849_v7 = vpop.xlane.xlu0 %848 }
 0x37f   :  { %v878_v9 = vmul.f32 0.03125, %v849_v7 }
 0x381   :  { %v894_v10 = vsub.f32 %v1766_v12, %v878_v9 }
 0x382   :  { %v851_v34 = vpop.xlane.xlu1 %850  ;;  %v845_v14 = vpop.xlane.xlu0 %844 }
 0x383   :  { %v879_v48 = vmul.f32 0.03125, %v851_v34  ;;  %v876_v8 = vmul.f32 0.03125, %v845_v14  ;;  %v1831_v37 = vmul.f32 %v1449_v51, %v894_v10 }
 0x385   :  { %v895_v17 = vsub.f32 %v1770_v32, %v879_v48  ;;  %v892_v40 = vsub.f32 %v1773_v6, %v876_v8  ;;  %v926_v20 = vmul.f32 %v1831_v37, %v1831_v37 }
 0x386   :  { %v847_v21 = vpop.xlane.xlu1 %846 }
 0x387   :  { %v877_v23 = vmul.f32 0.03125, %v847_v21  ;;  %944 = vadd.xlane.f32.xlu0 %v926_v20  ;;  %v1838_v26 = vmul.f32 %v1449_v51, %v895_v17  ;;  %v1841_v61 = vmul.f32 %v1449_v51, %v892_v40 }
 0x389   :  { %v893_v44 = vsub.f32 %v1778_v0, %v877_v23  ;;  %v927_v11 = vmul.f32 %v1838_v26, %v1838_v26  ;;  %v924_v46 = vmul.f32 %v1841_v61, %v1841_v61 }
 0x38b   :  { %946 = vadd.xlane.f32.xlu1 %v927_v11  ;;  %940 = vadd.xlane.f32.xlu0 %v924_v46  ;;  %v1849_v27 = vmul.f32 %v1449_v51, %v893_v44 }
 0x38d   :  { %v857_v12 = vpop.xlane.xlu0 %856  ;;  %v925_v28 = vmul.f32 %v1849_v27, %v1849_v27 }
 0x38e   :  { %v882_v52 = vmul.f32 0.03125, %v857_v12 }
 0x38f   :  { %942 = vadd.xlane.f32.xlu1 %v925_v28 }
 0x390   :  { %v898_v22 = vsub.f32 %v1782_v41, %v882_v52 }
 0x391   :  { %v859_v30 = vpop.xlane.xlu1 %858  ;;  %v853_v32 = vpop.xlane.xlu0 %852 }
 0x392   :  { %v883_v6 = vmul.f32 0.03125, %v859_v30  ;;  %v880_v0 = vmul.f32 0.03125, %v853_v32  ;;  %v1855_v15 = vmul.f32 %v1449_v51, %v898_v22 }
 0x394   :  { %v899_v62 = vsub.f32 %v1786_v4, %v883_v6  ;;  %v896_v3 = vsub.f32 %v1789_v42, %v880_v0  ;;  %v930_v38 = vmul.f32 %v1855_v15, %v1855_v15 }
 0x395   :  { %v855_v31 = vpop.xlane.xlu1 %854  ;;  %v865_v18 = vpop.xlane.xlu0 %864 }
 0x396   :  { %v881_v36 = vmul.f32 0.03125, %v855_v31  ;;  %v886_v16 = vmul.f32 0.03125, %v865_v18  ;;  %952 = vadd.xlane.f32.xlu0 %v930_v38  ;;  %v1862_v41 = vmul.f32 %v1449_v51, %v899_v62  ;;  %v1865_v13 = vmul.f32 %v1449_v51, %v896_v3 }
 0x398   :  { %v897_v43 = vsub.f32 %v1794_v49, %v881_v36  ;;  %v902_v4 = vsub.f32 %v1797_v50, %v886_v16  ;;  %v931_v42 = vmul.f32 %v1862_v41, %v1862_v41  ;;  %v928_v45 = vmul.f32 %v1865_v13, %v1865_v13 }
 0x399   :  { %v867_v19 = vpop.xlane.xlu1 %866  ;;  %v861_v53 = vpop.xlane.xlu0 %860 }
 0x39a   :  { %v887_v25 = vmul.f32 0.03125, %v867_v19  ;;  %v884_v54 = vmul.f32 0.03125, %v861_v53  ;;  %954 = vadd.xlane.f32.xlu1 %v931_v42  ;;  %948 = vadd.xlane.f32.xlu0 %v928_v45  ;;  %v1874_v24 = vmul.f32 %v1449_v51, %v897_v43  ;;  %v1877_v55 = vmul.f32 %v1449_v51, %v902_v4  ;;  %v1928_v4 = vld [vmem:[%s2036_s4 + $0x4] ss:$0 sm:$0xff] }
 0x39c   :  { %v903_v49 = vsub.f32 %v1802_v2, %v887_v25  ;;  %v900_v50 = vsub.f32 %v1805_v33, %v884_v54  ;;  %v929_v39 = vmul.f32 %v1874_v24, %v1874_v24  ;;  %v934_v56 = vmul.f32 %v1877_v55, %v1877_v55  ;;  %v1934_v25 = vld [vmem:[%s2036_s4 + $0x5] ss:$0 sm:$0xff] }
 0x39d   :  { %v863_v59 = vpop.xlane.xlu1 %862 }
 0x39e   :  { %v885_v60 = vmul.f32 0.03125, %v863_v59  ;;  %950 = vadd.xlane.f32.xlu1 %v929_v39  ;;  %960 = vadd.xlane.f32.xlu0 %v934_v56  ;;  %v1886_v1 = vmul.f32 %v1449_v51, %v903_v49  ;;  %v1889_v35 = vmul.f32 %v1449_v51, %v900_v50 }
 0x39f   :  { %v869_v29 = vpop.xlane.xlu0 %868 }
 0x3a0   :  { %v901_v2 = vsub.f32 %v1810_v58, %v885_v60  ;;  %v888_v33 = vmul.f32 0.03125, %v869_v29  ;;  %v935_v7 = vmul.f32 %v1886_v1, %v1886_v1  ;;  %v932_v9 = vmul.f32 %v1889_v35, %v1889_v35 }
 0x3a2   :  { %v904_v10 = vsub.f32 %v1814_v63, %v888_v33  ;;  %962 = vadd.xlane.f32.xlu1 %v935_v7  ;;  %956 = vadd.xlane.f32.xlu0 %v932_v9  ;;  %v1898_v34 = vmul.f32 %v1449_v51, %v901_v2 }
 0x3a3   :  { %v871_v14 = vpop.xlane.xlu1 %870  ;;  %v873_v48 = vpop.xlane.xlu0 %872 }
 0x3a4   :  { %v889_v8 = vmul.f32 0.03125, %v871_v14  ;;  %v890_v17 = vmul.f32 0.03125, %v873_v48  ;;  %v933_v58 = vmul.f32 %v1898_v34, %v1898_v34  ;;  %v1903_v40 = vmul.f32 %v1449_v51, %v904_v10 }
 0x3a6   :  { %v905_v20 = vsub.f32 %v1818_v47, %v889_v8  ;;  %v906_v21 = vsub.f32 %v1821_v57, %v890_v17  ;;  %958 = vadd.xlane.f32.xlu1 %v933_v58  ;;  %v936_v63 = vmul.f32 %v1903_v40, %v1903_v40 }
 0x3a7   :  { %v875_v23 = vpop.xlane.xlu1 %874 }
 0x3a8   :  { %v891_v44 = vmul.f32 0.03125, %v875_v23  ;;  %964 = vadd.xlane.f32.xlu0 %v936_v63  ;;  %v1910_v11 = vmul.f32 %v1449_v51, %v905_v20  ;;  %v1913_v46 = vmul.f32 %v1449_v51, %v906_v21 }
 0x3aa   :  { %v907_v12 = vsub.f32 %v1826_v5, %v891_v44  ;;  %v937_v47 = vmul.f32 %v1910_v11, %v1910_v11  ;;  %v938_v57 = vmul.f32 %v1913_v46, %v1913_v46 }
 0x3ac   :  { %966 = vadd.xlane.f32.xlu1 %v937_v47  ;;  %968 = vadd.xlane.f32.xlu0 %v938_v57  ;;  %v1921_v28 = vmul.f32 %v1449_v51, %v907_v12 }
 0x3ae   :  { %v939_v52 = vmul.f32 %v1921_v28, %v1921_v28 }
 0x3b0   :  { %970 = vadd.xlane.f32.xlu1 %v939_v52 }
 0x410   :  { %v945_v22 = vpop.xlane.xlu0 %944 }
 0x411   :  { %v974_v30 = vmul.f32 0.03125, %v945_v22 }
 0x413   :  { %v990_v32 = vadd.f32 1e-05, %v974_v30 }
 0x414   :  { %v947_v6 = vpop.xlane.xlu1 %946  ;;  %v941_v5 = vpop.xlane.xlu0 %940 }
 0x415   :  { %1282 = vrsqrt.f32 %v990_v32  ;;  %v975_v0 = vmul.f32 0.03125, %v947_v6  ;;  %v972_v62 = vmul.f32 0.03125, %v941_v5 }
 0x417   :  { %v991_v3 = vadd.f32 1e-05, %v975_v0  ;;  %v988_v38 = vadd.f32 1e-05, %v972_v62 }
 0x418   :  { %v943_v31 = vpop.xlane.xlu1 %942 }
 0x419   :  { %1284 = vrsqrt.f32 %v991_v3  ;;  %v973_v18 = vmul.f32 0.03125, %v943_v31 }
 0x41a   :  { %1286 = vrsqrt.f32 %v988_v38 }
 0x41b   :  { %v989_v51 = vadd.f32 1e-05, %v973_v18 }
 0x41d   :  { %1288 = vrsqrt.f32 %v989_v51 }
 0x41f   :  { %v953_v36 = vpop.xlane.xlu0 %952 }
 0x420   :  { %v978_v16 = vmul.f32 0.03125, %v953_v36 }
 0x422   :  { %v1283_v43 = vpop.eup %1282  ;;  %v994_v42 = vadd.f32 1e-05, %v978_v16 }
 0x423   :  { %v1022_v45 = vmul.f32 %v1283_v43, %v1831_v37  ;;  %v955_v19 = vpop.xlane.xlu1 %954  ;;  %v949_v53 = vpop.xlane.xlu0 %948 }
 0x424   :  { %1290 = vrsqrt.f32 %v994_v42  ;;  %v979_v54 = vmul.f32 0.03125, %v955_v19  ;;  %v976_v49 = vmul.f32 0.03125, %v949_v53 }
 0x425   :  { %v1042_v50 = vmul.f32 %v1928_v4, %v1022_v45 }
 0x426   :  { %v1285_v39 = vpop.eup %1284  ;;  %v995_v56 = vadd.f32 1e-05, %v979_v54  ;;  %v992_v59 = vadd.f32 1e-05, %v976_v49 }
 0x427   :  { %v1287_v60 = vpop.eup %1286  ;;  %v1062_v29 = vadd.f32 %v1934_v25, %v1042_v50  ;;  %v1023_v37 = vmul.f32 %v1285_v39, %v1838_v26  ;;  %v951_v2 = vpop.xlane.xlu1 %950 }
 0x428   :  { %v961_v33 = vpop.xlane.xlu0 %960  ;;  %v1020_v7 = vmul.f32 %v1287_v60, %v1841_v61  ;;  %1292 = vrsqrt.f32 %v995_v56  ;;  %v977_v9 = vmul.f32 0.03125, %v951_v2 }
 0x429   :  { %v982_v10 = vmul.f32 0.03125, %v961_v33  ;;  %v1078_v14 = vmax.f32 %v1062_v29, 0.0  ;;  %v1043_v48 = vmul.f32 %v1928_v4, %v1023_v37  ;;  %1294 = vrsqrt.f32 %v992_v59 }
 0x42a   :  { %v1289_v8 = vpop.eup %1288  ;;  %v1040_v17 = vmul.f32 %v1928_v4, %v1020_v7  ;;  %v993_v58 = vadd.f32 1e-05, %v977_v9 }
 0x42b   :  { %v998_v20 = vadd.f32 1e-05, %v982_v10  ;;  %1094 = vst [vmem:[%s2038_s7 + $0x10] sm:$0xff] %v1078_v14  ;;  %v1063_v26 = vadd.f32 %v1934_v25, %v1043_v48  ;;  %v1021_v61 = vmul.f32 %v1289_v8, %v1849_v27  ;;  %v963_v21 = vpop.xlane.xlu1 %962 }
 0x42c   :  { %v957_v63 = vpop.xlane.xlu0 %956  ;;  %v1060_v23 = vadd.f32 %v1934_v25, %v1040_v17  ;;  %1296 = vrsqrt.f32 %v993_v58  ;;  %v983_v44 = vmul.f32 0.03125, %v963_v21 }
 0x42d   :  { %v980_v12 = vmul.f32 0.03125, %v957_v63  ;;  %v1079_v47 = vmax.f32 %v1063_v26, 0.0  ;;  %v1041_v57 = vmul.f32 %v1928_v4, %v1021_v61  ;;  %1298 = vrsqrt.f32 %v998_v20 }
 0x42e   :  { %v1076_v52 = vmax.f32 %v1060_v23, 0.0  ;;  %v999_v22 = vadd.f32 1e-05, %v983_v44 }
 0x42f   :  { %v996_v30 = vadd.f32 1e-05, %v980_v12  ;;  %1095 = vst [vmem:[%s2038_s7 + $0x18] sm:$0xff] %v1079_v47  ;;  %v1061_v27 = vadd.f32 %v1934_v25, %v1041_v57  ;;  %v959_v32 = vpop.xlane.xlu1 %958 }
 0x430   :  { %1092 = vst [vmem:[%s2038_s7] sm:$0xff] %v1076_v52  ;;  %1300 = vrsqrt.f32 %v999_v22  ;;  %v981_v6 = vmul.f32 0.03125, %v959_v32 }
 0x431   :  { %v1291_v5 = vpop.eup %1290  ;;  %v1077_v0 = vmax.f32 %v1061_v27, 0.0  ;;  %1302 = vrsqrt.f32 %v996_v30  ;;  %v965_v62 = vpop.xlane.xlu0 %964 }
 0x432   :  { %v1026_v3 = vmul.f32 %v1291_v5, %v1855_v15  ;;  %v997_v38 = vadd.f32 1e-05, %v981_v6  ;;  %v984_v31 = vmul.f32 0.03125, %v965_v62 }
 0x433   :  { %1093 = vst [vmem:[%s2038_s7 + $0x8] sm:$0xff] %v1077_v0 }
 0x434   :  { %v1046_v18 = vmul.f32 %v1928_v4, %v1026_v3  ;;  %1304 = vrsqrt.f32 %v997_v38  ;;  %v1000_v51 = vadd.f32 1e-05, %v984_v31 }
 0x435   :  { %v1293_v36 = vpop.eup %1292  ;;  %v967_v16 = vpop.xlane.xlu1 %966 }
 0x436   :  { %v969_v43 = vpop.xlane.xlu0 %968  ;;  %v1295_v42 = vpop.eup %1294  ;;  %v1066_v45 = vadd.f32 %v1934_v25, %v1046_v18  ;;  %v1027_v19 = vmul.f32 %v1293_v36, %v1862_v41  ;;  %1306 = vrsqrt.f32 %v1000_v51  ;;  %v985_v15 = vmul.f32 0.03125, %v967_v16 }
 0x437   :  { %v1024_v53 = vmul.f32 %v1295_v42, %v1865_v13  ;;  %v986_v54 = vmul.f32 0.03125, %v969_v43 }
 0x438   :  { %v1082_v49 = vmax.f32 %v1066_v45, 0.0  ;;  %v1047_v50 = vmul.f32 %v1928_v4, %v1027_v19  ;;  %v1001_v39 = vadd.f32 1e-05, %v985_v15 }
 0x439   :  { %v1297_v56 = vpop.eup %1296  ;;  %v1044_v59 = vmul.f32 %v1928_v4, %v1024_v53  ;;  %v1002_v60 = vadd.f32 1e-05, %v986_v54  ;;  %v971_v29 = vpop.xlane.xlu1 %970 }
 0x43a   :  { %v1299_v37 = vpop.eup %1298  ;;  %1098 = vst [vmem:[%s2038_s7 + $0x30] sm:$0xff] %v1082_v49  ;;  %v1067_v41 = vadd.f32 %v1934_v25, %v1047_v50  ;;  %v1025_v2 = vmul.f32 %v1297_v56, %v1874_v24  ;;  %1308 = vrsqrt.f32 %v1001_v39  ;;  %v987_v13 = vmul.f32 0.03125, %v971_v29 }
 0x43b   :  { %v1064_v33 = vadd.f32 %v1934_v25, %v1044_v59  ;;  %v1030_v7 = vmul.f32 %v1299_v37, %v1877_v55  ;;  %1310 = vrsqrt.f32 %v1002_v60 }
 0x43c   :  { %v1083_v9 = vmax.f32 %v1067_v41, 0.0  ;;  %v1045_v10 = vmul.f32 %v1928_v4, %v1025_v2  ;;  %v1003_v14 = vadd.f32 1e-05, %v987_v13 }
 0x43d   :  { %v1301_v48 = vpop.eup %1300  ;;  %v1080_v8 = vmax.f32 %v1064_v33, 0.0  ;;  %v1050_v17 = vmul.f32 %v1928_v4, %v1030_v7 }
 0x43e   :  { %v1303_v58 = vpop.eup %1302  ;;  %1099 = vst [vmem:[%s2038_s7 + $0x38] sm:$0xff] %v1083_v9  ;;  %v1065_v24 = vadd.f32 %v1934_v25, %v1045_v10  ;;  %v1031_v20 = vmul.f32 %v1301_v48, %v1886_v1  ;;  %1312 = vrsqrt.f32 %v1003_v14 }
 0x43f   :  { %1096 = vst [vmem:[%s2038_s7 + $0x20] sm:$0xff] %v1080_v8  ;;  %v1070_v55 = vadd.f32 %v1934_v25, %v1050_v17  ;;  %v1028_v26 = vmul.f32 %v1303_v58, %v1889_v35 }
 0x440   :  { %v1081_v61 = vmax.f32 %v1065_v24, 0.0  ;;  %v1051_v21 = vmul.f32 %v1928_v4, %v1031_v20 }
 0x441   :  { %v1305_v63 = vpop.eup %1304  ;;  %v1086_v23 = vmax.f32 %v1070_v55, 0.0  ;;  %v1048_v44 = vmul.f32 %v1928_v4, %v1028_v26 }
 0x442   :  { %1097 = vst [vmem:[%s2038_s7 + $0x28] sm:$0xff] %v1081_v61  ;;  %v1071_v1 = vadd.f32 %v1934_v25, %v1051_v21  ;;  %v1029_v12 = vmul.f32 %v1305_v63, %v1898_v34 }
 0x443   :  { %v1307_v47 = vpop.eup %1306  ;;  %1102 = vst [vmem:[%s2038_s7 + $0x50] sm:$0xff] %v1086_v23  ;;  %v1068_v35 = vadd.f32 %v1934_v25, %v1048_v44 }
 0x444   :  { %v1087_v57 = vmax.f32 %v1071_v1, 0.0  ;;  %v1049_v52 = vmul.f32 %v1928_v4, %v1029_v12  ;;  %v1032_v22 = vmul.f32 %v1307_v47, %v1903_v40 }
 0x445   :  { %v1084_v30 = vmax.f32 %v1068_v35, 0.0 }
 0x446   :  { %1103 = vst [vmem:[%s2038_s7 + $0x58] sm:$0xff] %v1087_v57  ;;  %v1069_v27 = vadd.f32 %v1934_v25, %v1049_v52  ;;  %v1052_v34 = vmul.f32 %v1928_v4, %v1032_v22 }
 0x447   :  { %v1309_v32 = vpop.eup %1308  ;;  %1100 = vst [vmem:[%s2038_s7 + $0x40] sm:$0xff] %v1084_v30 }
 0x448   :  { %v1311_v6 = vpop.eup %1310  ;;  %v1085_v5 = vmax.f32 %v1069_v27, 0.0  ;;  %v1072_v0 = vadd.f32 %v1934_v25, %v1052_v34  ;;  %v1033_v40 = vmul.f32 %v1309_v32, %v1910_v11 }
 0x449   :  { %v1034_v62 = vmul.f32 %v1311_v6, %v1913_v46 }
 0x44a   :  { %1101 = vst [vmem:[%s2038_s7 + $0x48] sm:$0xff] %v1085_v5  ;;  %v1088_v3 = vmax.f32 %v1072_v0, 0.0  ;;  %v1053_v38 = vmul.f32 %v1928_v4, %v1033_v40 }
 0x44b   :  { %v1313_v31 = vpop.eup %1312  ;;  %v1054_v18 = vmul.f32 %v1928_v4, %v1034_v62 }
 0x44c   :  { %1104 = vst [vmem:[%s2038_s7 + $0x60] sm:$0xff] %v1088_v3  ;;  %v1073_v51 = vadd.f32 %v1934_v25, %v1053_v38  ;;  %v1035_v11 = vmul.f32 %v1313_v31, %v1921_v28 }
 0x44d   :  { %v1074_v46 = vadd.f32 %v1934_v25, %v1054_v18 }
 0x44e   :  { %v1089_v36 = vmax.f32 %v1073_v51, 0.0  ;;  %v1055_v16 = vmul.f32 %v1928_v4, %v1035_v11 }
 0x44f   :  { %v1090_v43 = vmax.f32 %v1074_v46, 0.0 }
 0x450   :  { %1105 = vst [vmem:[%s2038_s7 + $0x68] sm:$0xff] %v1089_v36  ;;  %v1075_v42 = vadd.f32 %v1934_v25, %v1055_v16 }
 0x451   :  { %1106 = vst [vmem:[%s2038_s7 + $0x70] sm:$0xff] %v1090_v43 }
 0x452   :  { %v1091_v45 = vmax.f32 %v1075_v42, 0.0 }
 0x454   :  { %1107 = vst [vmem:[%s2038_s7 + $0x78] sm:$0xff] %v1091_v45 }

// kernel: dsnetwork_forward.17
= control target key start
LH: loop header
LB: loop body
LE: loop exit
PB: predicated region body
PF: predicated region fallthrough
CT: control target
= control target key end

     0   :  { %v454_v0 = vmov 0.0   ;;  %vm455_vm0 = vmmov 0   ;;  %s629_s1 = inlined_call_operand.vmem [shape: f32[128,128], index: 1, kind: input, shape index: {}]   ;;  %s630_s2 = inlined_call_operand.vmem [shape: bf16[128,128], index: 2, kind: input, shape index: {}]   ;;  %s631_s0 = inlined_call_operand.vmem [shape: bf16[8,128], index: 0, kind: input, shape index: {}]   ;;  %s632_s4 = inlined_call_operand.vmem [shape: bf16[128,128], index: 4, kind: input, shape index: {}]   ;;  %s633_s3 = inlined_call_operand.vmem [shape: f32[1,128], index: 3, kind: input, shape index: {}]   ;;  %s634_s5 = inlined_call_operand.vmem [shape: f32[1,128], index: 5, kind: input, shape index: {}]   ;;  %s635_s6 = inlined_call_operand.vmem [shape: f32[8,128], index: 6, kind: output, shape index: {}]  }
   0x1   :  { %376 = vmatprep.subr.bf16.mxu0 %v454_v0  ;;  %v45_v1 = vld [vmem:[%s629_s1 + $0x70] sm:$0xff]  ;;  %v46_v2 = vld [vmem:[%s629_s1 + $0x78] sm:$0xff]  ;;  %v43_v3 = vld [vmem:[%s629_s1 + $0x60] sm:$0xff]  ;;  %392 = vmatprep.mubr.msk.bf16.mxu0 %vm455_vm0, %v454_v0 }
   0x2   :  { %v54_v4 = vpack.c.bf16 %v46_v2, %v45_v1  ;;  %v44_v5 = vld [vmem:[%s629_s1 + $0x68] sm:$0xff]  ;;  %396 = vmatprep.subr.bf16.mxu1 %v454_v0  ;;  %412 = vmatprep.mubr.msk.bf16.mxu1 %vm455_vm0, %v454_v0  ;;  %v41_v7 = vld [vmem:[%s629_s1 + $0x50] sm:$0xff]  ;;  %v42_v8 = vld [vmem:[%s629_s1 + $0x58] sm:$0xff] }
   0x3   :  { %v53_v6 = vpack.c.bf16 %v44_v5, %v43_v3  ;;  %v39_v9 = vld [vmem:[%s629_s1 + $0x40] sm:$0xff]  ;;  %v438_v10 = vld [vmem:[%s630_s2 + $0x38] sm:$0xff]   ;;  %v52_v11 = vpack.c.bf16 %v42_v8, %v41_v7  ;;  %v40_v12 = vld [vmem:[%s629_s1 + $0x48] sm:$0xff] }
   0x4   :  { %377 = vmatpush3.bf16.msra.mxu0 %v54_v4  ;;  %397 = vmatpush3.bf16.msra.mxu1 %v438_v10  ;;  %v439_v13 = vld [vmem:[%s630_s2 + $0x30] sm:$0xff]   ;;  %v51_v15 = vpack.c.bf16 %v40_v12, %v39_v9  ;;  %v38_v16 = vld [vmem:[%s629_s1 + $0x38] sm:$0xff]  ;;  %v440_v17 = vld [vmem:[%s630_s2 + $0x28] sm:$0xff]  }
   0x5   :  { %378 = vmatprep.subr.bf16.mxu0 %v454_v0  ;;  %398 = vmatprep.subr.bf16.mxu1 %v454_v0  ;;  %v37_v14 = vld [vmem:[%s629_s1 + $0x30] sm:$0xff]  ;;  %v35_v19 = vld [vmem:[%s629_s1 + $0x20] sm:$0xff]  ;;  %v36_v20 = vld [vmem:[%s629_s1 + $0x28] sm:$0xff] }
   0x6   :  { %v50_v18 = vpack.c.bf16 %v38_v16, %v37_v14  ;;  %v441_v21 = vld [vmem:[%s630_s2 + $0x20] sm:$0xff]   ;;  %v49_v22 = vpack.c.bf16 %v36_v20, %v35_v19  ;;  %v33_v23 = vld [vmem:[%s629_s1 + $0x10] sm:$0xff]  ;;  %v34_v24 = vld [vmem:[%s629_s1 + $0x18] sm:$0xff] }
   0x7   :  { %v442_v25 = vld [vmem:[%s630_s2 + $0x18] sm:$0xff]   ;;  %v48_v26 = vpack.c.bf16 %v34_v24, %v33_v23  ;;  %v31_v27 = vld [vmem:[%s629_s1] sm:$0xff]  ;;  %v32_v28 = vld [vmem:[%s629_s1 + $0x8] sm:$0xff] }
   0x8   :  { %379 = vmatpush3.bf16.msra.mxu0 %v53_v6  ;;  %399 = vmatpush3.bf16.msra.mxu1 %v439_v13  ;;  %v443_v29 = vld [vmem:[%s630_s2 + $0x10] sm:$0xff]   ;;  %v47_v30 = vpack.c.bf16 %v32_v28, %v31_v27  ;;  %v444_v31 = vld [vmem:[%s630_s2 + $0x8] sm:$0xff]   ;;  %v30_v32 = vld [vmem:[%s631_s0] sm:$0xf] }
   0x9   :  { %380 = vmatprep.subr.bf16.mxu0 %v454_v0  ;;  %400 = vmatprep.subr.bf16.mxu1 %v454_v0  ;;  %v445_v33 = vld [vmem:[%s630_s2] sm:$0xff]   ;;  %v446_v34 = vld [vmem:[%s632_s4 + $0x38] sm:$0xff]   ;;  %v447_v35 = vld [vmem:[%s632_s4 + $0x30] sm:$0xff]  }
   0xa   :  { %v448_v36 = vld [vmem:[%s632_s4 + $0x28] sm:$0xff]   ;;  %v449_v37 = vld [vmem:[%s632_s4 + $0x20] sm:$0xff]   ;;  %v450_v38 = vld [vmem:[%s632_s4 + $0x18] sm:$0xff]  }
   0xb   :  { %v451_v39 = vld [vmem:[%s632_s4 + $0x10] sm:$0xff]   ;;  %v452_v45 = vld [vmem:[%s632_s4 + $0x8] sm:$0xff]   ;;  %v453_v46 = vld [vmem:[%s632_s4] sm:$0xff]  }
   0xc   :  { %381 = vmatpush3.bf16.msra.mxu0 %v52_v11  ;;  %401 = vmatpush3.bf16.msra.mxu1 %v440_v17  ;;  %v331_v47 = vld [vmem:[%s633_s3] ss:$0 sm:$0xff] }
   0xd   :  { %382 = vmatprep.subr.bf16.mxu0 %v454_v0  ;;  %402 = vmatprep.subr.bf16.mxu1 %v454_v0  ;;  %v340_v55 = vld [vmem:[%s634_s5] ss:$0 sm:$0xff] }
  0x10   :  { %383 = vmatpush3.bf16.msra.mxu0 %v51_v15  ;;  %403 = vmatpush3.bf16.msra.mxu1 %v441_v21 }
  0x11   :  { %384 = vmatprep.subr.bf16.mxu0 %v454_v0  ;;  %404 = vmatprep.subr.bf16.mxu1 %v454_v0 }
  0x14   :  { %385 = vmatpush3.bf16.msra.mxu0 %v50_v18  ;;  %405 = vmatpush3.bf16.msra.mxu1 %v442_v25 }
  0x15   :  { %386 = vmatprep.subr.bf16.mxu0 %v454_v0  ;;  %406 = vmatprep.subr.bf16.mxu1 %v454_v0 }
  0x18   :  { %387 = vmatpush3.bf16.msra.mxu0 %v49_v22  ;;  %407 = vmatpush3.bf16.msra.mxu1 %v443_v29 }
  0x19   :  { %388 = vmatprep.subr.bf16.mxu0 %v454_v0  ;;  %408 = vmatprep.subr.bf16.mxu1 %v454_v0 }
  0x1c   :  { %389 = vmatpush3.bf16.msra.mxu0 %v48_v26  ;;  %409 = vmatpush3.bf16.msra.mxu1 %v444_v31 }
  0x1d   :  { %390 = vmatprep.subr.bf16.mxu0 %v454_v0  ;;  %410 = vmatprep.subr.bf16.mxu1 %v454_v0 }
  0x20   :  { %391 = vmatpush3.bf16.msra.mxu0 %v47_v30  ;;  %411 = vmatpush3.bf16.msra.mxu1 %v445_v33 }
  0x21   :  { %416 = vmatprep.subr.bf16.mxu0 %v454_v0 }
  0x23   :  { %393 = vmatmul.mubr.bf16.vlgmr.msra.gmra.mxu0 %v30_v32 }
  0x24   :  { %432 = vmatprep.mubr.msk.bf16.mxu0 %vm455_vm0, %v454_v0  ;;  %417 = vmatpush3.bf16.msra.mxu0 %v446_v34 }
  0x25   :  { %418 = vmatprep.subr.bf16.mxu0 %v454_v0 }
  0x28   :  { %419 = vmatpush3.bf16.msra.mxu0 %v447_v35 }
  0x29   :  { %420 = vmatprep.subr.bf16.mxu0 %v454_v0 }
  0x2c   :  { %421 = vmatpush3.bf16.msra.mxu0 %v448_v36 }
  0x2d   :  { %422 = vmatprep.subr.bf16.mxu0 %v454_v0 }
  0x30   :  { %423 = vmatpush3.bf16.msra.mxu0 %v449_v37 }
  0x31   :  { %424 = vmatprep.subr.bf16.mxu0 %v454_v0 }
  0x34   :  { %425 = vmatpush3.bf16.msra.mxu0 %v450_v38 }
  0x35   :  { %426 = vmatprep.subr.bf16.mxu0 %v454_v0 }
  0x38   :  { %427 = vmatpush3.bf16.msra.mxu0 %v451_v39 }
  0x39   :  { %428 = vmatprep.subr.bf16.mxu0 %v454_v0 }
  0x3c   :  { %429 = vmatpush3.bf16.msra.mxu0 %v452_v45 }
  0x3d   :  { %430 = vmatprep.subr.bf16.mxu0 %v454_v0 }
  0x40   :  { %431 = vmatpush3.bf16.msra.mxu0 %v453_v46 }
  0xe3   :  { %v89_v40 = vpop.f32.mrf.mxu0 }
  0xe4   :  { %v101_v41 = vpack.c.bf16 %v89_v40, %v89_v40 }
  0xe5   :  { %v394_v42 = vpop.f32.mrf.mxu0 }
  0xe6   :  { %413 = vmatmul.mubr.bf16.vlgmr.msra.gmra.mxu1 %v101_v41 }
  0xe7   :  { %v92_v43 = vpop.f32.mrf.mxu0 }
  0xe9   :  { %v395_v44 = vpop.f32.mrf.mxu0 }
 0x1a6   :  { %v207_v48 = vpop.f32.mrf.mxu1 }
 0x1a7   :  { %v208_v49 = vadd.f32 %v331_v47, %v207_v48 }
 0x1a8   :  { %v414_v50 = vpop.f32.mrf.mxu1 }
 0x1a9   :  { %v213_v51 = vmax.f32 %v208_v49, 0.0 }
 0x1aa   :  { %v210_v52 = vpop.f32.mrf.mxu1 }
 0x1ab   :  { %v214_v53 = vpack.c.bf16 %v213_v51, %v213_v51 }
 0x1ac   :  { %v415_v54 = vpop.f32.mrf.mxu1 }
 0x1ad   :  { %433 = vmatmul.mubr.bf16.vlgmr.msra.gmra.mxu0 %v214_v53 }
 0x26d   :  { %v320_v56 = vpop.f32.mrf.mxu0 }
 0x26e   :  { %v321_v57 = vadd.f32 %v340_v55, %v320_v56 }
 0x26f   :  { %v434_v58 = vpop.f32.mrf.mxu0 }
 0x270   :  { %326 = vst [vmem:[%s635_s6] sm:$0xff] %v321_v57 }
 0x271   :  { %v323_v59 = vpop.f32.mrf.mxu0 }
 0x273   :  { %v435_v60 = vpop.f32.mrf.mxu0 }

</bundles_post_ra>
